<compile_context>
chip_gen: v5e
topology: v5e:2x2
jax: 0.10.0
libtpu: 0.0.40
codegen_flags: <defaults>
</compile_context>

<pallas_src>
import functools

import jax
import jax.numpy as jnp
from jax.experimental import pallas as pl
from jax.experimental.pallas import tpu as pltpu


# ----------------------------- kernel ---------------------------------------

def _layer_norm(x, w, eps=1e-5):
    # F.layer_norm over last dim, weight only (LayerNormWithoutBias), f32 math.
    mu = jnp.mean(x, axis=-1, keepdims=True)
    xc = x - mu
    var = jnp.mean(xc * xc, axis=-1, keepdims=True)
    return xc * jax.lax.rsqrt(var + eps) * w


def metaformer_block_kernel(x_ref, ln1_ref, wqkv_ref, wo_ref, ln2_ref,
                            wfc1_ref, wfc2_ref, sr_ref,
                            o_ref, attn_ref,
                            *, n_heads, head_dim):
    x = x_ref[...]                                     # [N, D] f32, one batch
    d = x.shape[-1]

    # ---- norm1 (f32) + fused Q/K/V projection: one lane-dense K=D matmul ----
    xn = _layer_norm(x, ln1_ref[...])
    qkv = jnp.dot(xn.astype(jnp.bfloat16), wqkv_ref[...],
                  preferred_element_type=jnp.float32)            # [N, 3D] f32
    qkvb = qkv.astype(jnp.bfloat16)                    # cast once, slice after

    # ---- per-head attention; head outputs land in a [N, D] bf16 scratch at
    #      static lane offset h*hd (no concat, no per-head Wo matmul) ----
    for h in range(n_heads):                           # static unrolled loop
        lo = h * head_dim
        qb = qkvb[:, lo:lo + head_dim]                 # scale folded into Wq
        kb = qkvb[:, d + lo:d + lo + head_dim]
        vb = qkvb[:, 2 * d + lo:2 * d + lo + head_dim]
        s = jax.lax.dot_general(
            qb, kb, (((1,), (1,)), ((), ())),
            preferred_element_type=jnp.float32)                  # [N, N] f32
        m = jnp.max(s, axis=-1, keepdims=True)
        e = jnp.exp(s - m)
        denom = jnp.sum(e, axis=-1, keepdims=True)
        p = e * pl.reciprocal(denom, approx=True)      # denom >= 1, safe
        o_bh = jnp.dot(p.astype(jnp.bfloat16), vb,
                       preferred_element_type=jnp.float32)       # [N, hd] f32
        attn_ref[:, lo:lo + head_dim] = o_bh.astype(jnp.bfloat16)

    # ---- output projection: single K=D matmul across all heads ----
    mixed = jnp.dot(attn_ref[...], wo_ref[...],
                    preferred_element_type=jnp.float32)          # [N, D] f32

    # res_scale1 = Identity, drop_path1 = Identity
    x1 = x + mixed

    # ---- norm2 + MLP (fc1 -> StarReLU -> fc2), dropout p=0 ----
    xn2 = _layer_norm(x1, ln2_ref[...])
    h1 = jnp.dot(xn2.astype(jnp.bfloat16), wfc1_ref[...],
                 preferred_element_type=jnp.float32)             # [N, 4D] f32
    r = jnp.maximum(h1, 0.0)
    act = sr_ref[0] * (r * r) + sr_ref[1]              # StarReLU, f32 (v5e-safe)
    h2 = jnp.dot(act.astype(jnp.bfloat16), wfc2_ref[...],
                 preferred_element_type=jnp.float32)             # [N, D] f32

    # res_scale2 = Identity, drop_path2 = Identity
    o_ref[...] = x1 + h2


# ----------------------------- wrapper ---------------------------------------

def metaformer_block(x, params, *, n_heads, head_dim):
    """x: [B, H, W, D] float32 -> (y: [B, H, W, D], clusters=None)."""
    B, H, W, D = x.shape
    N = H * W
    scale = head_dim ** -0.5

    # Fused QKV weight [D, 3D] (bf16), attention scale folded into Wq.
    # Column packing matches the PyTorch rearranges 'b n (h d)' (to_q) and
    # 'b n (k h d)' with k=2 (to_kv: k-columns then v-columns).  For a real
    # checkpoint: wq = to_q.weight.T, wk = to_kv.weight[:D].T,
    # wv = to_kv.weight[D:].T before this fuse.
    wqkv = jnp.concatenate(
        [params["wq"] * scale, params["wk"], params["wv"]],
        axis=1).astype(jnp.bfloat16)
    wo = params["wo"].astype(jnp.bfloat16)
    wfc1 = params["wfc1"].astype(jnp.bfloat16)
    wfc2 = params["wfc2"].astype(jnp.bfloat16)
    sr = jnp.array([params["sr_scale"], params["sr_bias"]], jnp.float32)

    xt = x.reshape(B * N, D).astype(jnp.float32)

    kernel = functools.partial(metaformer_block_kernel,
                               n_heads=n_heads, head_dim=head_dim)

    def const_spec(shape):                      # weights: resident across grid
        return pl.BlockSpec(shape, lambda b: (0, 0))

    out = pl.pallas_call(
        kernel,
        out_shape=jax.ShapeDtypeStruct((B * N, D), jnp.float32),
        grid=(B,),
        in_specs=[
            pl.BlockSpec((N, D), lambda b: (b, 0)),     # x    [N, D]  f32
            const_spec((1, D)),                         # ln1  [1, D]  f32
            const_spec((D, 3 * D)),                     # Wqkv [D, 3D] bf16
            const_spec((D, D)),                         # Wo   [D, D]  bf16
            const_spec((1, D)),                         # ln2  [1, D]  f32
            const_spec((D, 4 * D)),                     # fc1  [D, 4D] bf16
            const_spec((4 * D, D)),                     # fc2  [4D, D] bf16
            pl.BlockSpec(memory_space=pltpu.MemorySpace.SMEM),  # StarReLU
        ],
        out_specs=pl.BlockSpec((N, D), lambda b: (b, 0)),
        scratch_shapes=[pltpu.VMEM((N, D), jnp.bfloat16)],      # head outputs
        compiler_params=pltpu.CompilerParams(
            dimension_semantics=("parallel",),
            vmem_limit_bytes=64 * 1024 * 1024),
    )(xt, params["ln1"], wqkv, wo, params["ln2"], wfc1, wfc2, sr)
    return out.reshape(B, H, W, D), None


# ----------------------------- reference (pure JAX, f32) ----------------------

def metaformer_block_ref(x, params, *, n_heads, head_dim):
    B, H, W, D = x.shape
    N = H * W
    xt = x.reshape(B, N, D).astype(jnp.float32)

    def ln(v, w):
        mu = jnp.mean(v, -1, keepdims=True)
        var = jnp.mean((v - mu) ** 2, -1, keepdims=True)
        return (v - mu) / jnp.sqrt(var + 1e-5) * w

    xn = ln(xt, params["ln1"][0])
    q = xn @ params["wq"]
    k = xn @ params["wk"]
    v = xn @ params["wv"]

    def split_heads(t):  # [B, N, D] -> [B, h, N, hd]
        return t.reshape(B, N, n_heads, head_dim).transpose(0, 2, 1, 3)

    qh, kh, vh = split_heads(q), split_heads(k), split_heads(v)
    s = jnp.einsum("bhnd,bhmd->bhnm", qh, kh) * (head_dim ** -0.5)
    p = jax.nn.softmax(s, axis=-1)
    o = jnp.einsum("bhnm,bhmd->bhnd", p, vh)
    o = o.transpose(0, 2, 1, 3).reshape(B, N, D)
    mixed = o @ params["wo"]

    x1 = xt + mixed
    xn2 = ln(x1, params["ln2"][0])
    h1 = xn2 @ params["wfc1"]
    act = params["sr_scale"] * jnp.maximum(h1, 0.0) ** 2 + params["sr_bias"]
    y = x1 + act @ params["wfc2"]
    return y.reshape(B, H, W, D)


# ----------------------------- main -------------------------------------------

if __name__ == "__main__":
    B, H, W, D = 2, 8, 8, 128           # D multiple of 128 -> lane-dense blocks
    head_dim = 32
    n_heads = D // head_dim             # 4 heads (emb_dim // head_dim)
    hidden = 4 * D                      # MLP mlp_ratio = 4

    key = jax.random.PRNGKey(0)
    ks = jax.random.split(key, 8)
    std = 0.02
    params = {
        "ln1": jnp.ones((1, D), jnp.float32),
        "ln2": jnp.ones((1, D), jnp.float32),
        # Linear weights stored pre-transposed: [in, out]
        "wq":   std * jax.random.normal(ks[0], (D, D), jnp.float32),
        "wk":   std * jax.random.normal(ks[1], (D, D), jnp.float32),
        "wv":   std * jax.random.normal(ks[2], (D, D), jnp.float32),
        "wo":   std * jax.random.normal(ks[3], (D, D), jnp.float32),
        "wfc1": std * jax.random.normal(ks[4], (D, hidden), jnp.float32),
        "wfc2": std * jax.random.normal(ks[5], (hidden, D), jnp.float32),
        # StarReLU parameters (learnable; non-default values to exercise wiring)
        "sr_scale": 0.75,
        "sr_bias":  0.125,
    }

    x = jax.random.normal(ks[6], (B, H, W, D), jnp.float32)

    y, clusters = metaformer_block(x, params, n_heads=n_heads, head_dim=head_dim)
    y = jax.block_until_ready(y)

    y_ref = metaformer_block_ref(x, params, n_heads=n_heads, head_dim=head_dim)
    assert y.shape == (B, H, W, D)
    assert clusters is None
    # Kernel uses bf16 MXU operands (f32 accumulation) + approx reciprocal;
    # reference is pure f32 -> tolerance accounts for that.
    max_err = float(jnp.max(jnp.abs(y - y_ref)))
    assert jnp.allclose(y, y_ref, atol=1e-2, rtol=1e-2), max_err

    print("KERNEL_OK")
</pallas_src>

<mosaic_0001>
module attributes {stable_mosaic.version = 11 : i64} {
  func.func @metaformer_block_kernel(%arg0: i32, %arg1: memref<64x128xf32, #tpu.memory_space<vmem>>, %arg2: memref<1x128xf32, #tpu.memory_space<vmem>>, %arg3: memref<128x384xbf16, #tpu.memory_space<vmem>>, %arg4: memref<128x128xbf16, #tpu.memory_space<vmem>>, %arg5: memref<1x128xf32, #tpu.memory_space<vmem>>, %arg6: memref<128x512xbf16, #tpu.memory_space<vmem>>, %arg7: memref<512x128xbf16, #tpu.memory_space<vmem>>, %arg8: memref<2xf32, #tpu.memory_space<smem>>, %arg9: memref<64x128xf32, #tpu.memory_space<vmem>>, %arg10: memref<64x128xbf16, #tpu.memory_space<vmem>>) attributes {dimension_semantics = [#tpu.dimension_semantics<parallel>], iteration_bounds = array<i64: 2>, scalar_prefetch = 0 : i64, scratch_operands = 1 : i64, tpu.core_type = #tpu.core_type<tc>, window_params = [{transform_indices = @transform_0, window_bounds = array<i64: 64, 128>}, {pipeline_mode = #tpu.pipeline_mode<synchronous>, transform_indices = @transform_1, window_bounds = array<i64: 1, 128>}, {pipeline_mode = #tpu.pipeline_mode<synchronous>, transform_indices = @transform_2, window_bounds = array<i64: 128, 384>}, {pipeline_mode = #tpu.pipeline_mode<synchronous>, transform_indices = @transform_3, window_bounds = array<i64: 128, 128>}, {pipeline_mode = #tpu.pipeline_mode<synchronous>, transform_indices = @transform_4, window_bounds = array<i64: 1, 128>}, {pipeline_mode = #tpu.pipeline_mode<synchronous>, transform_indices = @transform_5, window_bounds = array<i64: 128, 512>}, {pipeline_mode = #tpu.pipeline_mode<synchronous>, transform_indices = @transform_6, window_bounds = array<i64: 512, 128>}, {transform_indices = @transform_7, window_bounds = array<i64: 2>}, {transform_indices = @transform_8, window_bounds = array<i64: 64, 128>}]} {
    %c0 = arith.constant 0 : index
    %c0_0 = arith.constant 0 : index
    %0 = vector.load %arg1[%c0, %c0_0] : memref<64x128xf32, #tpu.memory_space<vmem>>, vector<64x128xf32>
    %c0_1 = arith.constant 0 : index
    %c0_2 = arith.constant 0 : index
    %1 = vector.load %arg2[%c0_1, %c0_2] : memref<1x128xf32, #tpu.memory_space<vmem>>, vector<1x128xf32>
    %cst = arith.constant dense<0.000000e+00> : vector<64xf32>
    %2 = vector.multi_reduction <add>, %0, %cst [1] : vector<64x128xf32> to vector<64xf32>
    %3 = vector.shape_cast %2 : vector<64xf32> to vector<64x1xf32>
    %cst_3 = arith.constant 1.280000e+02 : f32
    %4 = vector.broadcast %cst_3 : f32 to vector<64x1xf32>
    %5 = arith.divf %3, %4 : vector<64x1xf32>
    %6 = vector.broadcast %5 : vector<64x1xf32> to vector<64x128xf32>
    %7 = arith.subf %0, %6 : vector<64x128xf32>
    %8 = arith.mulf %7, %7 : vector<64x128xf32>
    %cst_4 = arith.constant dense<0.000000e+00> : vector<64xf32>
    %9 = vector.multi_reduction <add>, %8, %cst_4 [1] : vector<64x128xf32> to vector<64xf32>
    %10 = vector.shape_cast %9 : vector<64xf32> to vector<64x1xf32>
    %cst_5 = arith.constant 1.280000e+02 : f32
    %11 = vector.broadcast %cst_5 : f32 to vector<64x1xf32>
    %12 = arith.divf %10, %11 : vector<64x1xf32>
    %cst_6 = arith.constant 9.99999974E-6 : f32
    %13 = vector.broadcast %cst_6 : f32 to vector<64x1xf32>
    %14 = arith.addf %12, %13 : vector<64x1xf32>
    %15 = math.rsqrt %14 : vector<64x1xf32>
    %16 = vector.broadcast %15 : vector<64x1xf32> to vector<64x128xf32>
    %17 = arith.mulf %7, %16 : vector<64x128xf32>
    %18 = vector.broadcast %1 : vector<1x128xf32> to vector<64x128xf32>
    %19 = arith.mulf %17, %18 : vector<64x128xf32>
    %20 = arith.truncf %19 : vector<64x128xf32> to vector<64x128xbf16>
    %c0_7 = arith.constant 0 : index
    %c0_8 = arith.constant 0 : index
    %21 = vector.load %arg3[%c0_7, %c0_8] : memref<128x384xbf16, #tpu.memory_space<vmem>>, vector<128x384xbf16>
    %cst_9 = arith.constant dense<0.000000e+00> : vector<64x384xf32>
    %22 = tpu.matmul %20, %21, %cst_9 {dimension_numbers = #tpu.dot_dimension_numbers<[1], [0], [0], [1], [0, 0, 1, 1], [], []>} : vector<64x128xbf16>, vector<128x384xbf16>, vector<64x384xf32> -> vector<64x384xf32>
    %23 = arith.truncf %22 : vector<64x384xf32> to vector<64x384xbf16>
    %24 = vector.extract_strided_slice %23 {offsets = [0, 0], sizes = [64, 32], strides = [1, 1]} : vector<64x384xbf16> to vector<64x32xbf16>
    %25 = vector.extract_strided_slice %23 {offsets = [0, 128], sizes = [64, 32], strides = [1, 1]} : vector<64x384xbf16> to vector<64x32xbf16>
    %26 = vector.extract_strided_slice %23 {offsets = [0, 256], sizes = [64, 32], strides = [1, 1]} : vector<64x384xbf16> to vector<64x32xbf16>
    %cst_10 = arith.constant dense<0.000000e+00> : vector<64x64xf32>
    %27 = tpu.matmul %24, %25, %cst_10 {dimension_numbers = #tpu.dot_dimension_numbers<[1], [1], [0], [0], [0, 0, 1, 0], [], []>} : vector<64x32xbf16>, vector<64x32xbf16>, vector<64x64xf32> -> vector<64x64xf32>
    %cst_11 = arith.constant dense<0xFF800000> : vector<64xf32>
    %28 = vector.multi_reduction <maximumf>, %27, %cst_11 [1] : vector<64x64xf32> to vector<64xf32>
    %29 = vector.shape_cast %28 : vector<64xf32> to vector<64x1xf32>
    %30 = vector.broadcast %29 : vector<64x1xf32> to vector<64x64xf32>
    %31 = arith.subf %27, %30 : vector<64x64xf32>
    %32 = math.exp %31 : vector<64x64xf32>
    %cst_12 = arith.constant dense<0.000000e+00> : vector<64xf32>
    %33 = vector.multi_reduction <add>, %32, %cst_12 [1] : vector<64x64xf32> to vector<64xf32>
    %34 = vector.shape_cast %33 : vector<64xf32> to vector<64x1xf32>
    %35 = tpu.reciprocal %34 {approx = true} : vector<64x1xf32> -> vector<64x1xf32>
    %36 = vector.broadcast %35 : vector<64x1xf32> to vector<64x64xf32>
    %37 = arith.mulf %32, %36 : vector<64x64xf32>
    %38 = arith.truncf %37 : vector<64x64xf32> to vector<64x64xbf16>
    %cst_13 = arith.constant dense<0.000000e+00> : vector<64x32xf32>
    %39 = tpu.matmul %38, %26, %cst_13 {dimension_numbers = #tpu.dot_dimension_numbers<[1], [0], [0], [1], [0, 0, 1, 1], [], []>} : vector<64x64xbf16>, vector<64x32xbf16>, vector<64x32xf32> -> vector<64x32xf32>
    %40 = arith.truncf %39 : vector<64x32xf32> to vector<64x32xbf16>
    %c0_14 = arith.constant 0 : index
    %c0_15 = arith.constant 0 : index
    %41 = vector.load %arg10[%c0_14, %c0_15] : memref<64x128xbf16, #tpu.memory_space<vmem>>, vector<64x32xbf16>
    tpu.vector_store %arg10[%c0_14, %c0_15], %40 {strides = array<i32>} : memref<64x128xbf16, #tpu.memory_space<vmem>>, vector<64x32xbf16>,
    %42 = vector.extract_strided_slice %23 {offsets = [0, 32], sizes = [64, 32], strides = [1, 1]} : vector<64x384xbf16> to vector<64x32xbf16>
    %43 = vector.extract_strided_slice %23 {offsets = [0, 160], sizes = [64, 32], strides = [1, 1]} : vector<64x384xbf16> to vector<64x32xbf16>
    %44 = vector.extract_strided_slice %23 {offsets = [0, 288], sizes = [64, 32], strides = [1, 1]} : vector<64x384xbf16> to vector<64x32xbf16>
    %cst_16 = arith.constant dense<0.000000e+00> : vector<64x64xf32>
    %45 = tpu.matmul %42, %43, %cst_16 {dimension_numbers = #tpu.dot_dimension_numbers<[1], [1], [0], [0], [0, 0, 1, 0], [], []>} : vector<64x32xbf16>, vector<64x32xbf16>, vector<64x64xf32> -> vector<64x64xf32>
    %cst_17 = arith.constant dense<0xFF800000> : vector<64xf32>
    %46 = vector.multi_reduction <maximumf>, %45, %cst_17 [1] : vector<64x64xf32> to vector<64xf32>
    %47 = vector.shape_cast %46 : vector<64xf32> to vector<64x1xf32>
    %48 = vector.broadcast %47 : vector<64x1xf32> to vector<64x64xf32>
    %49 = arith.subf %45, %48 : vector<64x64xf32>
    %50 = math.exp %49 : vector<64x64xf32>
    %cst_18 = arith.constant dense<0.000000e+00> : vector<64xf32>
    %51 = vector.multi_reduction <add>, %50, %cst_18 [1] : vector<64x64xf32> to vector<64xf32>
    %52 = vector.shape_cast %51 : vector<64xf32> to vector<64x1xf32>
    %53 = tpu.reciprocal %52 {approx = true} : vector<64x1xf32> -> vector<64x1xf32>
    %54 = vector.broadcast %53 : vector<64x1xf32> to vector<64x64xf32>
    %55 = arith.mulf %50, %54 : vector<64x64xf32>
    %56 = arith.truncf %55 : vector<64x64xf32> to vector<64x64xbf16>
    %cst_19 = arith.constant dense<0.000000e+00> : vector<64x32xf32>
    %57 = tpu.matmul %56, %44, %cst_19 {dimension_numbers = #tpu.dot_dimension_numbers<[1], [0], [0], [1], [0, 0, 1, 1], [], []>} : vector<64x64xbf16>, vector<64x32xbf16>, vector<64x32xf32> -> vector<64x32xf32>
    %58 = arith.truncf %57 : vector<64x32xf32> to vector<64x32xbf16>
    %c0_20 = arith.constant 0 : index
    %c32 = arith.constant 32 : index
    %59 = vector.load %arg10[%c0_20, %c32] : memref<64x128xbf16, #tpu.memory_space<vmem>>, vector<64x32xbf16>
    tpu.vector_store %arg10[%c0_20, %c32], %58 {strides = array<i32>} : memref<64x128xbf16, #tpu.memory_space<vmem>>, vector<64x32xbf16>,
    %60 = vector.extract_strided_slice %23 {offsets = [0, 64], sizes = [64, 32], strides = [1, 1]} : vector<64x384xbf16> to vector<64x32xbf16>
    %61 = vector.extract_strided_slice %23 {offsets = [0, 192], sizes = [64, 32], strides = [1, 1]} : vector<64x384xbf16> to vector<64x32xbf16>
    %62 = vector.extract_strided_slice %23 {offsets = [0, 320], sizes = [64, 32], strides = [1, 1]} : vector<64x384xbf16> to vector<64x32xbf16>
    %cst_21 = arith.constant dense<0.000000e+00> : vector<64x64xf32>
    %63 = tpu.matmul %60, %61, %cst_21 {dimension_numbers = #tpu.dot_dimension_numbers<[1], [1], [0], [0], [0, 0, 1, 0], [], []>} : vector<64x32xbf16>, vector<64x32xbf16>, vector<64x64xf32> -> vector<64x64xf32>
    %cst_22 = arith.constant dense<0xFF800000> : vector<64xf32>
    %64 = vector.multi_reduction <maximumf>, %63, %cst_22 [1] : vector<64x64xf32> to vector<64xf32>
    %65 = vector.shape_cast %64 : vector<64xf32> to vector<64x1xf32>
    %66 = vector.broadcast %65 : vector<64x1xf32> to vector<64x64xf32>
    %67 = arith.subf %63, %66 : vector<64x64xf32>
    %68 = math.exp %67 : vector<64x64xf32>
    %cst_23 = arith.constant dense<0.000000e+00> : vector<64xf32>
    %69 = vector.multi_reduction <add>, %68, %cst_23 [1] : vector<64x64xf32> to vector<64xf32>
    %70 = vector.shape_cast %69 : vector<64xf32> to vector<64x1xf32>
    %71 = tpu.reciprocal %70 {approx = true} : vector<64x1xf32> -> vector<64x1xf32>
    %72 = vector.broadcast %71 : vector<64x1xf32> to vector<64x64xf32>
    %73 = arith.mulf %68, %72 : vector<64x64xf32>
    %74 = arith.truncf %73 : vector<64x64xf32> to vector<64x64xbf16>
    %cst_24 = arith.constant dense<0.000000e+00> : vector<64x32xf32>
    %75 = tpu.matmul %74, %62, %cst_24 {dimension_numbers = #tpu.dot_dimension_numbers<[1], [0], [0], [1], [0, 0, 1, 1], [], []>} : vector<64x64xbf16>, vector<64x32xbf16>, vector<64x32xf32> -> vector<64x32xf32>
    %76 = arith.truncf %75 : vector<64x32xf32> to vector<64x32xbf16>
    %c0_25 = arith.constant 0 : index
    %c64 = arith.constant 64 : index
    %77 = vector.load %arg10[%c0_25, %c64] : memref<64x128xbf16, #tpu.memory_space<vmem>>, vector<64x32xbf16>
    tpu.vector_store %arg10[%c0_25, %c64], %76 {strides = array<i32>} : memref<64x128xbf16, #tpu.memory_space<vmem>>, vector<64x32xbf16>,
    %78 = vector.extract_strided_slice %23 {offsets = [0, 96], sizes = [64, 32], strides = [1, 1]} : vector<64x384xbf16> to vector<64x32xbf16>
    %79 = vector.extract_strided_slice %23 {offsets = [0, 224], sizes = [64, 32], strides = [1, 1]} : vector<64x384xbf16> to vector<64x32xbf16>
    %80 = vector.extract_strided_slice %23 {offsets = [0, 352], sizes = [64, 32], strides = [1, 1]} : vector<64x384xbf16> to vector<64x32xbf16>
    %cst_26 = arith.constant dense<0.000000e+00> : vector<64x64xf32>
    %81 = tpu.matmul %78, %79, %cst_26 {dimension_numbers = #tpu.dot_dimension_numbers<[1], [1], [0], [0], [0, 0, 1, 0], [], []>} : vector<64x32xbf16>, vector<64x32xbf16>, vector<64x64xf32> -> vector<64x64xf32>
    %cst_27 = arith.constant dense<0xFF800000> : vector<64xf32>
    %82 = vector.multi_reduction <maximumf>, %81, %cst_27 [1] : vector<64x64xf32> to vector<64xf32>
    %83 = vector.shape_cast %82 : vector<64xf32> to vector<64x1xf32>
    %84 = vector.broadcast %83 : vector<64x1xf32> to vector<64x64xf32>
    %85 = arith.subf %81, %84 : vector<64x64xf32>
    %86 = math.exp %85 : vector<64x64xf32>
    %cst_28 = arith.constant dense<0.000000e+00> : vector<64xf32>
    %87 = vector.multi_reduction <add>, %86, %cst_28 [1] : vector<64x64xf32> to vector<64xf32>
    %88 = vector.shape_cast %87 : vector<64xf32> to vector<64x1xf32>
    %89 = tpu.reciprocal %88 {approx = true} : vector<64x1xf32> -> vector<64x1xf32>
    %90 = vector.broadcast %89 : vector<64x1xf32> to vector<64x64xf32>
    %91 = arith.mulf %86, %90 : vector<64x64xf32>
    %92 = arith.truncf %91 : vector<64x64xf32> to vector<64x64xbf16>
    %cst_29 = arith.constant dense<0.000000e+00> : vector<64x32xf32>
    %93 = tpu.matmul %92, %80, %cst_29 {dimension_numbers = #tpu.dot_dimension_numbers<[1], [0], [0], [1], [0, 0, 1, 1], [], []>} : vector<64x64xbf16>, vector<64x32xbf16>, vector<64x32xf32> -> vector<64x32xf32>
    %94 = arith.truncf %93 : vector<64x32xf32> to vector<64x32xbf16>
    %c0_30 = arith.constant 0 : index
    %c96 = arith.constant 96 : index
    %95 = vector.load %arg10[%c0_30, %c96] : memref<64x128xbf16, #tpu.memory_space<vmem>>, vector<64x32xbf16>
    tpu.vector_store %arg10[%c0_30, %c96], %94 {strides = array<i32>} : memref<64x128xbf16, #tpu.memory_space<vmem>>, vector<64x32xbf16>,
    %c0_31 = arith.constant 0 : index
    %c0_32 = arith.constant 0 : index
    %96 = vector.load %arg10[%c0_31, %c0_32] : memref<64x128xbf16, #tpu.memory_space<vmem>>, vector<64x128xbf16>
    %c0_33 = arith.constant 0 : index
    %c0_34 = arith.constant 0 : index
    %97 = vector.load %arg4[%c0_33, %c0_34] : memref<128x128xbf16, #tpu.memory_space<vmem>>, vector<128x128xbf16>
    %cst_35 = arith.constant dense<0.000000e+00> : vector<64x128xf32>
    %98 = tpu.matmul %96, %97, %cst_35 {dimension_numbers = #tpu.dot_dimension_numbers<[1], [0], [0], [1], [0, 0, 1, 1], [], []>} : vector<64x128xbf16>, vector<128x128xbf16>, vector<64x128xf32> -> vector<64x128xf32>
    %99 = arith.addf %0, %98 : vector<64x128xf32>
    %c0_36 = arith.constant 0 : index
    %c0_37 = arith.constant 0 : index
    %100 = vector.load %arg5[%c0_36, %c0_37] : memref<1x128xf32, #tpu.memory_space<vmem>>, vector<1x128xf32>
    %cst_38 = arith.constant dense<0.000000e+00> : vector<64xf32>
    %101 = vector.multi_reduction <add>, %99, %cst_38 [1] : vector<64x128xf32> to vector<64xf32>
    %102 = vector.shape_cast %101 : vector<64xf32> to vector<64x1xf32>
    %cst_39 = arith.constant 1.280000e+02 : f32
    %103 = vector.broadcast %cst_39 : f32 to vector<64x1xf32>
    %104 = arith.divf %102, %103 : vector<64x1xf32>
    %105 = vector.broadcast %104 : vector<64x1xf32> to vector<64x128xf32>
    %106 = arith.subf %99, %105 : vector<64x128xf32>
    %107 = arith.mulf %106, %106 : vector<64x128xf32>
    %cst_40 = arith.constant dense<0.000000e+00> : vector<64xf32>
    %108 = vector.multi_reduction <add>, %107, %cst_40 [1] : vector<64x128xf32> to vector<64xf32>
    %109 = vector.shape_cast %108 : vector<64xf32> to vector<64x1xf32>
    %cst_41 = arith.constant 1.280000e+02 : f32
    %110 = vector.broadcast %cst_41 : f32 to vector<64x1xf32>
    %111 = arith.divf %109, %110 : vector<64x1xf32>
    %cst_42 = arith.constant 9.99999974E-6 : f32
    %112 = vector.broadcast %cst_42 : f32 to vector<64x1xf32>
    %113 = arith.addf %111, %112 : vector<64x1xf32>
    %114 = math.rsqrt %113 : vector<64x1xf32>
    %115 = vector.broadcast %114 : vector<64x1xf32> to vector<64x128xf32>
    %116 = arith.mulf %106, %115 : vector<64x128xf32>
    %117 = vector.broadcast %100 : vector<1x128xf32> to vector<64x128xf32>
    %118 = arith.mulf %116, %117 : vector<64x128xf32>
    %119 = arith.truncf %118 : vector<64x128xf32> to vector<64x128xbf16>
    %c0_43 = arith.constant 0 : index
    %c0_44 = arith.constant 0 : index
    %120 = vector.load %arg6[%c0_43, %c0_44] : memref<128x512xbf16, #tpu.memory_space<vmem>>, vector<128x512xbf16>
    %cst_45 = arith.constant dense<0.000000e+00> : vector<64x512xf32>
    %121 = tpu.matmul %119, %120, %cst_45 {dimension_numbers = #tpu.dot_dimension_numbers<[1], [0], [0], [1], [0, 0, 1, 1], [], []>} : vector<64x128xbf16>, vector<128x512xbf16>, vector<64x512xf32> -> vector<64x512xf32>
    %cst_46 = arith.constant 0.000000e+00 : f32
    %122 = vector.broadcast %cst_46 : f32 to vector<64x512xf32>
    %123 = arith.maximumf %121, %122 : vector<64x512xf32>
    %c0_47 = arith.constant 0 : index
    %124 = memref.load %arg8[%c0_47] : memref<2xf32, #tpu.memory_space<smem>>
    %125 = arith.mulf %123, %123 : vector<64x512xf32>
    %126 = vector.broadcast %124 : f32 to vector<64x512xf32>
    %127 = arith.mulf %126, %125 : vector<64x512xf32>
    %c1 = arith.constant 1 : index
    %128 = memref.load %arg8[%c1] : memref<2xf32, #tpu.memory_space<smem>>
    %129 = vector.broadcast %128 : f32 to vector<64x512xf32>
    %130 = arith.addf %127, %129 : vector<64x512xf32>
    %131 = arith.truncf %130 : vector<64x512xf32> to vector<64x512xbf16>
    %c0_48 = arith.constant 0 : index
    %c0_49 = arith.constant 0 : index
    %132 = vector.load %arg7[%c0_48, %c0_49] : memref<512x128xbf16, #tpu.memory_space<vmem>>, vector<512x128xbf16>
    %cst_50 = arith.constant dense<0.000000e+00> : vector<64x128xf32>
    %133 = tpu.matmul %131, %132, %cst_50 {dimension_numbers = #tpu.dot_dimension_numbers<[1], [0], [0], [1], [0, 0, 1, 1], [], []>} : vector<64x512xbf16>, vector<512x128xbf16>, vector<64x128xf32> -> vector<64x128xf32>
    %134 = arith.addf %99, %133 : vector<64x128xf32>
    %c0_51 = arith.constant 0 : index
    %c0_52 = arith.constant 0 : index
    %135 = vector.load %arg9[%c0_51, %c0_52] : memref<64x128xf32, #tpu.memory_space<vmem>>, vector<64x128xf32>
    tpu.vector_store %arg9[%c0_51, %c0_52], %134 {strides = array<i32>} : memref<64x128xf32, #tpu.memory_space<vmem>>, vector<64x128xf32>,
    return
  }
  func.func @transform_0(%arg0: i32) -> (i32, i32) {
    %c0_i32 = arith.constant 0 : i32
    %c0_i32_0 = arith.constant 0 : i32
    return %arg0, %c0_i32 : i32, i32
  }
  func.func @transform_1(%arg0: i32) -> (i32, i32) {
    %c0_i32 = arith.constant 0 : i32
    %c0_i32_0 = arith.constant 0 : i32
    %c0_i32_1 = arith.constant 0 : i32
    return %c0_i32, %c0_i32_0 : i32, i32
  }
  func.func @transform_2(%arg0: i32) -> (i32, i32) {
    %c0_i32 = arith.constant 0 : i32
    %c0_i32_0 = arith.constant 0 : i32
    %c0_i32_1 = arith.constant 0 : i32
    return %c0_i32, %c0_i32_0 : i32, i32
  }
  func.func @transform_3(%arg0: i32) -> (i32, i32) {
    %c0_i32 = arith.constant 0 : i32
    %c0_i32_0 = arith.constant 0 : i32
    %c0_i32_1 = arith.constant 0 : i32
    return %c0_i32, %c0_i32_0 : i32, i32
  }
  func.func @transform_4(%arg0: i32) -> (i32, i32) {
    %c0_i32 = arith.constant 0 : i32
    %c0_i32_0 = arith.constant 0 : i32
    %c0_i32_1 = arith.constant 0 : i32
    return %c0_i32, %c0_i32_0 : i32, i32
  }
  func.func @transform_5(%arg0: i32) -> (i32, i32) {
    %c0_i32 = arith.constant 0 : i32
    %c0_i32_0 = arith.constant 0 : i32
    %c0_i32_1 = arith.constant 0 : i32
    return %c0_i32, %c0_i32_0 : i32, i32
  }
  func.func @transform_6(%arg0: i32) -> (i32, i32) {
    %c0_i32 = arith.constant 0 : i32
    %c0_i32_0 = arith.constant 0 : i32
    %c0_i32_1 = arith.constant 0 : i32
    return %c0_i32, %c0_i32_0 : i32, i32
  }
  func.func @transform_7(%arg0: i32) -> i32 {
    %c0_i32 = arith.constant 0 : i32
    %c0_i32_0 = arith.constant 0 : i32
    return %c0_i32 : i32
  }
  func.func @transform_8(%arg0: i32) -> (i32, i32) {
    %c0_i32 = arith.constant 0 : i32
    %c0_i32_0 = arith.constant 0 : i32
    return %arg0, %c0_i32 : i32, i32
  }
}

</mosaic_0001>

<bundles_post_ra>
// kernel: tpu_custom_call.1
= control target key start
LH: loop header
LB: loop body
LE: loop exit
PB: predicated region body
PF: predicated region fallthrough
CT: control target
= control target key end

     0   :  { %s5466_s0 = inlined_call_operand.hbm [shape: f32[128,128], index: 0, kind: input, shape index: {}]   ;;  %s5467_s1 = inlined_call_operand.hbm [shape: f32[1,128], index: 1, kind: input, shape index: {}]   ;;  %s5468_s2 = inlined_call_operand.hbm [shape: bf16[128,384], index: 2, kind: input, shape index: {}]   ;;  %s5469_s3 = inlined_call_operand.hbm [shape: bf16[128,128], index: 3, kind: input, shape index: {}]   ;;  %s5470_s4 = inlined_call_operand.vmem [shape: f32[1,128], index: 4, kind: input, shape index: {}]   ;;  %s5471_s5 = inlined_call_operand.hbm [shape: bf16[128,512], index: 5, kind: input, shape index: {}]   ;;  %s5472_s6 = inlined_call_operand.hbm [shape: bf16[512,128], index: 6, kind: input, shape index: {}]   ;;  %s5473_s7 = inlined_call_operand.vmem [shape: f32[2], index: 7, kind: input, shape index: {}]   ;;  %s5474_s8 = inlined_call_operand.hbm [shape: f32[128,128], index: 8, kind: output, shape index: {}]  }
   0x1   :  { %5475 = sst [smem:[#allocation23_spill]] %s5467_s1 }
   0x2   :  { %5476 = sst [smem:[#allocation24_spill]] %s5468_s2 }
   0x3   :  { %5477 = sst [smem:[#allocation25_spill]] %s5469_s3 }
   0x4   :  { %13 = vsyncpa [#allocation4], 0 }
   0x5   :  { %15 = vsyncpa [#allocation4 + $0x1], 0 }
   0x6   :  { %16 = vsyncpa [#allocation8], 0 }
   0x7   :  { %17 = vsyncpa [#allocation11], 0 }
   0x8   :  { %18 = vsyncpa [#allocation14], 0 }
   0x9   :  { %19 = vsyncpa [#allocation6], 0 }
   0xa   :  { %20 = vsyncpa [#allocation5], 0 }
   0xb   :  { %22 = vsyncpa [#allocation5 + $0x1], 0  ;;  %s4428_s27 = smov 0   ;;  %s4430_s28 = smov 0  }
   0xc   :  { %s4432_s29 = smov 0   ;;  %s4434_s30 = smov 0  }
   0xd LB: > { %s5478_s1 = sld [smem:[#allocation23_spill]]  ;;  %s4452_s12 = sadd.s32 4294967295, %s4361_s30   ;;  %s4361_s30 = sphi %s4434_s30, %s5492_s30   ;;  %s4357_s29 = sphi %s4432_s29, %s5491_s29   ;;  %s4353_s28 = sphi %s4430_s28, %s5490_s28   ;;  %s4349_s27 = sphi %s4428_s27, %s5489_s27  }
   0xe   : > { %p3231_p0 = scmp.ge.s32.totalorder %s4361_s30, 1  ;;  %p49_p1 = scmp.eq.s32.totalorder %s4452_s12, 0 }
   0xf   : > { %p232_p2 = scmp.lt.s32.totalorder %s4361_s30, 3  ;;  %s4363_s14 = smov [#allocation7]  }
  0x10   : > { %s246_s15 = sshll.u32 %s4363_s14, 4  ;;  %s5480_s3 = sld [smem:[#allocation25_spill]]  ;;  %s247_s15 = int_to_ptr.vmem [resolvable:$true] %s246_s15 }
  0x11   : > { %p4457_p3 = pnand %p3231_p0, %p232_p2  ;;  %s4364_s20 = smov [#allocation10]  }
  0x12   : > { %s271_s21 = sshll.u32 %s4364_s20, 4  ;;  %s4365_s22 = smov 64   ;;  %s272_s21 = int_to_ptr.vmem [resolvable:$true] %s271_s21 }
  0x13   : > { %s244_s11 = sshll.u32 %s5478_s1, 4  ;;  %p3819_p5 = pneg %p4457_p3  ;;  %s245_s11 = int_to_ptr.hbm [resolvable:$true] %s244_s11 }
  0x14   : > { %s4366_s23 = smov 4   ;;  %s5482_s2 = sld [smem:[#allocation24_spill]] }
  0x15   : > { %p4469_p6 = pnand %p3819_p5, %p49_p1  ;;  %s4367_s9 = smov [#allocation9]  }
  0x16   : > { %s269_s18 = sshll.u32 %s5480_s3, 4  ;;  %s257_s10 = sshll.u32 %s4367_s9, 4  ;;  %s270_s18 = int_to_ptr.hbm [resolvable:$true] %s269_s18  ;;  %s258_s10 = int_to_ptr.vmem [resolvable:$true] %s257_s10 }
  0x17   : > { %3822 = dma.hbm_to_vmem [thread:$0]  (!%p4469_p6), %s245_s11, 16, %s247_s15, [#allocation8]  }
  0x18   : > { %3828 = dma.hbm_to_vmem [thread:$0]  (!%p4469_p6), %s270_s18, 1024, %s272_s21, [#allocation11], %s4365_s22, %s4365_s22, %s4366_s23  }
  0x19   : > { %s286_s17 = sshll.u32 %s5471_s5, 4  ;;  %s4368_s20 = smov 192   ;;  %s287_s17 = int_to_ptr.hbm [resolvable:$true] %s286_s17 }
  0x1a   : > { %s255_s26 = sshll.u32 %s5482_s2, 4  ;;  %s4369_s11 = smov 12   ;;  %s256_s26 = int_to_ptr.hbm [resolvable:$true] %s255_s26 }
  0x1b   : > { %3825 = dma.hbm_to_vmem [thread:$0]  (!%p4469_p6), %s256_s26, 3072, %s258_s10, [#allocation8], %s4368_s20, %s4368_s20, %s4369_s11  }
  0x1c   : > { %s4370_s15 = smov [#allocation12]   ;;  %s4371_s21 = smov 256  }
  0x1d   : > { %s288_s18 = sshll.u32 %s4370_s15, 4  ;;  %s4372_s24 = smov 16   ;;  %s289_s18 = int_to_ptr.vmem [resolvable:$true] %s288_s18 }
  0x1e   : > { %3831 = dma.hbm_to_vmem [thread:$0]  (!%p4469_p6), %s287_s17, 4096, %s289_s18, [#allocation11], %s4371_s21, %s4371_s21, %s4372_s24  }
  0x1f   : > { %s300_s14 = sshll.u32 %s5472_s6, 4  ;;  %s4373_s26 = smov [#allocation13]   ;;  %s301_s14 = int_to_ptr.hbm [resolvable:$true] %s300_s14 }
  0x20   : > { %s302_s10 = sshll.u32 %s4373_s26, 4  ;;  %s315_s11 = sshll.u32 %s5473_s7, 4  ;;  %s303_s10 = int_to_ptr.vmem [resolvable:$true] %s302_s10  ;;  %s316_s11 = int_to_ptr.vmem [resolvable:$true] %s315_s11 }
  0x21   : > { %3834 = dma.hbm_to_vmem [thread:$0]  (!%p4469_p6), %s301_s14, 4096, %s303_s10, [#allocation14], %s4365_s22, %s4365_s22, %s4366_s23  }
  0x22   : > { %s4374_s17 = smov [#allocation15]   ;;  %s3230_s15 = sadd.s32 4294967294, %s4361_s30  }
  0x23   : > { %3837 = dma.vmem_to_smem (!%p4469_p6), %s316_s11, 16, %s4374_s17, [#allocation6]  }
  0x24   : > { %s4499_s18 = sadd.s32 1, %s4361_s30   ;;  %s35_s24 = sadd.s32 1, %s4357_s29 }
  0x25   : > { %s32_s21 = ssub.s32 %s4361_s30, %s4499_s18  ;;  %p42_p8 = scmp.ne.s32.totalorder %s4357_s29, %s4353_s28 }
  0x26   : > { %p33_p7 = scmp.eq.s32.totalorder %s32_s21, 0  ;;  %p43_p9 = scmp.eq.s32.totalorder %s4361_s30, 0 }
  0x27   : > { %p48_p10 = scmp.ne.s32.totalorder %s4353_s28, %s4349_s27  ;;  %p219_p13 = scmp.eq.s32.totalorder %s4452_s12, 1 }
  0x28   : > { %s4510_s25 = scalar_select %p33_p7, %s4357_s29, %s35_s24  }
  0x29   : > { %p4512_p11 = por %p43_p9, %p42_p8  ;;  %p4518_p12 = por %p49_p1, %p48_p10 }
  0x2a   : > { %p225_p0 = scmp.eq.s32.totalorder %s3230_s15, 1  ;;  %p3852_p2 = scmp.lt.s32.totalorder %s4361_s30, 2 }
  0x2b   : > { %s326_s23 = sand.u32 1, %s4357_s29   ;;  %p4525_p5 = por %p219_p13, %p42_p8 }
  0x2c   : > { %p4529_p6 = por %p225_p0, %p48_p10  ;;  %s3239_s26 = sshll.u32 %s326_s23, 6 }
  0x2d   : > { %s3689_s10 = sshll.u32 %s4361_s30, 6  ;;  %s330_s17 = scalar_lea.vmem [#allocation3], %s3239_s26 }
  0x2e   : > { %s335_s11 = scalar_lea.hbm %s5466_s0, %s3689_s10  ;;  %s338_s21 = sshll.u32 %s330_s17, 4  ;;  %s339_s21 = int_to_ptr.vmem [resolvable:$true] %s338_s21 }
  0x2f   : > { %s336_s24 = sshll.u32 %s335_s11, 4  ;;  %p4539_p7 = pnand %p3852_p2, %p4512_p11  ;;  %s337_s24 = int_to_ptr.hbm [resolvable:$true] %s336_s24 }
  0x30   : > { %s327_s1 = scalar_lea.sflag [#allocation4], %s326_s23  ;;  %s4249_s2 = sshra.s32 %s337_s24, 4  ;;  %s4250_s2 = int_to_ptr.hbm [resolvable:$true] %s4249_s2 }
  0x31   : > { %s4251_s3 = scalar_lea.hbm %s4250_s2, 64  ;;  %p4253_p9 = pneg %p4539_p7 }
  0x32   : > { %p4252_p8 = scmp.ne.s32.totalorder %s4250_s2, %s4251_s3  ;;  %s4256_s16 = scalar_lea.hbm %s5466_s0, 128 }
  0x33   : > { %p4257_p11 = scmp.lt.s32.totalorder %s4250_s2, %s5466_s0  ;;  %p4258_p0 = scmp.lt.s32.totalorder %s4256_s16, %s4251_s3 }
  0x34   : > { %p4254_p10 = pnand %p4253_p9, %p4252_p8 }
  0x35   : > { %p4259_p2 = por %p4258_p0, %p4257_p11 }
  0x36   : > { %p4255_p13 = pneg %p4254_p10 }
  0x38   : > { %p4260_p4 = pnand %p4259_p2, %p4255_p13 }
  0x3a   : > { %4263 = shalt.err (!%p4260_p4)
}
  0x3b   : > { %s4375_s23 = smov 128   ;;  %s4376_s11 = smov 8  }
  0x3c   : > { %3841 = dma.hbm_to_vmem [thread:$0]  (!%p4539_p7), %s337_s24, 1024, %s339_s21, %s327_s1, %s4375_s23, %s4375_s23, %s4376_s11  }
  0x3d   : > { %350 = sbr.rel (%p4457_p3) target bundleno = 2390 (0x956), region = 52  ;;  %s4556_s17 = sand.u32 (!%p4457_p3), 1, %s4353_s28  }
  0x3e   : > { %s3243_s2 = sshll.u32 (!%p4457_p3), %s4556_s17, 6  ;;  %s353_s3 = scalar_lea.sflag (!%p4457_p3), [#allocation4], %s4556_s17 }
  0x3f   : > { %s4562_s26 = scalar_lea.vmem (!%p4457_p3), [#allocation3], %s3243_s2 }
  0x42   : > { %4324 = dma.done.wait (%p4518_p12), %s353_s3, 1024  }
  0x43   : > { %4326 = vsyncadd (%p4518_p12), %s353_s3, 4294966272 }
  0x44   : > { %4328 = dma.done.wait (%p49_p1), [#allocation8], 3088  }
  0x45   : > { %4330 = vsyncadd (%p49_p1), [#allocation8], 4294964208 }
  0x46   : > { %4332 = dma.done.wait (%p49_p1), [#allocation11], 5120  }
  0x47   : > { %4334 = vsyncadd (%p49_p1), [#allocation11], 4294962176 }
  0x48   : > { %4336 = dma.done.wait (%p49_p1), [#allocation14], 4096  }
  0x49   : > { %4338 = vsyncadd (%p49_p1), [#allocation14], 4294963200 }
  0x4a   : > { %4340 = dma.done.wait (%p49_p1), [#allocation6], 16  }
  0x4b   : > { %4342 = vsyncadd (%p49_p1), [#allocation6], 4294967280 }
  0x4c   : > { %392 = sfence }
  0x4d   : > { %v428_v0 = vld [vmem:[%s4562_s26 + $0x20] sm:$0xff]  ;;  %v426_v1 = vld [vmem:[%s4562_s26 + $0x10] sm:$0xff]  ;;  %v429_v3 = vld [vmem:[%s4562_s26 + $0x28] sm:$0xff]  ;;  %v4377_v7 = vmov 128.0   ;;  %s4378_s1 = smov 96   ;;  %s4379_s13 = smov 64  }
  0x4e   : > { %v424_v2 = vld [vmem:[%s4562_s26] sm:$0xff]  ;;  %441 = vadd.xlane.f32.xlu2 %v428_v0  ;;  %437 = vadd.xlane.f32.xlu1 %v426_v1  ;;  %v427_v4 = vld [vmem:[%s4562_s26 + $0x18] sm:$0xff]  ;;  %v425_v5 = vld [vmem:[%s4562_s26 + $0x8] sm:$0xff]  ;;  %3914 = vrcp.f32 %v4377_v7  ;;  %s4380_s19 = smov 32   ;;  %s2577_s15 = sld [smem:[#allocation15]] }
  0x4f   : > { %433 = vadd.xlane.f32.xlu0 %v424_v2  ;;  %v430_v6 = vld [vmem:[%s4562_s26 + $0x30] sm:$0xff]  ;;  %v4609_v30 = vld [vmem:[%s4562_s26 + $0x38] sm:$0xff]  ;;  %v3337_v43 = vld [vmem:[#allocation9 + $0xa8] sm:$0xf]  ;;  %s3555_s10 = sld [smem:[#allocation15 + $0x1]]  ;;  %s5415_s16 = scalar_lea.vmem [#allocation16], %s3243_s2 }
  0x50   : > { %v3712_v44 = vld [vmem:[#allocation9 + $0xb0] sm:$0xf0]  ;;  %v3711_v45 = vld [vmem:[#allocation9 + $0xac] sm:$0xf]  ;;  %v3339_v47 = vld [vmem:[#allocation9 + $0xb4] sm:$0xf0] }
  0x51   : > { %v3338_v46 = vor.u32 %v3712_v44, %v3337_v43  ;;  %v3345_v48 = vld [vmem:[#allocation9 + $0xb0] sm:$0xf]  ;;  %v3713_v49 = vld [vmem:[#allocation9 + $0xb8] sm:$0xf0]  ;;  %v3342_v50 = vor.u32 %v3711_v45, %v3339_v47  ;;  %v3708_v54 = vld [vmem:[#allocation9 + $0x94] sm:$0xf] }
  0x52   : > { %v3346_v51 = vor.u32 %v3713_v49, %v3345_v48  ;;  %v3325_v52 = vld [vmem:[#allocation9 + $0x90] sm:$0xf]  ;;  %v3709_v53 = vld [vmem:[#allocation9 + $0x98] sm:$0xf0]  ;;  %v3327_v56 = vld [vmem:[#allocation9 + $0x9c] sm:$0xf0] }
  0x53   : > { %775 = vmatpush.bf16.msra.mxu0 %v3338_v46  ;;  %804 = vmatpush.bf16.msra.mxu1 %v3342_v50  ;;  %v3326_v55 = vor.u32 %v3709_v53, %v3325_v52  ;;  %v3333_v57 = vld [vmem:[#allocation9 + $0x98] sm:$0xf]  ;;  %v3710_v58 = vld [vmem:[#allocation9 + $0xa0] sm:$0xf0]  ;;  %v3330_v59 = vor.u32 %v3708_v54, %v3327_v56  ;;  %v3705_v63 = vld [vmem:[#allocation9 + $0x7c] sm:$0xf] }
  0x54   : > { %v3915_v8 = vpop.eup %3914  ;;  %833 = vmatpush.bf16.msra.mxu2 %v3346_v51  ;;  %v3334_v60 = vor.u32 %v3710_v58, %v3333_v57  ;;  %v3313_v61 = vld [vmem:[#allocation9 + $0x78] sm:$0xf]  ;;  %v3706_v62 = vld [vmem:[#allocation9 + $0x80] sm:$0xf0]  ;;  %v3703_v7 = vld [vmem:[#allocation9 + $0x68] sm:$0xf0] }
  0x55   : > { %v450_v9 = vmul.f32 128.0, %v3915_v8  ;;  %vm454_vm0 = vweird.f32 %v3915_v8  ;;  %v3694_v43 = vld [vmem:[#allocation9 + $0x20] sm:$0xf0]  ;;  %v3693_v44 = vld [vmem:[#allocation9 + $0x1c] sm:$0xf]  ;;  %s3790_s20 = sshll.u32 %s4452_s12, 6 }
  0x56   : > { %443 = vadd.xlane.f32.xlu2 %v429_v3  ;;  %439 = vadd.xlane.f32.xlu1 %v427_v4  ;;  %v3267_v46 = vld [vmem:[#allocation9 + $0x24] sm:$0xf0]  ;;  %v3273_v47 = vld [vmem:[#allocation9 + $0x20] sm:$0xf]  ;;  %v3695_v48 = vld [vmem:[#allocation9 + $0x28] sm:$0xf0]  ;;  %s3093_s11 = scalar_lea.hbm %s5474_s8, %s3790_s20 }
  0x57   : > { %435 = vadd.xlane.f32.xlu0 %v425_v5  ;;  %v451_v10 = vsub.f32 1.0, %v450_v9  ;;  %776 = vmatpush.bf16.msra.mxu0 %v3326_v55  ;;  %v3270_v49 = vor.u32 %v3693_v44, %v3267_v46  ;;  %v3274_v50 = vor.u32 %v3695_v48, %v3273_v47  ;;  %v3253_v52 = vld [vmem:[#allocation9] sm:$0xf]  ;;  %v3691_v53 = vld [vmem:[#allocation9 + $0x8] sm:$0xf0]  ;;  %s3094_s2 = sshll.u32 %s5415_s16, 4  ;;  %s3095_s2 = int_to_ptr.vmem [resolvable:$true] %s3094_s2 }
  0x58   : > { %805 = vmatpush.bf16.msra.mxu1 %v3330_v59  ;;  %834 = vmatpush.bf16.msra.mxu2 %v3334_v60  ;;  %v3690_v54 = vld [vmem:[#allocation9 + $0x4] sm:$0xf]  ;;  %v3254_v56 = vor.u32 %v3691_v53, %v3253_v52  ;;  %v3255_v57 = vld [vmem:[#allocation9 + $0xc] sm:$0xf0]  ;;  %v3261_v58 = vld [vmem:[#allocation9 + $0x8] sm:$0xf] }
  0x59   : > { %v452_v11 = vmul.f32 %v3915_v8, %v451_v10  ;;  %v3303_v10 = vld [vmem:[#allocation9 + $0x6c] sm:$0xf0]  ;;  %v3692_v59 = vld [vmem:[#allocation9 + $0x10] sm:$0xf0]  ;;  %v3258_v60 = vor.u32 %v3690_v54, %v3255_v57  ;;  %s3096_s3 = sshll.u32 %s3093_s11, 4  ;;  %s3082_s12 = scalar_lea.sflag [#allocation5], %s4556_s17  ;;  %s3097_s3 = int_to_ptr.hbm [resolvable:$true] %s3096_s3 }
  0x5a   : > { %s4299_s21 = scalar_lea.hbm %s5474_s8, 128 }
  0x5b   : > { %v453_v12 = vadd.f32 %v3915_v8, %v452_v11  ;;  %v3309_v11 = vld [vmem:[#allocation9 + $0x68] sm:$0xf] }
  0x5d   : > { %v4591_v13 = vsel %vm454_vm0, %v3915_v8, %v453_v12  ;;  %v3702_v8 = vld [vmem:[#allocation9 + $0x64] sm:$0xf]  ;;  %v3704_v12 = vld [vmem:[#allocation9 + $0x70] sm:$0xf0] }
  0x5e   : > { %445 = vadd.xlane.f32.xlu2 %v430_v6 }
  0xc1   : > { %v442_v14 = vpop.xlane.xlu2 %441  ;;  %v438_v15 = vpop.xlane.xlu1 %437 }
  0xc2   : > { %v434_v16 = vpop.xlane.xlu0 %433  ;;  %v460_v26 = vmul.f32 %v4591_v13, %v442_v14  ;;  %v458_v27 = vmul.f32 %v4591_v13, %v438_v15  ;;  %v3306_v14 = vor.u32 %v3702_v8, %v3303_v10  ;;  %v3310_v15 = vor.u32 %v3704_v12, %v3309_v11 }
  0xc3   : > { %v456_v17 = vmul.f32 %v4591_v13, %v434_v16  ;;  %v3289_v16 = vld [vmem:[#allocation9 + $0x48] sm:$0xf] }
  0xc4   : > { %v4613_v32 = vsub.f32 %v426_v1, %v458_v27  ;;  %v4616_v34 = vsub.f32 %v428_v0, %v460_v26  ;;  %v3314_v0 = vor.u32 %v3706_v62, %v3313_v61  ;;  %v3315_v1 = vld [vmem:[#allocation9 + $0x84] sm:$0xf0]  ;;  %v3277_v27 = vld [vmem:[#allocation9 + $0x30] sm:$0xf]  ;;  %v3262_v61 = vor.u32 %v3692_v59, %v3261_v58 }
  0xc5   : > { %v4594_v18 = vsub.f32 %v424_v2, %v456_v17  ;;  %v3321_v2 = vld [vmem:[#allocation9 + $0x80] sm:$0xf]  ;;  %v3700_v17 = vld [vmem:[#allocation9 + $0x50] sm:$0xf0] }
  0xc6   : > { %v476_v38 = vmul.f32 %v4616_v34, %v4616_v34  ;;  %v474_v39 = vmul.f32 %v4613_v32, %v4613_v32  ;;  %777 = vmatpush.bf16.msra.mxu0 %v3314_v0 }
  0xc7   : > { %v472_v19 = vmul.f32 %v4594_v18, %v4594_v18 }
  0xc9   : > { %480 = vadd.xlane.f32.xlu0 %v472_v19  ;;  %v444_v20 = vpop.xlane.xlu2 %443  ;;  %v440_v21 = vpop.xlane.xlu1 %439  ;;  %v3699_v19 = vld [vmem:[#allocation9 + $0x4c] sm:$0xf] }
  0xca   : > { %v459_v22 = vmul.f32 %v4591_v13, %v440_v21  ;;  %v436_v23 = vpop.xlane.xlu0 %435  ;;  %v461_v37 = vmul.f32 %v4591_v13, %v444_v20  ;;  %v3290_v20 = vor.u32 %v3700_v17, %v3289_v16  ;;  %v3291_v21 = vld [vmem:[#allocation9 + $0x54] sm:$0xf0] }
  0xcb   : > { %v457_v24 = vmul.f32 %v4591_v13, %v436_v23  ;;  %v3701_v23 = vld [vmem:[#allocation9 + $0x58] sm:$0xf0] }
  0xcc   : > { %v4600_v25 = vsub.f32 %v427_v4, %v459_v22  ;;  %v4628_v41 = vsub.f32 %v429_v3, %v461_v37  ;;  %v3707_v3 = vld [vmem:[#allocation9 + $0x88] sm:$0xf0]  ;;  %v3318_v4 = vor.u32 %v3705_v63, %v3315_v1  ;;  %v3297_v22 = vld [vmem:[#allocation9 + $0x50] sm:$0xf]  ;;  %v3285_v37 = vld [vmem:[#allocation9 + $0x38] sm:$0xf] }
  0xcd   : > { %v4604_v28 = vsub.f32 %v425_v5, %v457_v24  ;;  %v3322_v5 = vor.u32 %v3707_v3, %v3321_v2  ;;  %v3294_v24 = vor.u32 %v3699_v19, %v3291_v21  ;;  %v3298_v26 = vor.u32 %v3701_v23, %v3297_v22 }
  0xce   : > { %v475_v29 = vmul.f32 %v4600_v25, %v4600_v25  ;;  %v477_v42 = vmul.f32 %v4628_v41, %v4628_v41  ;;  %806 = vmatpush.bf16.msra.mxu1 %v3318_v4 }
  0xcf   : > { %v473_v31 = vmul.f32 %v4604_v28, %v4604_v28  ;;  %835 = vmatpush.bf16.msra.mxu2 %v3322_v5 }
  0xd0   : > { %486 = vadd.xlane.f32.xlu2 %v475_v29  ;;  %v3697_v29 = vld [vmem:[#allocation9 + $0x38] sm:$0xf0] }
  0xd1   : > { %447 = vadd.xlane.f32.xlu0 %v4609_v30  ;;  %482 = vadd.xlane.f32.xlu1 %v473_v31  ;;  %v446_v33 = vpop.xlane.xlu2 %445  ;;  %v3696_v31 = vld [vmem:[#allocation9 + $0x34] sm:$0xf] }
  0xd2   : > { %v462_v35 = vmul.f32 %v4591_v13, %v446_v33  ;;  %807 = vmatpush.bf16.msra.mxu1 %v3306_v14  ;;  %v3278_v33 = vor.u32 %v3697_v29, %v3277_v27 }
  0xd3   : > { %836 = vmatpush.bf16.msra.mxu2 %v3310_v15 }
  0xd4   : > { %v4619_v36 = vsub.f32 %v430_v6, %v462_v35  ;;  %v3301_v6 = vld [vmem:[#allocation9 + $0x60] sm:$0xf] }
  0xd5   : > { %v3302_v9 = vor.u32 %v3703_v7, %v3301_v6  ;;  %v3279_v35 = vld [vmem:[#allocation9 + $0x3c] sm:$0xf0] }
  0xd6   : > { %v478_v40 = vmul.f32 %v4619_v36, %v4619_v36  ;;  %808 = vmatpush.bf16.msra.mxu1 %v3294_v24 }
  0xd7   : > { %778 = vmatpush.bf16.msra.mxu0 %v3302_v9  ;;  %837 = vmatpush.bf16.msra.mxu2 %v3298_v26 }
  0xd8   : > { %492 = vadd.xlane.f32.xlu2 %v478_v40 }
  0xd9   : > { %488 = vadd.xlane.f32.xlu0 %v476_v38  ;;  %484 = vadd.xlane.f32.xlu1 %v474_v39  ;;  %v3698_v38 = vld [vmem:[#allocation9 + $0x40] sm:$0xf0]  ;;  %v3282_v39 = vor.u32 %v3696_v31, %v3279_v35 }
  0xda   : > { %v3286_v40 = vor.u32 %v3698_v38, %v3285_v37 }
  0xdb   : > { %779 = vmatpush.bf16.msra.mxu0 %v3290_v20  ;;  %809 = vmatpush.bf16.msra.mxu1 %v3282_v39 }
  0xdc   : > { %838 = vmatpush.bf16.msra.mxu2 %v3286_v40 }
  0xdf   : > { %780 = vmatpush.bf16.msra.mxu0 %v3278_v33  ;;  %810 = vmatpush.bf16.msra.mxu1 %v3270_v49 }
  0xe0   : > { %839 = vmatpush.bf16.msra.mxu2 %v3274_v50 }
  0xe1   : > { %490 = vadd.xlane.f32.xlu1 %v477_v42  ;;  %v3265_v42 = vld [vmem:[#allocation9 + $0x18] sm:$0xf] }
  0xe2   : > { %v3266_v45 = vor.u32 %v3694_v43, %v3265_v42 }
  0xe3   : > { %811 = vmatpush.bf16.msra.mxu1 %v3258_v60 }
  0xe4   : > { %781 = vmatpush.bf16.msra.mxu0 %v3266_v45  ;;  %840 = vmatpush.bf16.msra.mxu2 %v3262_v61  ;;  %v4656_v45 = vld [vmem:[#allocation7] ss:$0 sm:$0xff] }
  0xe8   : > { %782 = vmatpush.bf16.msra.mxu0 %v3254_v56 }
 0x13c   : > { %v481_v51 = vpop.xlane.xlu0 %480 }
 0x13d   : > { %v496_v55 = vmul.f32 %v481_v51, %v4591_v13 }
 0x13f   : > { %v504_v62 = vadd.f32 1e-05, %v496_v55 }
 0x141   : > { %3916 = vrsqrt.f32 %v504_v62  ;;  %vm518_vm2 = vweird.f32 %v504_v62 }
 0x143   : > { %v487_v63 = vpop.xlane.xlu2 %486 }
 0x144   : > { %v499_v0 = vmul.f32 %v487_v63, %v4591_v13  ;;  %v483_v1 = vpop.xlane.xlu1 %482  ;;  %v448_v2 = vpop.xlane.xlu0 %447 }
 0x145   : > { %v497_v3 = vmul.f32 %v483_v1, %v4591_v13  ;;  %v463_v4 = vmul.f32 %v4591_v13, %v448_v2 }
 0x146   : > { %v4636_v5 = vadd.f32 1e-05, %v499_v0 }
 0x147   : > { %v3917_v6 = vpop.eup %3916  ;;  %v505_v7 = vadd.f32 1e-05, %v497_v3  ;;  %v4639_v8 = vsub.f32 %v4609_v30, %v463_v4 }
 0x148   : > { %v513_v9 = vmul.f32 %v3917_v6, %v504_v62  ;;  %3918 = vrsqrt.f32 %v4636_v5  ;;  %vm519_vm1 = vweird.f32 %v3917_v6  ;;  %vm548_vm9 = vweird.f32 %v4636_v5 }
 0x149   : > { %3920 = vrsqrt.f32 %v505_v7  ;;  %v479_v10 = vmul.f32 %v4639_v8, %v4639_v8  ;;  %vm528_vm3 = vweird.f32 %v505_v7  ;;  %vm520_vm5 = vmor %vm518_vm2, %vm519_vm1 }
 0x14a   : > { %v514_v11 = vmul.f32 %v3917_v6, %v513_v9 }
 0x14b   : > { %494 = vadd.xlane.f32.xlu0 %v479_v10 }
 0x14c   : > { %v515_v12 = vmul.f32 0.5, %v514_v11  ;;  %v485_v14 = vpop.xlane.xlu1 %484  ;;  %v489_v16 = vpop.xlane.xlu0 %488 }
 0x14d   : > { %v498_v15 = vmul.f32 %v485_v14, %v4591_v13  ;;  %v500_v22 = vmul.f32 %v489_v16, %v4591_v13 }
 0x14e   : > { %v4645_v17 = vpop.eup %3918  ;;  %v516_v19 = vsub.f32 1.5, %v515_v12 }
 0x14f   : > { %v3921_v20 = vpop.eup %3920  ;;  %v506_v30 = vadd.f32 1e-05, %v498_v15  ;;  %v543_v24 = vmul.f32 %v4645_v17, %v4636_v5  ;;  %v4650_v29 = vadd.f32 1e-05, %v500_v22  ;;  %vm549_vm10 = vweird.f32 %v4645_v17 }
 0x150   : > { %v523_v21 = vmul.f32 %v3921_v20, %v505_v7  ;;  %v517_v23 = vmul.f32 %v3917_v6, %v516_v19  ;;  %vm529_vm4 = vweird.f32 %v3921_v20  ;;  %vm550_vm12 = vmor %vm548_vm9, %vm549_vm10  ;;  %v493_v19 = vpop.xlane.xlu2 %492  ;;  %vm910_vm9 = vcmask 261120  }
 0x151   : > { %3922 = vrsqrt.f32 %v506_v30  ;;  %v544_v35 = vmul.f32 %v4645_v17, %v543_v24  ;;  %vm530_vm6 = vmor %vm528_vm3, %vm529_vm4  ;;  %vm538_vm7 = vweird.f32 %v506_v30  ;;  %vm558_vm15 = vweird.f32 %v4650_v29 }
 0x152   : > { %v524_v26 = vmul.f32 %v3921_v20, %v523_v21  ;;  %v521_v38 = vsel %vm520_vm5, %v3917_v6, %v517_v23  ;;  %3924 = vrsqrt.f32 %v4650_v29  ;;  %vm964_vm10 = vcmask 523264  }
 0x153   : > { %v592_v44 = vmul.f32 %v521_v38, %v4594_v18  ;;  %v545_v46 = vmul.f32 0.5, %v544_v35 }
 0x154   : > { %v525_v27 = vmul.f32 0.5, %v524_v26  ;;  %v491_v31 = vpop.xlane.xlu1 %490 }
 0x155   : > { %v501_v33 = vmul.f32 %v491_v31, %v4591_v13  ;;  %v603_v51 = vmul.f32 %v4656_v45, %v592_v44  ;;  %v546_v54 = vsub.f32 1.5, %v545_v46 }
 0x156   : > { %v526_v37 = vsub.f32 1.5, %v525_v27 }
 0x157   : > { %v3923_v39 = vpop.eup %3922  ;;  %v509_v40 = vadd.f32 1e-05, %v501_v33 }
 0x158   : > { %v527_v42 = vmul.f32 %v3921_v20, %v526_v37  ;;  %v533_v43 = vmul.f32 %v3923_v39, %v506_v30  ;;  %v3925_v53 = vpop.eup %3924  ;;  %vm539_vm8 = vweird.f32 %v3923_v39 }
 0x159   : > { %3926 = vrsqrt.f32 %v509_v40  ;;  %vm540_vm11 = vmor %vm538_vm7, %vm539_vm8  ;;  %v553_v59 = vmul.f32 %v3925_v53, %v4650_v29  ;;  %vm568_vm13 = vweird.f32 %v509_v40  ;;  %vm559_vm0 = vweird.f32 %v3925_v53 }
 0x15a   : > { %v531_v47 = vsel %vm530_vm6, %v3921_v20, %v527_v42  ;;  %v534_v48 = vmul.f32 %v3923_v39, %v533_v43  ;;  %vm560_vm2 = vmor %vm558_vm15, %vm559_vm0  ;;  %v502_v20 = vmul.f32 %v493_v19, %v4591_v13 }
 0x15b   : > { %v593_v49 = vmul.f32 %v531_v47, %v4604_v28  ;;  %v547_v28 = vmul.f32 %v4645_v17, %v546_v54  ;;  %v554_v62 = vmul.f32 %v3925_v53, %v553_v59 }
 0x15c   : > { %v535_v50 = vmul.f32 0.5, %v534_v48  ;;  %v510_v30 = vadd.f32 1e-05, %v502_v20 }
 0x15d   : > { %v604_v52 = vmul.f32 %v4656_v45, %v593_v49  ;;  %v551_v63 = vsel %vm550_vm12, %v4645_v17, %v547_v28  ;;  %v555_v3 = vmul.f32 0.5, %v554_v62  ;;  %vm1393_vm12 = vcmask 519424  }
 0x15e   : > { %v536_v55 = vsub.f32 1.5, %v535_v50  ;;  %v595_v2 = vmul.f32 %v551_v63, %v4600_v25  ;;  %3928 = vrsqrt.f32 %v510_v30  ;;  %vm578_vm3 = vweird.f32 %v510_v30 }
 0x15f   : > { %v3927_v56 = vpop.eup %3926  ;;  %v611_v57 = vpack.c.bf16 %v604_v52, %v603_v51  ;;  %v556_v7 = vsub.f32 1.5, %v555_v3 }
 0x160   : > { %v537_v18 = vmul.f32 %v3923_v39, %v536_v55  ;;  %v563_v58 = vmul.f32 %v3927_v56, %v509_v40  ;;  %v606_v6 = vmul.f32 %v4656_v45, %v595_v2  ;;  %vm569_vm14 = vweird.f32 %v3927_v56 }
 0x161   : > { %783 = vmatmul.bf16.vlgmr.msra.gmra.mxu0 %v611_v57  ;;  %812 = vmatmul.bf16.vlgmr.msra.gmra.mxu1 %v611_v57  ;;  %vm570_vm1 = vmor %vm568_vm13, %vm569_vm14  ;;  %vm1656_vm13 = vcmask 781824   ;;  %vm1919_vm14 = vcmask 1044224  }
 0x162   : > { %841 = vmatmul.bf16.vlgmr.msra.gmra.mxu2 %v611_v57  ;;  %v541_v60 = vsel %vm540_vm11, %v3923_v39, %v537_v18  ;;  %v564_v61 = vmul.f32 %v3927_v56, %v563_v58  ;;  %vm1130_vm11 = vcmask 257024  }
 0x163   : > { %v594_v0 = vmul.f32 %v541_v60, %v4613_v32  ;;  %v557_v32 = vmul.f32 %v3925_v53, %v556_v7 }
 0x164   : > { %v565_v1 = vmul.f32 0.5, %v564_v61  ;;  %v3929_v21 = vpop.eup %3928 }
 0x165   : > { %v605_v4 = vmul.f32 %v4656_v45, %v594_v0  ;;  %v561_v11 = vsel %vm560_vm2, %v3925_v53, %v557_v32  ;;  %v573_v22 = vmul.f32 %v3929_v21, %v510_v30  ;;  %vm579_vm4 = vweird.f32 %v3929_v21 }
 0x166   : > { %v566_v5 = vsub.f32 1.5, %v565_v1  ;;  %v596_v14 = vmul.f32 %v561_v11, %v4616_v34  ;;  %vm580_vm5 = vmor %vm578_vm3, %vm579_vm4 }
 0x167   : > { %v612_v9 = vpack.c.bf16 %v606_v6, %v605_v4  ;;  %v574_v24 = vmul.f32 %v3929_v21, %v573_v22 }
 0x168   : > { %v567_v10 = vmul.f32 %v3927_v56, %v566_v5  ;;  %v607_v16 = vmul.f32 %v4656_v45, %v596_v14 }
 0x169   : > { %v575_v26 = vmul.f32 0.5, %v574_v24 }
 0x16a   : > { %v571_v25 = vsel %vm570_vm1, %v3927_v56, %v567_v10 }
 0x16b   : > { %v597_v12 = vmul.f32 %v571_v25, %v4628_v41  ;;  %v576_v27 = vsub.f32 1.5, %v575_v26 }
 0x16d   : > { %v608_v15 = vmul.f32 %v4656_v45, %v597_v12  ;;  %v577_v33 = vmul.f32 %v3929_v21, %v576_v27 }
 0x16f   : > { %v613_v17 = vpack.c.bf16 %v608_v15, %v607_v16  ;;  %v581_v39 = vsel %vm580_vm5, %v3929_v21, %v577_v33 }
 0x170   : > { %v598_v42 = vmul.f32 %v581_v39, %v4619_v36 }
 0x171   : > { %788 = vmatmul.bf16.gmra.mxu0 %v612_v9  ;;  %817 = vmatmul.bf16.gmra.mxu1 %v612_v9 }
 0x172   : > { %846 = vmatmul.bf16.gmra.mxu2 %v612_v9  ;;  %v609_v46 = vmul.f32 %v4656_v45, %v598_v42 }
 0x181   : > { %793 = vmatmul.bf16.gmra.mxu0 %v613_v17  ;;  %822 = vmatmul.bf16.gmra.mxu1 %v613_v17 }
 0x182   : > { %851 = vmatmul.bf16.gmra.mxu2 %v613_v17 }
 0x1be   : > { %v495_v23 = vpop.xlane.xlu0 %494 }
 0x1bf   : > { %v503_v41 = vmul.f32 %v495_v23, %v4591_v13 }
 0x1c1   : > { %v511_v34 = vadd.f32 1e-05, %v503_v41 }
 0x1c3   : > { %3930 = vrsqrt.f32 %v511_v34  ;;  %vm588_vm7 = vweird.f32 %v511_v34 }
 0x1c9   : > { %v3931_v29 = vpop.eup %3930 }
 0x1ca   : > { %v583_v31 = vmul.f32 %v3931_v29, %v511_v34  ;;  %vm589_vm6 = vweird.f32 %v3931_v29 }
 0x1cb   : > { %vm590_vm8 = vmor %vm588_vm7, %vm589_vm6 }
 0x1cc   : > { %v584_v35 = vmul.f32 %v3931_v29, %v583_v31 }
 0x1ce   : > { %v585_v37 = vmul.f32 0.5, %v584_v35 }
 0x1d0   : > { %v586_v38 = vsub.f32 1.5, %v585_v37 }
 0x1d2   : > { %v587_v40 = vmul.f32 %v3931_v29, %v586_v38 }
 0x1d4   : > { %v591_v43 = vsel %vm590_vm8, %v3931_v29, %v587_v40 }
 0x1d5   : > { %v599_v44 = vmul.f32 %v591_v43, %v4639_v8 }
 0x1d7   : > { %v610_v47 = vmul.f32 %v4656_v45, %v599_v44 }
 0x1d9   : > { %v614_v48 = vpack.c.bf16 %v610_v47, %v609_v46 }
 0x1db   : > { %798 = vmatmul.bf16.gmra.mxu0 %v614_v48  ;;  %827 = vmatmul.bf16.gmra.mxu1 %v614_v48 }
 0x1dc   : > { %856 = vmatmul.bf16.gmra.mxu2 %v614_v48 }
 0x1de   : > { %v784_v49 = vpop.f32.mrf.mxu0  ;;  %v813_v50 = vpop.f32.mrf.mxu1 }
 0x1df   : > { %v862_v51 = vpack.c.bf16 %v813_v50, %v784_v49 }
 0x1e1   : > { %v886_v55 = vunpack.c.l.b16 %v862_v51  ;;  %v898_v14 = vunpack.c.h.b16 %v862_v51 }
 0x1e5   : > { %v842_v16 = vpop.f32.mrf.mxu2 }
 0x1e6   : > { %v786_v52 = vpop.f32.mrf.mxu0  ;;  %v815_v53 = vpop.f32.mrf.mxu1 }
 0x1e7   : > { %v864_v54 = vpack.c.bf16 %v815_v53, %v786_v52 }
 0x1e9   : > { %v887_v56 = vunpack.c.l.b16 %v864_v54  ;;  %v899_v12 = vunpack.c.h.b16 %v864_v54 }
 0x1eb   : > { %v4681_v36 = vpack.c.b16 %v887_v56, %v886_v55  ;;  %v4699_v15 = vpack.c.b16 %v899_v12, %v898_v14  ;;  %v863_v55 = vpack.c.bf16 %v842_v16, %v842_v16 }
 0x1ed   : > { %v844_v17 = vpop.f32.mrf.mxu2 }
 0x1ee   : > { %v789_v57 = vpop.f32.mrf.mxu0  ;;  %v818_v8 = vpop.f32.mrf.mxu1  ;;  %v865_v52 = vpack.c.bf16 %v844_v17, %v844_v17 }
 0x1ef   : > { %v866_v18 = vpack.c.bf16 %v818_v8, %v789_v57 }
 0x1f0   : > { %v1066_v57 = vunpack.c.l.b16 %v865_v52 }
 0x1f1   : > { %v900_v59 = vunpack.c.h.b16 %v866_v18  ;;  %v888_v1 = vunpack.c.l.b16 %v866_v18  ;;  %v1065_v18 = vunpack.c.l.b16 %v863_v55 }
 0x1f5   : > { %v847_v19 = vpop.f32.mrf.mxu2 }
 0x1f6   : > { %v791_v58 = vpop.f32.mrf.mxu0  ;;  %v820_v28 = vpop.f32.mrf.mxu1  ;;  %v867_v49 = vpack.c.bf16 %v847_v19, %v847_v19 }
 0x1f7   : > { %v868_v45 = vpack.c.bf16 %v820_v28, %v791_v58  ;;  %v4732_v28 = vpack.c.b16 %v1066_v57, %v1065_v18 }
 0x1f8   : > { %v1067_v56 = vunpack.c.l.b16 %v867_v49 }
 0x1f9   : > { %v901_v60 = vunpack.c.h.b16 %v868_v45  ;;  %v889_v0 = vunpack.c.l.b16 %v868_v45  ;;  %v924_v45 = vsel %vm910_vm9, %v4699_v15, 0 }
 0x1fb   : > { %v4683_v61 = vpack.c.b16 %v901_v60, %v900_v59  ;;  %v4687_v2 = vpack.c.b16 %v889_v0, %v888_v1 }
 0x1fd   : > { %1149 = vrot.lane.b32.xlu0 %v4683_v61, %s4378_s1  ;;  %v849_v20 = vpop.f32.mrf.mxu2  ;;  %v927_v58 = vsel %vm910_vm9, %v4683_v61, 0 }
 0x1fe   : > { %v794_v62 = vpop.f32.mrf.mxu0  ;;  %v823_v63 = vpop.f32.mrf.mxu1  ;;  %v869_v46 = vpack.c.bf16 %v849_v20, %v849_v20 }
 0x1ff   : > { %v870_v3 = vpack.c.bf16 %v823_v63, %v794_v62 }
 0x200   : > { %v1068_v53 = vunpack.c.l.b16 %v869_v46 }
 0x201   : > { %v890_v7 = vunpack.c.l.b16 %v870_v3  ;;  %v902_v9 = vunpack.c.h.b16 %v870_v3 }
 0x202   : > { %v4723_v8 = vpack.c.b16 %v1068_v53, %v1067_v56 }
 0x205   : > { %1141 = vrot.lane.b32.xlu0 %v4687_v2, %s4378_s1  ;;  %v852_v30 = vpop.f32.mrf.mxu2 }
 0x206   : > { %v796_v4 = vpop.f32.mrf.mxu0  ;;  %v825_v5 = vpop.f32.mrf.mxu1  ;;  %v871_v42 = vpack.c.bf16 %v852_v30, %v852_v30 }
 0x207   : > { %v872_v6 = vpack.c.bf16 %v825_v5, %v796_v4 }
 0x208   : > { %v1069_v50 = vunpack.c.l.b16 %v871_v42 }
 0x209   : > { %v891_v10 = vunpack.c.l.b16 %v872_v6  ;;  %v903_v32 = vunpack.c.h.b16 %v872_v6 }
 0x20b   : > { %v4691_v25 = vpack.c.b16 %v891_v10, %v890_v7  ;;  %v4693_v11 = vpack.c.b16 %v903_v32, %v902_v9 }
 0x20d   : > { %1412 = vrot.lane.b32.xlu0 %v4683_v61, %s4379_s13  ;;  %1151 = vrot.lane.b32.xlu2 %v4693_v11, %s4378_s1  ;;  %v854_v21 = vpop.f32.mrf.mxu2  ;;  %v930_v51 = vsel %vm910_vm9, %v4693_v11, 0 }
 0x20e   : > { %v873_v39 = vpack.c.bf16 %v854_v21, %v854_v21 }
 0x210   : > { %v1070_v47 = vunpack.c.l.b16 %v873_v39 }
 0x212   : > { %v4718_v54 = vpack.c.b16 %v1070_v47, %v1069_v50 }
 0x215   : > { %1147 = vrot.lane.b32.xlu2 %v4699_v15, %s4378_s1 }
 0x21d   : > { %1414 = vrot.lane.b32.xlu2 %v4693_v11, %s4379_s13 }
 0x258   : > { %v799_v22 = vpop.f32.mrf.mxu0  ;;  %v828_v23 = vpop.f32.mrf.mxu1 }
 0x259   : > { %v874_v41 = vpack.c.bf16 %v828_v23, %v799_v22 }
 0x25b   : > { %v904_v29 = vunpack.c.h.b16 %v874_v41  ;;  %v892_v60 = vunpack.c.l.b16 %v874_v41 }
 0x25f   : > { %v857_v24 = vpop.f32.mrf.mxu2 }
 0x260   : > { %v801_v34 = vpop.f32.mrf.mxu0  ;;  %v830_v26 = vpop.f32.mrf.mxu1  ;;  %v875_v35 = vpack.c.bf16 %v857_v24, %v857_v24 }
 0x261   : > { %v876_v27 = vpack.c.bf16 %v830_v26, %v801_v34 }
 0x262   : > { %v1071_v43 = vunpack.c.l.b16 %v875_v35 }
 0x263   : > { %v905_v31 = vunpack.c.h.b16 %v876_v27  ;;  %v893_v59 = vunpack.c.l.b16 %v876_v27 }
 0x265   : > { %v909_v33 = vpack.c.b16 %v905_v31, %v904_v29  ;;  %v897_v62 = vpack.c.b16 %v893_v59, %v892_v60 }
 0x267   : > { %v859_v37 = vpop.f32.mrf.mxu2  ;;  %1679 = vrot.lane.b32.xlu0 %v909_v33, %s4380_s19  ;;  %1416 = vrot.lane.b32.xlu2 %v909_v33, %s4379_s13  ;;  %v933_v38 = vsel %vm910_vm9, %v909_v33, 0 }
 0x268   : > { %v877_v40 = vpack.c.bf16 %v859_v37, %v859_v37  ;;  %1153 = vrot.lane.b32.xlu1 %v909_v33, %s4378_s1  ;;  %939 = vmatpush.bf16.xpose.msra.mxu3 %v933_v38 }
 0x26a   : > { %v1072_v44 = vunpack.c.l.b16 %v877_v40 }
 0x26c   : > { %v4709_v48 = vpack.c.b16 %v1072_v44, %v1071_v43 }
 0x26e   : > { %1097 = vmatpush.bf16.msrb.mxu0 %v4709_v48 }
 0x26f   : > { %1410 = vrot.lane.b32.xlu0 %v4699_v15, %s4379_s13  ;;  %1673 = vrot.lane.b32.xlu2 %v4699_v15, %s4380_s19  ;;  %v1150_v0 = vpop.permute.xlu0 %1149 }
 0x270   : > { %1139 = vrot.lane.b32.xlu1 %v4681_v36, %s4378_s1  ;;  %940 = vmatpush.bf16.xpose.msra.mxu3 %v930_v51  ;;  %v1171_v17 = vsel %vm910_vm9, %v1150_v0, 0 }
 0x272   : > { %1098 = vmatpush.bf16.msrb.mxu0 %v4718_v54 }
 0x276   : > { %1099 = vmatpush.bf16.msrb.mxu0 %v4723_v8 }
 0x277   : > { %1665 = vrot.lane.b32.xlu0 %v4681_v36, %s4380_s19  ;;  %1404 = vrot.lane.b32.xlu2 %v4687_v2, %s4379_s13  ;;  %v1142_v4 = vpop.permute.xlu0 %1141 }
 0x278   : > { %1143 = vrot.lane.b32.xlu1 %v4691_v25, %s4378_s1  ;;  %941 = vmatpush.bf16.xpose.msra.mxu3 %v927_v58 }
 0x27a   : > { %1100 = vmatpush.bf16.msrb.mxu0 %v4732_v28 }
 0x27f   : > { %1406 = vrot.lane.b32.xlu0 %v4691_v25, %s4379_s13  ;;  %1669 = vrot.lane.b32.xlu2 %v4691_v25, %s4380_s19  ;;  %v1413_v5 = vpop.permute.xlu0 %1412 }
 0x280   : > { %1677 = vrot.lane.b32.xlu1 %v4693_v11, %s4380_s19  ;;  %942 = vmatpush.bf16.xpose.msra.mxu3 %v924_v45  ;;  %v1434_v6 = vsel %vm910_vm9, %v1413_v5, 0 }
 0x287   : > { %1304 = vrot.lane.b32.xlu2 %v4718_v54, %s4378_s1  ;;  %3347 = vmatmul.msk.bf16.vlgmr.msra.gmra.mxu3 %vm910_vm9, %v4681_v36 }
 0x288   : > { %1675 = vrot.lane.b32.xlu1 %v4683_v61, %s4380_s19  ;;  %1671 = vrot.lane.b32.xlu0 %v897_v62, %s4380_s19  ;;  %v1152_v61 = vpop.permute.xlu2 %1151 }
 0x289   : > { %v1174_v12 = vsel %vm910_vm9, %v1152_v61, 0 }
 0x28f   : > { %1300 = vrot.lane.b32.xlu2 %v4732_v28, %s4378_s1 }
 0x290   : > { %1402 = vrot.lane.b32.xlu1 %v4681_v36, %s4379_s13  ;;  %1306 = vrot.lane.b32.xlu0 %v4709_v48, %s4378_s1  ;;  %v1148_v36 = vpop.permute.xlu2 %1147 }
 0x291   : > { %v1168_v21 = vsel %vm910_vm9, %v1148_v36, 0 }
 0x297   : > { %3348 = vmatmul.msk.bf16.gmra.mxu3 %vm910_vm9, %v4687_v2  ;;  %1145 = vrot.lane.b32.xlu2 %v897_v62, %s4378_s1 }
 0x298   : > { %1667 = vrot.lane.b32.xlu1 %v4687_v2, %s4380_s19  ;;  %v1415_v63 = vpop.permute.xlu2 %1414 }
 0x299   : > { %v1437_v2 = vsel %vm910_vm9, %v1415_v63, 0 }
 0x2a0   : > { %1302 = vrot.lane.b32.xlu1 %v4723_v8, %s4378_s1 }
 0x2a7   : > { %3349 = vmatmul.msk.bf16.gmra.mxu3 %vm910_vm9, %v4691_v25 }
 0x2a8   : > { %1408 = vrot.lane.b32.xlu1 %v897_v62, %s4379_s13 }
 0x2b7   : > { %3350 = vmatmul.msk.bf16.gmra.mxu3 %vm910_vm9, %v897_v62 }
 0x2c1   : > { %v1417_v1 = vpop.permute.xlu2 %1416 }
 0x2c2   : > { %v1440_v3 = vsel %vm910_vm9, %v1417_v1, 0 }
 0x2c3   : > { %1446 = vmatpush.bf16.xpose.msrb.mxu3 %v1440_v3 }
 0x2c9   : > { %v1674_v14 = vpop.permute.xlu2 %1673 }
 0x2ca   : > { %v1694_v38 = vsel %vm910_vm9, %v1674_v14, 0 }
 0x2cb   : > { %1447 = vmatpush.bf16.xpose.msrb.mxu3 %v1437_v2 }
 0x2d1   : > { %v1405_v20 = vpop.permute.xlu2 %1404 }
 0x2d3   : > { %1448 = vmatpush.bf16.xpose.msrb.mxu3 %v1434_v6 }
 0x2d9   : > { %v1680_v7 = vpop.permute.xlu0 %1679  ;;  %v1670_v24 = vpop.permute.xlu2 %1669 }
 0x2da   : > { %v1154_v9 = vpop.permute.xlu1 %1153  ;;  %v1703_v22 = vsel %vm910_vm9, %v1680_v7, 0 }
 0x2db   : > { %v1177_v10 = vsel %vm910_vm9, %v1154_v9, 0 }
 0x2dc   : > { %1183 = vmatpush.bf16.xpose.msrb.mxu1 %v1177_v10 }
 0x2e1   : > { %v1411_v32 = vpop.permute.xlu0 %1410  ;;  %v1305_v31 = vpop.permute.xlu2 %1304 }
 0x2e2   : > { %v1140_v25 = vpop.permute.xlu1 %1139  ;;  %v1431_v11 = vsel %vm910_vm9, %v1411_v32, 0 }
 0x2e3   : > { %1449 = vmatpush.bf16.xpose.msrb.mxu3 %v1431_v11 }
 0x2e4   : > { %1184 = vmatpush.bf16.xpose.msrb.mxu1 %v1174_v12 }
 0x2e9   : > { %v1666_v15 = vpop.permute.xlu0 %1665  ;;  %v1301_v43 = vpop.permute.xlu2 %1300 }
 0x2ea   : > { %v1144_v16 = vpop.permute.xlu1 %1143 }
 0x2ec   : > { %1185 = vmatpush.bf16.xpose.msrb.mxu1 %v1171_v17 }
 0x2f1   : > { %v1407_v19 = vpop.permute.xlu0 %1406  ;;  %v1146_v50 = vpop.permute.xlu2 %1145 }
 0x2f2   : > { %v1678_v30 = vpop.permute.xlu1 %1677 }
 0x2f3   : > { %v1700_v34 = vsel %vm910_vm9, %v1678_v30, 0 }
 0x2f4   : > { %1186 = vmatpush.bf16.xpose.msrb.mxu1 %v1168_v21 }
 0x2fa   : > { %v1676_v23 = vpop.permute.xlu1 %1675  ;;  %v1672_v41 = vpop.permute.xlu0 %1671 }
 0x2fb   : > { %3355 = vmatmul.msk.bf16.vlgmr.msrb.gmra.mxu1 %vm910_vm9, %v1140_v25  ;;  %v1697_v29 = vsel %vm910_vm9, %v1676_v23, 0 }
 0x2fc   : > { %1709 = vmatpush.bf16.xpose.msra.mxu1 %v1703_v22 }
 0x302   : > { %v1403_v26 = vpop.permute.xlu1 %1402  ;;  %v1307_v27 = vpop.permute.xlu0 %1306 }
 0x303   : > { %1328 = vmatpush.bf16.msrb.mxu2 %v1307_v27  ;;  %3363 = vmatmul.msk.bf16.vlgmr.msrb.gmra.mxu3 %vm910_vm9, %v1403_v26 }
 0x304   : > { %1710 = vmatpush.bf16.xpose.msra.mxu1 %v1700_v34 }
 0x307   : > { %1329 = vmatpush.bf16.msrb.mxu2 %v1305_v31 }
 0x30a   : > { %v1668_v33 = vpop.permute.xlu1 %1667  ;;  %v944_v35 = vpop.f32.mrf.mxu3 }
 0x30b   : > { %3356 = vmatmul.msk.bf16.gmra.mxu1 %vm910_vm9, %v1142_v4  ;;  %v965_v37 = vsel %vm964_vm10, %v944_v35, -inf }
 0x30c   : > { %1711 = vmatpush.bf16.xpose.msra.mxu1 %v1697_v29  ;;  %966 = vmax.xlane.f32.xlu0 %v965_v37 }
 0x312   : > { %v1303_v39 = vpop.permute.xlu1 %1302  ;;  %v946_v40 = vpop.f32.mrf.mxu3 }
 0x313   : > { %1330 = vmatpush.bf16.msrb.mxu2 %v1303_v39  ;;  %3364 = vmatmul.msk.bf16.gmra.mxu3 %vm910_vm9, %v1405_v20  ;;  %v968_v42 = vsel %vm964_vm10, %v946_v40, -inf }
 0x314   : > { %1712 = vmatpush.bf16.xpose.msra.mxu1 %v1694_v38  ;;  %969 = vmax.xlane.f32.xlu2 %v968_v42 }
 0x317   : > { %1331 = vmatpush.bf16.msrb.mxu2 %v1301_v43 }
 0x31a   : > { %v949_v44 = vpop.f32.mrf.mxu3  ;;  %v1409_v53 = vpop.permute.xlu1 %1408 }
 0x31b   : > { %3357 = vmatmul.msk.bf16.gmra.mxu1 %vm910_vm9, %v1144_v16  ;;  %v971_v46 = vsel %vm964_vm10, %v949_v44, -inf }
 0x31c   : > { %972 = vmax.xlane.f32.xlu2 %v971_v46 }
 0x322   : > { %v4789_v47 = vpop.f32.mrf.mxu3 }
 0x323   : > { %3365 = vmatmul.msk.bf16.gmra.mxu3 %vm910_vm9, %v1407_v19  ;;  %v974_v49 = vsel %vm964_vm10, %v4789_v47, -inf }
 0x324   : > { %975 = vmax.xlane.f32.xlu1 %v974_v49 }
 0x32a   : > { %v4794_v51 = vpop.f32.mrf.mxu3 }
 0x32b   : > { %3358 = vmatmul.msk.bf16.gmra.mxu1 %vm910_vm9, %v1146_v50  ;;  %v977_v52 = vsel %vm964_vm10, %v4794_v51, -inf }
 0x32c   : > { %978 = vmax.xlane.f32.xlu1 %v977_v52 }
 0x332   : > { %v4799_v55 = vpop.f32.mrf.mxu3 }
 0x333   : > { %3366 = vmatmul.msk.bf16.gmra.mxu3 %vm910_vm9, %v1409_v53  ;;  %v980_v56 = vsel %vm964_vm10, %v4799_v55, -inf }
 0x334   : > { %981 = vmax.xlane.f32.xlu0 %v980_v56 }
 0x33a   : > { %v4804_v57 = vpop.f32.mrf.mxu3 }
 0x33b   : > { %3371 = vmatmul.msk.bf16.vlgmr.msra.gmra.mxu1 %vm910_vm9, %v1666_v15  ;;  %v983_v18 = vsel %vm964_vm10, %v4804_v57, -inf }
 0x33c   : > { %984 = vmax.xlane.f32.xlu2 %v983_v18 }
 0x342   : > { %v4809_v58 = vpop.f32.mrf.mxu3 }
 0x343   : > { %v986_v45 = vsel %vm964_vm10, %v4809_v58, -inf }
 0x344   : > { %987 = vmax.xlane.f32.xlu1 %v986_v45 }
 0x34b   : > { %3372 = vmatmul.msk.bf16.gmra.mxu1 %vm910_vm9, %v1668_v33 }
 0x35b   : > { %3373 = vmatmul.msk.bf16.gmra.mxu1 %vm910_vm9, %v1670_v24 }
 0x36b   : > { %3374 = vmatmul.msk.bf16.gmra.mxu1 %vm910_vm9, %v1672_v41 }
 0x378   : > { %v4816_v59 = vpop.f32.mrf.mxu1 }
 0x379   : > { %v1208_v60 = vsel %vm964_vm10, %v4816_v59, -inf }
 0x37a   : > { %1209 = vmax.xlane.f32.xlu2 %v1208_v60 }
 0x37f   : > { %v967_v36 = vpop.xlane.xlu0 %966 }
 0x380   : > { %v4820_v62 = vpop.f32.mrf.mxu1  ;;  %v989_v63 = vsub.f32 %v944_v35, %v967_v36 }
 0x381   : > { %v1211_v61 = vsel %vm964_vm10, %v4820_v62, -inf }
 0x382   : > { %1212 = vmax.xlane.f32.xlu1 %v1211_v61  ;;  %v997_v6 = vmul.f32 1.442695, %v989_v63 }
 0x386   : > { %v4824_v0 = vpop.f32.mrf.mxu3 }
 0x387   : > { %v970_v1 = vpop.xlane.xlu2 %969  ;;  %v1471_v3 = vsel %vm964_vm10, %v4824_v0, -inf }
 0x388   : > { %v990_v4 = vsub.f32 %v946_v40, %v970_v1  ;;  %v4828_v2 = vpop.f32.mrf.mxu1  ;;  %1472 = vmax.xlane.f32.xlu0 %v1471_v3 }
 0x389   : > { %v1214_v5 = vsel %vm964_vm10, %v4828_v2, -inf }
 0x38a   : > { %v999_v7 = vmul.f32 1.442695, %v990_v4  ;;  %1215 = vmax.xlane.f32.xlu1 %v1214_v5 }
 0x38c   : > { %3932 = vpow2.f32 %v999_v7 }
 0x38d   : > { %3934 = vpow2.f32 %v997_v6 }
 0x38e   : > { %v4832_v9 = vpop.f32.mrf.mxu3 }
 0x38f   : > { %v973_v10 = vpop.xlane.xlu2 %972  ;;  %v1474_v32 = vsel %vm964_vm10, %v4832_v9, -inf }
 0x390   : > { %v991_v25 = vsub.f32 %v949_v44, %v973_v10  ;;  %v4836_v11 = vpop.f32.mrf.mxu1  ;;  %1475 = vmax.xlane.f32.xlu0 %v1474_v32 }
 0x391   : > { %v1217_v34 = vsel %vm964_vm10, %v4836_v11, -inf }
 0x392   : > { %v4838_v12 = vpop.eup %3932  ;;  %v1001_v14 = vmul.f32 1.442695, %v991_v25 }
 0x393   : > { %v1016_v15 = vsel %vm964_vm10, %v4838_v12, 0.0  ;;  %v4842_v16 = vpop.eup %3934 }
 0x394   : > { %1017 = vadd.xlane.f32.xlu1 %v1016_v15  ;;  %3936 = vpow2.f32 %v1001_v14  ;;  %v1013_v30 = vsel %vm964_vm10, %v4842_v16, 0.0 }
 0x396   : > { %v4844_v17 = vpop.f32.mrf.mxu3 }
 0x397   : > { %v976_v19 = vpop.xlane.xlu1 %975  ;;  %v1477_v20 = vsel %vm964_vm10, %v4844_v17, -inf }
 0x398   : > { %v4850_v21 = vpop.f32.mrf.mxu1  ;;  %1478 = vmax.xlane.f32.xlu2 %v1477_v20  ;;  %1014 = vadd.xlane.f32.xlu0 %v1013_v30  ;;  %v992_v33 = vsub.f32 %v4789_v47, %v976_v19 }
 0x399   : > { %v1220_v53 = vsel %vm964_vm10, %v4850_v21, -inf }
 0x39a   : > { %v4852_v22 = vpop.eup %3936  ;;  %v1003_v40 = vmul.f32 1.442695, %v992_v33 }
 0x39b   : > { %v1019_v24 = vsel %vm964_vm10, %v4852_v22, 0.0 }
 0x39e   : > { %v4854_v23 = vpop.f32.mrf.mxu3 }
 0x39f   : > { %v979_v41 = vpop.xlane.xlu1 %978  ;;  %v1480_v39 = vsel %vm964_vm10, %v4854_v23, -inf }
 0x3a0   : > { %v993_v26 = vsub.f32 %v4794_v51, %v979_v41  ;;  %v4861_v27 = vpop.f32.mrf.mxu1  ;;  %1020 = vadd.xlane.f32.xlu2 %v1019_v24  ;;  %1218 = vmax.xlane.f32.xlu0 %v1217_v34 }
 0x3a1   : > { %v1223_v35 = vsel %vm964_vm10, %v4861_v27, -inf }
 0x3a2   : > { %v1005_v29 = vmul.f32 1.442695, %v993_v26 }
 0x3a4   : > { %3938 = vpow2.f32 %v1005_v29 }
 0x3a5   : > { %3940 = vpow2.f32 %v1003_v40 }
 0x3a6   : > { %v4863_v31 = vpop.f32.mrf.mxu3 }
 0x3a7   : > { %v1483_v37 = vsel %vm964_vm10, %v4863_v31, -inf  ;;  %v982_v42 = vpop.xlane.xlu0 %981 }
 0x3a8   : > { %v4870_v38 = vpop.f32.mrf.mxu1  ;;  %1224 = vmax.xlane.f32.xlu2 %v1223_v35  ;;  %1484 = vmax.xlane.f32.xlu1 %v1483_v37  ;;  %v994_v44 = vsub.f32 %v4799_v55, %v982_v42 }
 0x3a9   : > { %1481 = vmax.xlane.f32.xlu0 %v1480_v39 }
 0x3aa   : > { %v4874_v43 = vpop.eup %3938  ;;  %v1007_v55 = vmul.f32 1.442695, %v994_v44 }
 0x3ab   : > { %v1025_v49 = vsel %vm964_vm10, %v4874_v43, 0.0  ;;  %v4888_v18 = vpop.eup %3940 }
 0x3ac   : > { %3942 = vpow2.f32 %v1007_v55  ;;  %v1022_v63 = vsel %vm964_vm10, %v4888_v18, 0.0 }
 0x3ae   : > { %v4877_v46 = vpop.f32.mrf.mxu3 }
 0x3af   : > { %v985_v47 = vpop.xlane.xlu2 %984  ;;  %v1486_v50 = vsel %vm964_vm10, %v4877_v46, -inf }
 0x3b0   : > { %v995_v51 = vsub.f32 %v4804_v57, %v985_v47  ;;  %v4884_v52 = vpop.f32.mrf.mxu1  ;;  %1026 = vadd.xlane.f32.xlu1 %v1025_v49  ;;  %1487 = vmax.xlane.f32.xlu2 %v1486_v50  ;;  %v1226_v57 = vsel %vm964_vm10, %v4870_v38, -inf }
 0x3b1   : > { %1221 = vmax.xlane.f32.xlu0 %v1220_v53  ;;  %v1229_v60 = vsel %vm964_vm10, %v4884_v52, -inf }
 0x3b2   : > { %v1009_v56 = vmul.f32 1.442695, %v995_v51  ;;  %v4899_v1 = vpop.eup %3942 }
 0x3b3   : > { %v1028_v5 = vsel %vm964_vm10, %v4899_v1, 0.0 }
 0x3b4   : > { %3944 = vpow2.f32 %v1009_v56 }
 0x3b6   : > { %v4937_v33 = vpop.f32.mrf.mxu3 }
 0x3b7   : > { %v988_v45 = vpop.xlane.xlu1 %987 }
 0x3b8   : > { %v996_v61 = vsub.f32 %v4809_v58, %v988_v45  ;;  %v4895_v36 = vpop.f32.mrf.mxu1  ;;  %1230 = vmax.xlane.f32.xlu1 %v1229_v60  ;;  %1227 = vmax.xlane.f32.xlu2 %v1226_v57 }
 0x3b9   : > { %1023 = vadd.xlane.f32.xlu0 %v1022_v63  ;;  %v1734_v32 = vsel %vm964_vm10, %v4895_v36, -inf }
 0x3ba   : > { %v1011_v3 = vmul.f32 1.442695, %v996_v61  ;;  %v4901_v4 = vpop.eup %3944  ;;  %v1489_v61 = vsel %vm964_vm10, %v4937_v33, -inf }
 0x3bb   : > { %v1031_v58 = vsel %vm964_vm10, %v4901_v4, 0.0 }
 0x3bc   : > { %3946 = vpow2.f32 %v1011_v3 }
 0x3be   : > { %v4944_v47 = vpop.f32.mrf.mxu3 }
 0x3bf   : > { %v1492_v53 = vsel %vm964_vm10, %v4944_v47, -inf }
 0x3c0   : > { %v4905_v6 = vpop.f32.mrf.mxu1  ;;  %1029 = vadd.xlane.f32.xlu2 %v1028_v5 }
 0x3c1   : > { %1032 = vadd.xlane.f32.xlu0 %v1031_v58  ;;  %v1737_v7 = vsel %vm964_vm10, %v4905_v6, -inf }
 0x3c2   : > { %1738 = vmax.xlane.f32.xlu1 %v1737_v7  ;;  %v4911_v10 = vpop.eup %3946 }
 0x3c3   : > { %v1034_v14 = vsel %vm964_vm10, %v4911_v10, 0.0 }
 0x3c8   : > { %v4915_v25 = vpop.f32.mrf.mxu1  ;;  %1735 = vmax.xlane.f32.xlu2 %v1734_v32 }
 0x3c9   : > { %v1740_v19 = vsel %vm964_vm10, %v4915_v25, -inf }
 0x3ca   : > { %1035 = vadd.xlane.f32.xlu1 %v1034_v14 }
 0x3d0   : > { %v4919_v15 = vpop.f32.mrf.mxu1 }
 0x3d1   : > { %v1743_v20 = vsel %vm964_vm10, %v4919_v15, -inf }
 0x3d2   : > { %1741 = vmax.xlane.f32.xlu1 %v1740_v19  ;;  %1744 = vmax.xlane.f32.xlu2 %v1743_v20 }
 0x3d8   : > { %v4925_v30 = vpop.f32.mrf.mxu1 }
 0x3d9   : > { %v1746_v41 = vsel %vm964_vm10, %v4925_v30, -inf }
 0x3da   : > { %1747 = vmax.xlane.f32.xlu0 %v1746_v41 }
 0x3e0   : > { %v4929_v24 = vpop.f32.mrf.mxu1 }
 0x3e1   : > { %v1749_v34 = vsel %vm964_vm10, %v4929_v24, -inf }
 0x3e2   : > { %1750 = vmax.xlane.f32.xlu1 %v1749_v34 }
 0x3e8   : > { %v4933_v26 = vpop.f32.mrf.mxu1 }
 0x3e9   : > { %v1752_v29 = vsel %vm964_vm10, %v4933_v26, -inf }
 0x3ea   : > { %1753 = vmax.xlane.f32.xlu2 %v1752_v29 }
 0x3ed   : > { %v1210_v35 = vpop.xlane.xlu2 %1209 }
 0x3ee   : > { %v1232_v37 = vsub.f32 %v4816_v59, %v1210_v35 }
 0x3f0   : > { %v1240_v39 = vmul.f32 1.442695, %v1232_v37  ;;  %v4940_v40 = vpop.f32.mrf.mxu1 }
 0x3f1   : > { %v1755_v42 = vsel %vm964_vm10, %v4940_v40, -inf }
 0x3f2   : > { %3948 = vpow2.f32 %v1240_v39  ;;  %1756 = vmax.xlane.f32.xlu0 %v1755_v42 }
 0x3f5   : > { %v1213_v44 = vpop.xlane.xlu1 %1212 }
 0x3f6   : > { %v1233_v49 = vsub.f32 %v4820_v62, %v1213_v44 }
 0x3f8   : > { %v4947_v50 = vpop.eup %3948  ;;  %v1242_v51 = vmul.f32 1.442695, %v1233_v49 }
 0x3f9   : > { %v1256_v59 = vsel %vm964_vm10, %v4947_v50, 0.0 }
 0x3fa   : > { %3950 = vpow2.f32 %v1242_v51  ;;  %1493 = vmax.xlane.f32.xlu0 %v1492_v53  ;;  %1257 = vadd.xlane.f32.xlu2 %v1256_v59 }
 0x3fb   : > { %v1473_v55 = vpop.xlane.xlu0 %1472 }
 0x3fd   : > { %v1216_v56 = vpop.xlane.xlu1 %1215 }
 0x3fe   : > { %v1234_v45 = vsub.f32 %v4828_v2, %v1216_v56 }
 0x400   : > { %v4954_v60 = vpop.eup %3950  ;;  %v1244_v57 = vmul.f32 1.442695, %v1234_v45 }
 0x401   : > { %v1259_v62 = vsel %vm964_vm10, %v4954_v60, 0.0 }
 0x402   : > { %3952 = vpow2.f32 %v1244_v57  ;;  %1260 = vadd.xlane.f32.xlu1 %v1259_v62  ;;  %1490 = vmax.xlane.f32.xlu2 %v1489_v61 }
 0x403   : > { %v4960_v63 = vpop.xlane.xlu0 %1475 }
 0x407   : > { %v1018_v3 = vpop.xlane.xlu1 %1017 }
 0x408   : > { %v4962_v5 = vpop.eup %3952  ;;  %3954 = vrcp.f32 %v1018_v3 }
 0x409   : > { %v1262_v2 = vsel %vm964_vm10, %v4962_v5, 0.0 }
 0x40a   : > { %1263 = vadd.xlane.f32.xlu0 %v1262_v2  ;;  %v1495_v2 = vsub.f32 %v4824_v0, %v1473_v55 }
 0x40b   : > { %v4966_v58 = vpop.xlane.xlu2 %1478  ;;  %v1015_v7 = vpop.xlane.xlu0 %1014 }
 0x40c   : > { %3956 = vrcp.f32 %v1015_v7 }
 0x40e   : > { %v3955_v32 = vpop.eup %3954 }
 0x40f   : > { %v1046_v19 = vmul.f32 %v3955_v32, %v4838_v12 }
 0x412   : > { %v3957_v14 = vpop.eup %3956 }
 0x413   : > { %v1045_v20 = vmul.f32 %v3957_v14, %v4842_v16  ;;  %v1021_v41 = vpop.xlane.xlu2 %1020  ;;  %v1219_v34 = vpop.xlane.xlu0 %1218 }
 0x414   : > { %v1235_v29 = vsub.f32 %v4836_v11, %v1219_v34 }
 0x415   : > { %v1053_v35 = vpack.c.bf16 %v1046_v19, %v1045_v20  ;;  %v1503_v20 = vmul.f32 1.442695, %v1495_v2 }
 0x416   : > { %v1246_v37 = vmul.f32 1.442695, %v1235_v29 }
 0x417   : > { %3351 = vmatmul.msk.bf16.vlgmr.msrb.gmra.mxu0 %vm964_vm10, %v1053_v35 }
 0x418   : > { %3958 = vpow2.f32 %v1246_v37 }
 0x41a   : > { %1830 = vrot.lane.b32.xlu2 %v4718_v54, %s4380_s19 }
 0x41b   : > { %v1225_v39 = vpop.xlane.xlu2 %1224  ;;  %1832 = vrot.lane.b32.xlu1 %v4709_v48, %s4380_s19  ;;  %v4982_v11 = vpop.xlane.xlu1 %1484 }
 0x41c   : > { %v4976_v42 = vpop.xlane.xlu0 %1481 }
 0x41e   : > { %v4978_v12 = vpop.eup %3958 }
 0x41f   : > { %v1265_v16 = vsel %vm964_vm10, %v4978_v12, 0.0 }
 0x420   : > { %1266 = vadd.xlane.f32.xlu0 %v1265_v16 }
 0x423   : > { %v4984_v44 = vpop.xlane.xlu2 %1487  ;;  %v1027_v59 = vpop.xlane.xlu1 %1026 }
 0x424   : > { %v1222_v49 = vpop.xlane.xlu0 %1221 }
 0x425   : > { %v1236_v51 = vsub.f32 %v4850_v21, %v1222_v49 }
 0x427   : > { %v1248_v53 = vmul.f32 1.442695, %v1236_v51 }
 0x429   : > { %3960 = vpow2.f32 %v1248_v53 }
 0x42a   : > { %3962 = vrcp.f32 %v1021_v41 }
 0x42b   : > { %v1228_v56 = vpop.xlane.xlu2 %1227  ;;  %v1231_v21 = vpop.xlane.xlu1 %1230 }
 0x42c   : > { %v1024_v45 = vpop.xlane.xlu0 %1023  ;;  %v1238_v62 = vsub.f32 %v4870_v38, %v1228_v56  ;;  %v1237_v38 = vsub.f32 %v4861_v27, %v1225_v39 }
 0x42d   : > { %3964 = vrcp.f32 %v1024_v45 }
 0x42e   : > { %v1252_v32 = vmul.f32 1.442695, %v1238_v62  ;;  %v1250_v35 = vmul.f32 1.442695, %v1237_v38 }
 0x42f   : > { %v4987_v57 = vpop.eup %3960 }
 0x430   : > { %v1268_v61 = vsel %vm964_vm10, %v4987_v57, 0.0  ;;  %v3963_v3 = vpop.eup %3962  ;;  %3966 = vpow2.f32 %v1252_v32  ;;  %v1496_v32 = vsub.f32 %v4832_v9, %v4960_v63 }
 0x431   : > { %1269 = vadd.xlane.f32.xlu0 %v1268_v61  ;;  %v1047_v14 = vmul.f32 %v3963_v3, %v4852_v22  ;;  %v1239_v3 = vsub.f32 %v4884_v52, %v1231_v21 }
 0x433   : > { %v3965_v7 = vpop.eup %3964  ;;  %v1030_v41 = vpop.xlane.xlu2 %1029  ;;  %v1254_v2 = vmul.f32 1.442695, %v1239_v3 }
 0x434   : > { %v1048_v19 = vmul.f32 %v3965_v7, %v4888_v18  ;;  %3968 = vrcp.f32 %v1030_v41  ;;  %v1033_v53 = vpop.xlane.xlu0 %1032  ;;  %v1497_v41 = vsub.f32 %v4844_v17, %v4966_v58  ;;  %v1498_v58 = vsub.f32 %v4854_v23, %v4976_v42 }
 0x435   : > { %3970 = vpow2.f32 %v1503_v20  ;;  %v1739_v29 = vpop.xlane.xlu1 %1738 }
 0x436   : > { %v1054_v34 = vpack.c.bf16 %v1048_v19, %v1047_v14  ;;  %3972 = vrcp.f32 %v1027_v59  ;;  %v4997_v0 = vpop.eup %3966  ;;  %v1507_v38 = vmul.f32 1.442695, %v1497_v41 }
 0x437   : > { %v1274_v18 = vsel %vm964_vm10, %v4997_v0, 0.0  ;;  %3974 = vpow2.f32 %v1250_v35 }
 0x438   : > { %3352 = vmatmul.msk.bf16.gmra.mxu0 %vm964_vm10, %v1054_v34 }
 0x43a   : > { %v3969_v55 = vpop.eup %3968 }
 0x43b   : > { %v4999_v37 = vpop.eup %3970  ;;  %v1050_v16 = vmul.f32 %v3969_v55, %v4899_v1  ;;  %v1736_v61 = vpop.xlane.xlu2 %1735 }
 0x43c   : > { %v3973_v22 = vpop.eup %3972  ;;  %v1519_v49 = vsel %vm964_vm10, %v4999_v37, 0.0 }
 0x43d   : > { %v1049_v27 = vmul.f32 %v3973_v22, %v4874_v43  ;;  %v1036_v39 = vpop.xlane.xlu1 %1035  ;;  %v5010_v59 = vpop.eup %3974 }
 0x43e   : > { %3976 = vrcp.f32 %v1036_v39  ;;  %v1271_v1 = vsel %vm964_vm10, %v5010_v59, 0.0 }
 0x43f   : > { %v1055_v51 = vpack.c.bf16 %v1050_v16, %v1049_v27  ;;  %3978 = vrcp.f32 %v1033_v53  ;;  %v1758_v53 = vsub.f32 %v4895_v36, %v1736_v61 }
 0x440   : > { %3980 = vpow2.f32 %v1254_v2 }
 0x441   : > { %v1766_v23 = vmul.f32 1.442695, %v1758_v53 }
 0x443   : > { %1275 = vadd.xlane.f32.xlu2 %v1274_v18 }
 0x444   : > { %v3977_v56 = vpop.eup %3976 }
 0x445   : > { %1569 = vrot.lane.b32.xlu0 %v4709_v48, %s4379_s13  ;;  %1520 = vadd.xlane.f32.xlu1 %v1519_v49  ;;  %v3979_v45 = vpop.eup %3978  ;;  %v1052_v43 = vmul.f32 %v3977_v56, %v4911_v10  ;;  %v1745_v7 = vpop.xlane.xlu2 %1744 }
 0x446   : > { %v1051_v48 = vmul.f32 %v3979_v45, %v4901_v4  ;;  %v5024_v10 = vpop.xlane.xlu1 %1741  ;;  %v1505_v4 = vmul.f32 1.442695, %v1496_v32  ;;  %v5030_v19 = vpop.eup %3980  ;;  %v1761_v18 = vsub.f32 %v4919_v15, %v1745_v7 }
 0x447   : > { %v1277_v9 = vsel %vm964_vm10, %v5030_v19, 0.0 }
 0x448   : > { %3353 = vmatmul.msk.bf16.gmra.mxu0 %vm964_vm10, %v1055_v51  ;;  %v1056_v62 = vpack.c.bf16 %v1052_v43, %v1051_v48  ;;  %3982 = vpow2.f32 %v1505_v4  ;;  %v1772_v39 = vmul.f32 1.442695, %v1761_v18  ;;  %v1509_v51 = vmul.f32 1.442695, %v1498_v58 }
 0x44d   : > { %1272 = vadd.xlane.f32.xlu1 %v1271_v1  ;;  %v1748_v21 = vpop.xlane.xlu0 %1747 }
 0x455   : > { %v1751_v52 = vpop.xlane.xlu1 %1750 }
 0x456   : > { %v1763_v48 = vsub.f32 %v4929_v24, %v1751_v52  ;;  %v1499_v52 = vsub.f32 %v4863_v31, %v4982_v11 }
 0x458   : > { %3354 = vmatmul.msk.bf16.gmra.mxu0 %vm964_vm10, %v1056_v62  ;;  %v1776_v2 = vmul.f32 1.442695, %v1763_v48 }
 0x45b   : > { %1828 = vrot.lane.b32.xlu2 %v4723_v8, %s4380_s19 }
 0x45d   : > { %v5028_v14 = vpop.xlane.xlu2 %1753 }
 0x45e   : > { %v1764_v31 = vsub.f32 %v4933_v26, %v5028_v14 }
 0x463   : > { %1567 = vrot.lane.b32.xlu2 %v4718_v54, %s4379_s13  ;;  %v1759_v54 = vsub.f32 %v4905_v6, %v1739_v29 }
 0x465   : > { %v1768_v63 = vmul.f32 1.442695, %v1759_v54  ;;  %v5043_v29 = vpop.xlane.xlu0 %1756 }
 0x466   : > { %1565 = vrot.lane.b32.xlu1 %v4723_v8, %s4379_s13  ;;  %v5037_v8 = vpop.eup %3982 }
 0x467   : > { %v1522_v6 = vsel %vm964_vm10, %v5037_v8, 0.0 }
 0x46b   : > { %1826 = vrot.lane.b32.xlu2 %v4732_v28, %s4380_s19 }
 0x46d   : > { %v1258_v20 = vpop.xlane.xlu2 %1257  ;;  %v5058_v15 = vpop.xlane.xlu0 %1493 }
 0x46e   : > { %3984 = vrcp.f32 %v1258_v20  ;;  %v1511_v20 = vmul.f32 1.442695, %v1499_v52  ;;  %v1500_v52 = vsub.f32 %v4877_v46, %v4984_v44 }
 0x46f   : > { %1278 = vadd.xlane.f32.xlu0 %v1277_v9  ;;  %3986 = vpow2.f32 %v1768_v63 }
 0x474   : > { %v3985_v55 = vpop.eup %3984 }
 0x475   : > { %v1261_v34 = vpop.xlane.xlu1 %1260  ;;  %v5045_v35 = vpop.eup %3986  ;;  %v1288_v16 = vmul.f32 %v3985_v55, %v4947_v50  ;;  %v1762_v50 = vsub.f32 %v4925_v30, %v1748_v21 }
 0x476   : > { %3988 = vrcp.f32 %v1261_v34  ;;  %v1785_v49 = vsel %vm964_vm10, %v5045_v35, 0.0  ;;  %v1491_v42 = vpop.xlane.xlu2 %1490 }
 0x477   : > { %1523 = vadd.xlane.f32.xlu0 %v1522_v6  ;;  %3990 = vpow2.f32 %v1507_v38  ;;  %v1774_v56 = vmul.f32 1.442695, %v1762_v50 }
 0x478   : > { %3992 = vpow2.f32 %v1772_v39 }
 0x479   : > { %3994 = vpow2.f32 %v1509_v51 }
 0x47a   : > { %3996 = vpow2.f32 %v1766_v23 }
 0x47b   : > { %3998 = vpow2.f32 %v1774_v56 }
 0x47c   : > { %v3989_v22 = vpop.eup %3988 }
 0x47d   : > { %v1289_v17 = vmul.f32 %v3989_v22, %v4954_v60  ;;  %v5056_v1 = vpop.eup %3990  ;;  %v1264_v43 = vpop.xlane.xlu0 %1263 }
 0x47e   : > { %v1525_v60 = vsel %vm964_vm10, %v5056_v1, 0.0  ;;  %v5063_v45 = vpop.eup %3992  ;;  %v1831_v7 = vpop.permute.xlu2 %1830  ;;  %4000 = vrcp.f32 %v1264_v43  ;;  %v1760_v43 = vsub.f32 %v4915_v25, %v5024_v10 }
 0x47f   : > { %1786 = vadd.xlane.f32.xlu0 %v1785_v49  ;;  %v1296_v27 = vpack.c.bf16 %v1289_v17, %v1288_v16  ;;  %v5065_v36 = vpop.eup %3994  ;;  %v1791_v30 = vsel %vm964_vm10, %v5063_v45, 0.0  ;;  %v1778_v16 = vmul.f32 1.442695, %v1764_v31 }
 0x480   : > { %v1528_v61 = vsel %vm964_vm10, %v5065_v36, 0.0  ;;  %v5072_v3 = vpop.eup %3996 }
 0x481   : > { %3359 = vmatmul.msk.bf16.vlgmr.msrb.gmra.mxu2 %vm964_vm10, %v1296_v27  ;;  %v5074_v32 = vpop.eup %3998  ;;  %v1782_v24 = vsel %vm964_vm10, %v5072_v3, 0.0 }
 0x482   : > { %v1794_v63 = vsel %vm964_vm10, %v5074_v32, 0.0 }
 0x484   : > { %v4001_v21 = vpop.eup %4000 }
 0x485   : > { %v1290_v6 = vmul.f32 %v4001_v21, %v4962_v5  ;;  %v1501_v5 = vsub.f32 %v4937_v33, %v1491_v42 }
 0x487   : > { %1526 = vadd.xlane.f32.xlu0 %v1525_v60  ;;  %v1515_v26 = vmul.f32 1.442695, %v1501_v5 }
 0x48d   : > { %v1833_v62 = vpop.permute.xlu1 %1832 }
 0x48e   : > { %1854 = vmatpush.bf16.msra.mxu2 %v1833_v62 }
 0x48f   : > { %1792 = vadd.xlane.f32.xlu0 %v1791_v30 }
 0x490   : > { %1529 = vadd.xlane.f32.xlu1 %v1528_v61 }
 0x492   : > { %1855 = vmatpush.bf16.msra.mxu2 %v1831_v7  ;;  %v1770_v7 = vmul.f32 1.442695, %v1760_v43 }
 0x493   : > { %v1267_v4 = vpop.xlane.xlu0 %1266 }
 0x494   : > { %4002 = vrcp.f32 %v1267_v4  ;;  %1783 = vadd.xlane.f32.xlu2 %v1782_v24  ;;  %v1102_v54 = vpop.f32.mrf.mxu0 }
 0x495   : > { %4004 = vpow2.f32 %v1776_v2  ;;  %v1122_v9 = vpack.c.bf16 %v1102_v54, %v1102_v54 }
 0x496   : > { %4006 = vpow2.f32 %v1511_v20 }
 0x497   : > { %1131 = vst.msk [vmem:[#allocation2] sm:$0xf] %vm1130_vm11, %v1122_v9  ;;  %1795 = vadd.xlane.f32.xlu0 %v1794_v63  ;;  %4008 = vpow2.f32 %v1778_v16  ;;  %v1513_v63 = vmul.f32 1.442695, %v1500_v52 }
 0x498   : > { %4010 = vpow2.f32 %v1515_v26 }
 0x49a   : > { %v4003_v41 = vpop.eup %4002 }
 0x49b   : > { %v5083_v34 = vpop.eup %4004  ;;  %v1291_v38 = vmul.f32 %v4003_v41, %v4978_v12 }
 0x49c   : > { %v1104_v55 = vpop.f32.mrf.mxu0  ;;  %v1797_v18 = vsel %vm964_vm10, %v5083_v34, 0.0  ;;  %v5093_v17 = vpop.eup %4006 }
 0x49d   : > { %v1123_v11 = vpack.c.bf16 %v1104_v55, %v1104_v55  ;;  %v1297_v22 = vpack.c.bf16 %v1291_v38, %v1290_v6  ;;  %v1531_v12 = vsel %vm964_vm10, %v5093_v17, 0.0  ;;  %v5098_v14 = vpop.eup %4008  ;;  %v1502_v38 = vsub.f32 %v4944_v47, %v5058_v15 }
 0x49e   : > { %v1800_v58 = vsel %vm964_vm10, %v5098_v14, 0.0  ;;  %v5104_v27 = vpop.eup %4010 }
 0x49f   : > { %1132 = vst.msk [vmem:[#allocation2 + $0x4] sm:$0xf] %vm1130_vm11, %v1123_v11  ;;  %1798 = vadd.xlane.f32.xlu0 %v1797_v18  ;;  %3360 = vmatmul.msk.bf16.gmra.mxu2 %vm964_vm10, %v1297_v22  ;;  %v1537_v53 = vsel %vm964_vm10, %v5104_v27, 0.0  ;;  %v1517_v55 = vmul.f32 1.442695, %v1502_v38 }
 0x4a4   : > { %v1270_v49 = vpop.xlane.xlu0 %1269 }
 0x4a5   : > { %4012 = vrcp.f32 %v1270_v49 }
 0x4a7   : > { %1532 = vadd.xlane.f32.xlu0 %v1531_v12 }
 0x4ab   : > { %v4013_v48 = vpop.eup %4012 }
 0x4ac   : > { %1563 = vrot.lane.b32.xlu2 %v4732_v28, %s4379_s13  ;;  %v1292_v4 = vmul.f32 %v4013_v48, %v4987_v57  ;;  %v1765_v57 = vsub.f32 %v4940_v40, %v5043_v29 }
 0x4ae   : > { %v1780_v20 = vmul.f32 1.442695, %v1765_v57 }
 0x4af   : > { %1801 = vadd.xlane.f32.xlu0 %v1800_v58 }
 0x4b5   : > { %v1107_v39 = vpop.f32.mrf.mxu0 }
 0x4b6   : > { %v1124_v33 = vpack.c.bf16 %v1107_v39, %v1107_v39  ;;  %v1276_v51 = vpop.xlane.xlu2 %1275 }
 0x4b7   : > { %1538 = vadd.xlane.f32.xlu0 %v1537_v53  ;;  %v1570_v50 = vpop.permute.xlu0 %1569 }
 0x4b8   : > { %1133 = vst.msk [vmem:[#allocation2 + $0x8] sm:$0xf] %vm1130_vm11, %v1124_v33  ;;  %1591 = vmatpush.bf16.msra.mxu0 %v1570_v50  ;;  %v5109_v28 = vpop.xlane.xlu1 %1520 }
 0x4bd   : > { %v1109_v23 = vpop.f32.mrf.mxu0 }
 0x4be   : > { %v1125_v60 = vpack.c.bf16 %v1109_v23, %v1109_v23  ;;  %v1829_v42 = vpop.permute.xlu2 %1828 }
 0x4bf   : > { %1856 = vmatpush.bf16.msra.mxu2 %v1829_v42 }
 0x4c0   : > { %1134 = vst.msk [vmem:[#allocation2 + $0xc] sm:$0xf] %vm1130_vm11, %v1125_v60  ;;  %v1273_v56 = vpop.xlane.xlu1 %1272 }
 0x4c1   : > { %4014 = vrcp.f32 %v1273_v56 }
 0x4c2   : > { %4016 = vpow2.f32 %v1770_v7 }
 0x4c3   : > { %4018 = vpow2.f32 %v1513_v63 }
 0x4c4   : > { %4020 = vpow2.f32 %v1780_v20 }
 0x4c5   : > { %v1112_v62 = vpop.f32.mrf.mxu0  ;;  %4022 = vrcp.f32 %v1276_v51 }
 0x4c6   : > { %v1126_v30 = vpack.c.bf16 %v1112_v62, %v1112_v62  ;;  %v1568_v61 = vpop.permute.xlu2 %1567  ;;  %4024 = vpow2.f32 %v1517_v55 }
 0x4c7   : > { %v4015_v2 = vpop.eup %4014  ;;  %1592 = vmatpush.bf16.msra.mxu0 %v1568_v61 }
 0x4c8   : > { %1135 = vst.msk [vmem:[#allocation2 + $0x10] sm:$0xf] %vm1130_vm11, %v1126_v30  ;;  %v1293_v24 = vmul.f32 %v4015_v2, %v5010_v59  ;;  %v5121_v21 = vpop.eup %4016 }
 0x4c9   : > { %v1788_v59 = vsel %vm964_vm10, %v5121_v21, 0.0  ;;  %v5128_v6 = vpop.eup %4018 }
 0x4ca   : > { %v1298_v54 = vpack.c.bf16 %v1293_v24, %v1292_v4  ;;  %v1534_v40 = vsel %vm964_vm10, %v5128_v6, 0.0  ;;  %v5135_v11 = vpop.eup %4020 }
 0x4cb   : > { %v1803_v18 = vsel %vm964_vm10, %v5135_v11, 0.0  ;;  %v4023_v47 = vpop.eup %4022 }
 0x4cc   : > { %3361 = vmatmul.msk.bf16.gmra.mxu2 %vm964_vm10, %v1298_v54  ;;  %v5139_v15 = vpop.eup %4024  ;;  %v1294_v5 = vmul.f32 %v4023_v47, %v4997_v0 }
 0x4cd   : > { %v1114_v25 = vpop.f32.mrf.mxu0  ;;  %v1540_v26 = vsel %vm964_vm10, %v5139_v15, 0.0 }
 0x4ce   : > { %v1127_v10 = vpack.c.bf16 %v1114_v25, %v1114_v25  ;;  %v1827_v9 = vpop.permute.xlu2 %1826 }
 0x4cf   : > { %1857 = vmatpush.bf16.msra.mxu2 %v1827_v9 }
 0x4d0   : > { %1136 = vst.msk [vmem:[#allocation2 + $0x14] sm:$0xf] %vm1130_vm11, %v1127_v10 }
 0x4d5   : > { %v1117_v46 = vpop.f32.mrf.mxu0  ;;  %1789 = vadd.xlane.f32.xlu2 %v1788_v59 }
 0x4d6   : > { %v1128_v44 = vpack.c.bf16 %v1117_v46, %v1117_v46 }
 0x4d8   : > { %1137 = vst.msk [vmem:[#allocation2 + $0x18] sm:$0xf] %vm1130_vm11, %v1128_v44  ;;  %v1566_v41 = vpop.permute.xlu1 %1565 }
 0x4d9   : > { %1593 = vmatpush.bf16.msra.mxu0 %v1566_v41 }
 0x4dd   : > { %v1119_v29 = vpop.f32.mrf.mxu0  ;;  %1535 = vadd.xlane.f32.xlu2 %v1534_v40 }
 0x4de   : > { %v1129_v31 = vpack.c.bf16 %v1119_v29, %v1119_v29 }
 0x4e0   : > { %1138 = vst.msk [vmem:[#allocation2 + $0x1c] sm:$0xf] %vm1130_vm11, %v1129_v31 }
 0x4e2   : > { %v1279_v22 = vpop.xlane.xlu0 %1278 }
 0x4e3   : > { %4026 = vrcp.f32 %v1279_v22 }
 0x4e5   : > { %1804 = vadd.xlane.f32.xlu2 %v1803_v18 }
 0x4e9   : > { %v4027_v16 = vpop.eup %4026 }
 0x4ea   : > { %v1295_v12 = vmul.f32 %v4027_v16, %v5030_v19  ;;  %v1524_v49 = vpop.xlane.xlu0 %1523 }
 0x4eb   : > { %4028 = vrcp.f32 %v1524_v49 }
 0x4ec   : > { %v1299_v58 = vpack.c.bf16 %v1295_v12, %v1294_v5  ;;  %4030 = vrcp.f32 %v5109_v28 }
 0x4ed   : > { %1541 = vadd.xlane.f32.xlu2 %v1540_v26 }
 0x4ee   : > { %3362 = vmatmul.msk.bf16.gmra.mxu2 %vm964_vm10, %v1299_v58 }
 0x4f1   : > { %v4029_v0 = vpop.eup %4028 }
 0x4f2   : > { %v1787_v39 = vpop.xlane.xlu0 %1786  ;;  %v4031_v19 = vpop.eup %4030  ;;  %v1552_v60 = vmul.f32 %v4029_v0, %v5037_v8 }
 0x4f3   : > { %4032 = vrcp.f32 %v1787_v39  ;;  %v1551_v43 = vmul.f32 %v4031_v19, %v4999_v37 }
 0x4f5   : > { %v1559_v30 = vpack.c.bf16 %v1552_v60, %v1551_v43 }
 0x4f9   : > { %v4033_v50 = vpop.eup %4032 }
 0x4fa   : > { %v1815_v48 = vmul.f32 %v4033_v50, %v5045_v35  ;;  %v1527_v7 = vpop.xlane.xlu0 %1526 }
 0x502   : > { %v1793_v24 = vpop.xlane.xlu0 %1792 }
 0x503   : > { %v1530_v61 = vpop.xlane.xlu1 %1529 }
 0x504   : > { %v1333_v33 = vpop.f32.mrf.mxu2 }
 0x505   : > { %v1353_v51 = vpack.c.bf16 %v1333_v33, %v1333_v33 }
 0x507   : > { %v1784_v53 = vpop.xlane.xlu2 %1783  ;;  %1369 = vrot.lane.b32.xlu1 %v1353_v51, %s4380_s19 }
 0x508   : > { %4034 = vrcp.f32 %v1784_v53 }
 0x509   : > { %4036 = vrcp.f32 %v1530_v61 }
 0x50a   : > { %4038 = vrcp.f32 %v1527_v7  ;;  %v1796_v54 = vpop.xlane.xlu0 %1795 }
 0x50b   : > { %4040 = vrcp.f32 %v1793_v24 }
 0x50c   : > { %v1335_v23 = vpop.f32.mrf.mxu2 }
 0x50d   : > { %v1354_v42 = vpack.c.bf16 %v1335_v23, %v1335_v23 }
 0x50e   : > { %v4035_v56 = vpop.eup %4034 }
 0x50f   : > { %v1814_v28 = vmul.f32 %v4035_v56, %v5072_v3  ;;  %v1564_v62 = vpop.permute.xlu2 %1563  ;;  %1371 = vrot.lane.b32.xlu0 %v1354_v42, %s4380_s19  ;;  %v4037_v8 = vpop.eup %4036 }
 0x510   : > { %1594 = vmatpush.bf16.msra.mxu0 %v1564_v62  ;;  %v4039_v37 = vpop.eup %4038  ;;  %v1554_v35 = vmul.f32 %v4037_v8, %v5065_v36 }
 0x511   : > { %v1822_v2 = vpack.c.bf16 %v1815_v48, %v1814_v28  ;;  %v1553_v3 = vmul.f32 %v4039_v37, %v5056_v1  ;;  %v4041_v9 = vpop.eup %4040 }
 0x512   : > { %v1799_v52 = vpop.xlane.xlu0 %1798  ;;  %v1817_v36 = vmul.f32 %v4041_v9, %v5063_v45 }
 0x513   : > { %3367 = vmatmul.msk.bf16.vlgmr.msra.gmra.mxu0 %vm964_vm10, %v1559_v30  ;;  %3375 = vmatmul.msk.bf16.vlgmr.msra.gmra.mxu2 %vm964_vm10, %v1822_v2  ;;  %v1560_v4 = vpack.c.bf16 %v1554_v35, %v1553_v3  ;;  %v3725_v35 = vld [vmem:[#allocation10 + $0x38] sm:$0xff] }
 0x514   : > { %2024 = vmatpush.bf16.msra.mxu3 %v3725_v35 }
 0x51a   : > { %v1533_v25 = vpop.xlane.xlu0 %1532 }
 0x522   : > { %v1802_v1 = vpop.xlane.xlu0 %1801  ;;  %v1338_v22 = vpop.f32.mrf.mxu2 }
 0x523   : > { %3368 = vmatmul.msk.bf16.gmra.mxu0 %vm964_vm10, %v1560_v4  ;;  %v1355_v62 = vpack.c.bf16 %v1338_v22, %v1338_v22  ;;  %v3724_v4 = vld [vmem:[#allocation10 + $0x30] sm:$0xff] }
 0x524   : > { %2025 = vmatpush.bf16.msra.mxu3 %v3724_v4  ;;  %v4079_v4 = vld [vmem:[%s4562_s26 + $0x18] sm:$0xff] }
 0x52a   : > { %v1539_v31 = vpop.xlane.xlu0 %1538  ;;  %v1340_v26 = vpop.f32.mrf.mxu2 }
 0x52b   : > { %v1356_v43 = vpack.c.bf16 %v1340_v26, %v1340_v26 }
 0x548   : > { %v1790_v10 = vpop.xlane.xlu2 %1789 }
 0x549   : > { %4042 = vrcp.f32 %v1790_v10 }
 0x54a   : > { %4044 = vrcp.f32 %v1533_v25  ;;  %v3723_v25 = vld [vmem:[#allocation10 + $0x28] sm:$0xff] }
 0x54b   : > { %2026 = vmatpush.bf16.msra.mxu3 %v3723_v25 }
 0x54f   : > { %v4043_v63 = vpop.eup %4042  ;;  %v1343_v33 = vpop.f32.mrf.mxu2 }
 0x550   : > { %v1536_v57 = vpop.xlane.xlu2 %1535  ;;  %v1816_v59 = vmul.f32 %v4043_v63, %v5121_v21  ;;  %v4045_v44 = vpop.eup %4044  ;;  %v1357_v7 = vpack.c.bf16 %v1343_v33, %v1343_v33  ;;  %v3722_v63 = vld [vmem:[#allocation10 + $0x20] sm:$0xff] }
 0x551   : > { %4046 = vrcp.f32 %v1536_v57  ;;  %v1555_v38 = vmul.f32 %v4045_v44, %v5093_v17  ;;  %2027 = vmatpush.bf16.msra.mxu3 %v3722_v63 }
 0x552   : > { %v1823_v46 = vpack.c.bf16 %v1817_v36, %v1816_v59  ;;  %4048 = vrcp.f32 %v1799_v52  ;;  %v3721_v59 = vld [vmem:[#allocation10 + $0x18] sm:$0xff] }
 0x553   : > { %4050 = vrcp.f32 %v1796_v54 }
 0x554   : > { %3376 = vmatmul.msk.bf16.gmra.mxu2 %vm964_vm10, %v1823_v46  ;;  %4052 = vrcp.f32 %v1539_v31 }
 0x555   : > { %2028 = vmatpush.bf16.msra.mxu3 %v3721_v59  ;;  %v4082_v59 = vld [vmem:[%s4562_s26 + $0x30] sm:$0xff] }
 0x557   : > { %v4047_v20 = vpop.eup %4046 }
 0x558   : > { %v1805_v41 = vpop.xlane.xlu2 %1804  ;;  %v1556_v40 = vmul.f32 %v4047_v20, %v5128_v6  ;;  %v4049_v55 = vpop.eup %4048 }
 0x559   : > { %v4051_v45 = vpop.eup %4050  ;;  %v1819_v21 = vmul.f32 %v4049_v55, %v5083_v34 }
 0x55a   : > { %v1561_v29 = vpack.c.bf16 %v1556_v40, %v1555_v38  ;;  %v1818_v47 = vmul.f32 %v4051_v45, %v5074_v32  ;;  %v4053_v17 = vpop.eup %4052  ;;  %v3719_v40 = vld [vmem:[#allocation10 + $0x8] sm:$0xff] }
 0x55b   : > { %v1557_v5 = vmul.f32 %v4053_v17, %v5104_v27  ;;  %v1345_v27 = vpop.f32.mrf.mxu2 }
 0x55c   : > { %3369 = vmatmul.msk.bf16.gmra.mxu0 %vm964_vm10, %v1561_v29  ;;  %v1824_v16 = vpack.c.bf16 %v1819_v21, %v1818_v47  ;;  %v1358_v54 = vpack.c.bf16 %v1345_v27, %v1345_v27  ;;  %v3718_v21 = vld [vmem:[#allocation10] sm:$0xff] }
 0x560   : > { %v1542_v18 = vpop.xlane.xlu2 %1541 }
 0x561   : > { %4054 = vrcp.f32 %v1542_v18 }
 0x562   : > { %4056 = vrcp.f32 %v1805_v41  ;;  %v3720_v41 = vld [vmem:[#allocation10 + $0x10] sm:$0xff] }
 0x563   : > { %4058 = vrcp.f32 %v1802_v1  ;;  %2029 = vmatpush.bf16.msra.mxu3 %v3720_v41 }
 0x564   : > { %3377 = vmatmul.msk.bf16.gmra.mxu2 %vm964_vm10, %v1824_v16 }
 0x567   : > { %v4055_v6 = vpop.eup %4054  ;;  %2030 = vmatpush.bf16.msra.mxu3 %v3719_v40 }
 0x568   : > { %v1558_v12 = vmul.f32 %v4055_v6, %v5139_v15  ;;  %v4057_v34 = vpop.eup %4056 }
 0x569   : > { %v4059_v49 = vpop.eup %4058  ;;  %v1821_v32 = vmul.f32 %v4057_v34, %v5135_v11 }
 0x56a   : > { %v1562_v58 = vpack.c.bf16 %v1558_v12, %v1557_v5  ;;  %v1820_v39 = vmul.f32 %v4059_v49, %v5098_v14 }
 0x56b   : > { %2031 = vmatpush.bf16.msra.mxu3 %v3718_v21 }
 0x56c   : > { %3370 = vmatmul.msk.bf16.gmra.mxu0 %vm964_vm10, %v1562_v58  ;;  %v1825_v51 = vpack.c.bf16 %v1821_v32, %v1820_v39 }
 0x571   : > { %v1348_v0 = vpop.f32.mrf.mxu2 }
 0x572   : > { %v1359_v44 = vpack.c.bf16 %v1348_v0, %v1348_v0 }
 0x574   : > { %3378 = vmatmul.msk.bf16.gmra.mxu2 %vm964_vm10, %v1825_v51 }
 0x579   : > { %v1370_v53 = vpop.permute.xlu1 %1369  ;;  %v5175_v19 = vpop.f32.mrf.mxu2 }
 0x57a   : > { %1394 = vst.msk [vmem:[#allocation2] sm:$0xf] %vm1393_vm12, %v1370_v53  ;;  %v1360_v29 = vpack.c.bf16 %v5175_v19, %v5175_v19 }
 0x581   : > { %v1372_v15 = vpop.permute.xlu0 %1371 }
 0x582   : > { %1395 = vst.msk [vmem:[#allocation2 + $0x4] sm:$0xf] %vm1393_vm12, %v1372_v15 }
 0x590   : > { %v1596_v50 = vpop.f32.mrf.mxu0 }
 0x591   : > { %v1616_v23 = vpack.c.bf16 %v1596_v50, %v1596_v50 }
 0x593   : > { %1632 = vrot.lane.b32.xlu2 %v1616_v23, %s4379_s13 }
 0x596   : > { %v1859_v14 = vpop.f32.mrf.mxu2 }
 0x597   : > { %v1879_v11 = vpack.c.bf16 %v1859_v14, %v1859_v14 }
 0x598   : > { %v1598_v60 = vpop.f32.mrf.mxu0 }
 0x599   : > { %v1617_v42 = vpack.c.bf16 %v1598_v60, %v1598_v60  ;;  %1895 = vrot.lane.b32.xlu0 %v1879_v11, %s4378_s1 }
 0x59b   : > { %1634 = vrot.lane.b32.xlu1 %v1617_v42, %s4379_s13 }
 0x59e   : > { %v1861_v56 = vpop.f32.mrf.mxu2 }
 0x59f   : > { %v1880_v48 = vpack.c.bf16 %v1861_v56, %v1861_v56 }
 0x5a0   : > { %v1601_v28 = vpop.f32.mrf.mxu0 }
 0x5a1   : > { %1375 = vrot.lane.b32.xlu0 %v1356_v43, %s4380_s19  ;;  %1897 = vrot.lane.b32.xlu2 %v1880_v48, %s4378_s1  ;;  %v1618_v30 = vpack.c.bf16 %v1601_v28, %v1601_v28 }
 0x5a3   : > { %1373 = vrot.lane.b32.xlu1 %v1355_v62, %s4380_s19  ;;  %v4076_v62 = vld [vmem:[%s4562_s26] sm:$0xff] }
 0x5a8   : > { %v1603_v61 = vpop.f32.mrf.mxu0 }
 0x5a9   : > { %v1619_v2 = vpack.c.bf16 %v1603_v61, %v1603_v61  ;;  %1636 = vrot.lane.b32.xlu2 %v1618_v30, %s4379_s13 }
 0x5ab   : > { %1638 = vrot.lane.b32.xlu1 %v1619_v2, %s4379_s13  ;;  %v4077_v2 = vld [vmem:[%s4562_s26 + $0x8] sm:$0xff] }
 0x5b3   : > { %1377 = vrot.lane.b32.xlu1 %v1357_v7, %s4380_s19 }
 0x5d7   : > { %v1864_v8 = vpop.f32.mrf.mxu2 }
 0x5d8   : > { %v1881_v37 = vpack.c.bf16 %v1864_v8, %v1864_v8 }
 0x5d9   : > { %v1606_v3 = vpop.f32.mrf.mxu0 }
 0x5da   : > { %1899 = vrot.lane.b32.xlu0 %v1881_v37, %s4378_s1  ;;  %v1620_v36 = vpack.c.bf16 %v1606_v3, %v1606_v3  ;;  %v4078_v37 = vld [vmem:[%s4562_s26 + $0x10] sm:$0xff] }
 0x5df   : > { %v1866_v24 = vpop.f32.mrf.mxu2 }
 0x5e0   : > { %v1882_v52 = vpack.c.bf16 %v1866_v24, %v1866_v24 }
 0x5e1   : > { %v1608_v10 = vpop.f32.mrf.mxu0 }
 0x5e2   : > { %v1621_v9 = vpack.c.bf16 %v1608_v10, %v1608_v10  ;;  %1379 = vrot.lane.b32.xlu0 %v1358_v54, %s4380_s19  ;;  %1901 = vrot.lane.b32.xlu2 %v1882_v52, %s4378_s1  ;;  %v4080_v52 = vld [vmem:[%s4562_s26 + $0x20] sm:$0xff] }
 0x5e4   : > { %1642 = vrot.lane.b32.xlu1 %v1621_v9, %s4379_s13  ;;  %v4081_v9 = vld [vmem:[%s4562_s26 + $0x28] sm:$0xff] }
 0x5e7   : > { %v1869_v57 = vpop.f32.mrf.mxu2 }
 0x5e8   : > { %v1883_v1 = vpack.c.bf16 %v1869_v57, %v1869_v57 }
 0x5e9   : > { %v1611_v46 = vpop.f32.mrf.mxu0 }
 0x5ea   : > { %1903 = vrot.lane.b32.xlu0 %v1883_v1, %s4378_s1  ;;  %1640 = vrot.lane.b32.xlu2 %v1620_v36, %s4379_s13  ;;  %v1622_v18 = vpack.c.bf16 %v1611_v46, %v1611_v46 }
 0x5ec   : > { %1381 = vrot.lane.b32.xlu1 %v1359_v44, %s4380_s19 }
 0x5ed   : > { %v1633_v20 = vpop.permute.xlu2 %1632 }
 0x5ee   : > { %1657 = vst.msk [vmem:[#allocation2] sm:$0xf] %vm1656_vm13, %v1633_v20 }
 0x5ef   : > { %v1871_v38 = vpop.f32.mrf.mxu2 }
 0x5f0   : > { %v1884_v55 = vpack.c.bf16 %v1871_v38, %v1871_v38 }
 0x5f1   : > { %v1613_v31 = vpop.f32.mrf.mxu0 }
 0x5f2   : > { %v1623_v45 = vpack.c.bf16 %v1613_v31, %v1613_v31  ;;  %1383 = vrot.lane.b32.xlu0 %v1360_v29, %s4380_s19  ;;  %1905 = vrot.lane.b32.xlu2 %v1884_v55, %s4378_s1  ;;  %v4083_v55 = vld [vmem:[%s4562_s26 + $0x38] sm:$0xff]  ;;  %s4293_s26 = sshra.s32 %s3097_s3, 4  ;;  %s4294_s26 = int_to_ptr.hbm [resolvable:$true] %s4293_s26 }
 0x5f3   : > { %p4300_p12 = scmp.lt.s32.totalorder %s4294_s26, %s5474_s8 }
 0x5f4   : > { %1646 = vrot.lane.b32.xlu1 %v1623_v45, %s4379_s13 }
 0x5f7   : > { %v1874_v22 = vpop.f32.mrf.mxu2 }
 0x5f8   : > { %v1885_v47 = vpack.c.bf16 %v1874_v22, %v1874_v22 }
 0x5fa   : > { %1907 = vrot.lane.b32.xlu0 %v1885_v47, %s4378_s1  ;;  %1644 = vrot.lane.b32.xlu2 %v1622_v18, %s4379_s13 }
 0x5fb   : > { %v1898_v5 = vpop.permute.xlu2 %1897 }
 0x5ff   : > { %v1876_v16 = vpop.f32.mrf.mxu2 }
 0x600   : > { %v1886_v17 = vpack.c.bf16 %v1876_v16, %v1876_v16 }
 0x602   : > { %1909 = vrot.lane.b32.xlu2 %v1886_v17, %s4378_s1  ;;  %s4295_s1 = scalar_lea.hbm %s4294_s26, 64 }
 0x603   : > { %v1637_v34 = vpop.permute.xlu2 %1636  ;;  %p4296_p1 = scmp.ne.s32.totalorder %s4294_s26, %s4295_s1  ;;  %p4301_p7 = scmp.lt.s32.totalorder %s4299_s21, %s4295_s1 }
 0x605   : > { %p4297_p3 = pnand %p4296_p1, %p4525_p5  ;;  %p4302_p8 = por %p4301_p7, %p4300_p12 }
 0x607   : > { %p4298_p4 = pneg %p4297_p3 }
 0x609   : > { %p4303_p9 = pnand %p4302_p8, %p4298_p4 }
 0x60b   : > { %v1896_v6 = vpop.permute.xlu0 %1895 }
 0x60c   : > { %1920 = vst.msk [vmem:[#allocation2] sm:$0xf] %vm1919_vm14, %v1896_v6 }
 0x60d   : > { %v1635_v12 = vpop.permute.xlu1 %1634 }
 0x60e   : > { %1658 = vst.msk [vmem:[#allocation2 + $0x4] sm:$0xf] %vm1656_vm13, %v1635_v12 }
 0x60f   : > { %1921 = vst.msk [vmem:[#allocation2 + $0x4] sm:$0xf] %vm1919_vm14, %v1898_v5 }
 0x613   : > { %v1376_v26 = vpop.permute.xlu0 %1375 }
 0x614   : > { %1397 = vst.msk [vmem:[#allocation2 + $0xc] sm:$0xf] %vm1393_vm12, %v1376_v26 }
 0x615   : > { %v1374_v58 = vpop.permute.xlu1 %1373 }
 0x616   : > { %1396 = vst.msk [vmem:[#allocation2 + $0x8] sm:$0xf] %vm1393_vm12, %v1374_v58  ;;  %v3714_v49 = vld [vmem:[#allocation2] sm:$0xff] }
 0x617   : > { %1659 = vst.msk [vmem:[#allocation2 + $0x8] sm:$0xf] %vm1656_vm13, %v1637_v34  ;;  %2032 = vmatmul.bf16.vlgmr.msra.gmra.mxu3 %v3714_v49 }
 0x61d   : > { %v1639_v32 = vpop.permute.xlu1 %1638 }
 0x61e   : > { %1660 = vst.msk [vmem:[#allocation2 + $0xc] sm:$0xf] %vm1656_vm13, %v1639_v32 }
 0x625   : > { %v1378_v39 = vpop.permute.xlu1 %1377 }
 0x626   : > { %1398 = vst.msk [vmem:[#allocation2 + $0x10] sm:$0xf] %vm1393_vm12, %v1378_v39 }
 0x63c   : > { %v1902_v33 = vpop.permute.xlu2 %1901 }
 0x63d   : > { %1923 = vst.msk [vmem:[#allocation2 + $0xc] sm:$0xf] %vm1919_vm14, %v1902_v33 }
 0x644   : > { %v1641_v51 = vpop.permute.xlu2 %1640 }
 0x645   : > { %1661 = vst.msk [vmem:[#allocation2 + $0x10] sm:$0xf] %vm1656_vm13, %v1641_v51 }
 0x64c   : > { %v1900_v53 = vpop.permute.xlu0 %1899  ;;  %v1906_v27 = vpop.permute.xlu2 %1905 }
 0x64d   : > { %1922 = vst.msk [vmem:[#allocation2 + $0x8] sm:$0xf] %vm1919_vm14, %v1900_v53 }
 0x654   : > { %v1380_v15 = vpop.permute.xlu0 %1379  ;;  %v3715_v0 = vld [vmem:[#allocation2 + $0x8] sm:$0xff]  ;;  %v1645_v23 = vpop.permute.xlu2 %1644 }
 0x655   : > { %1399 = vst.msk [vmem:[#allocation2 + $0x14] sm:$0xf] %vm1393_vm12, %v1380_v15  ;;  %2037 = vmatmul.bf16.gmra.mxu3 %v3715_v0  ;;  %v3756_v15 = vld [vmem:[#allocation12 + $0xec] sm:$0xf0]  ;;  %v3754_v0 = vld [vmem:[#allocation12 + $0xe4] sm:$0xf] }
 0x656   : > { %v1643_v19 = vpop.permute.xlu1 %1642 }
 0x657   : > { %1662 = vst.msk [vmem:[#allocation2 + $0x14] sm:$0xf] %vm1656_vm13, %v1643_v19 }
 0x658   : > { %1925 = vst.msk [vmem:[#allocation2 + $0x14] sm:$0xf] %vm1919_vm14, %v1906_v27  ;;  %v3541_v27 = vld [vmem:[#allocation12 + $0xe0] sm:$0xf] }
 0x659   : > { %v3542_v19 = vor.u32 %v3756_v15, %v3541_v27  ;;  %v3477_v15 = vld [vmem:[#allocation12 + $0x60] sm:$0xf] }
 0x65b   : > { %2429 = vmatpush.bf16.msrb.mxu0 %v3542_v19  ;;  %v3738_v19 = vld [vmem:[#allocation12 + $0x64] sm:$0xf] }
 0x65c   : > { %v1904_v50 = vpop.permute.xlu0 %1903  ;;  %v1910_v56 = vpop.permute.xlu2 %1909 }
 0x65d   : > { %1924 = vst.msk [vmem:[#allocation2 + $0x10] sm:$0xf] %vm1919_vm14, %v1904_v50  ;;  %v3543_v50 = vld [vmem:[#allocation12 + $0xf0] sm:$0xf0] }
 0x65e   : > { %v1382_v14 = vpop.permute.xlu1 %1381 }
 0x65f   : > { %1400 = vst.msk [vmem:[#allocation2 + $0x18] sm:$0xf] %vm1393_vm12, %v1382_v14  ;;  %v3757_v14 = vld [vmem:[#allocation12 + $0xf4] sm:$0xf0] }
 0x660   : > { %1663 = vst.msk [vmem:[#allocation2 + $0x18] sm:$0xf] %vm1656_vm13, %v1645_v23  ;;  %v3549_v23 = vld [vmem:[#allocation12 + $0xe8] sm:$0xf] }
 0x664   : > { %v1384_v11 = vpop.permute.xlu0 %1383  ;;  %v3716_v60 = vld [vmem:[#allocation2 + $0x10] sm:$0xff] }
 0x665   : > { %1401 = vst.msk [vmem:[#allocation2 + $0x1c] sm:$0xf] %vm1393_vm12, %v1384_v11  ;;  %2042 = vmatmul.bf16.gmra.mxu3 %v3716_v60  ;;  %v3546_v60 = vor.u32 %v3754_v0, %v3543_v50  ;;  %v3740_v0 = vld [vmem:[#allocation12 + $0x6c] sm:$0xf0] }
 0x666   : > { %v1647_v42 = vpop.permute.xlu1 %1646  ;;  %v3478_v50 = vor.u32 %v3740_v0, %v3477_v15  ;;  %v3727_v15 = vld [vmem:[#allocation12 + $0xc] sm:$0xf]  ;;  %v3439_v0 = vld [vmem:[#allocation12 + $0x18] sm:$0xf0] }
 0x667   : > { %1664 = vst.msk [vmem:[#allocation2 + $0x1c] sm:$0xf] %vm1656_vm13, %v1647_v42  ;;  %v3550_v42 = vor.u32 %v3757_v14, %v3549_v23  ;;  %2458 = vmatpush.bf16.msrb.mxu1 %v3546_v60  ;;  %v3479_v23 = vld [vmem:[#allocation12 + $0x70] sm:$0xf0]  ;;  %v3485_v14 = vld [vmem:[#allocation12 + $0x68] sm:$0xf] }
 0x668   : > { %1927 = vst.msk [vmem:[#allocation2 + $0x1c] sm:$0xf] %vm1919_vm14, %v1910_v56  ;;  %v3755_v56 = vld [vmem:[#allocation12 + $0xec] sm:$0xf]  ;;  %v3741_v60 = vld [vmem:[#allocation12 + $0x74] sm:$0xf0] }
 0x669   : > { %2487 = vmatpush.bf16.msrb.mxu2 %v3550_v42  ;;  %v3482_v42 = vor.u32 %v3738_v19, %v3479_v23  ;;  %v3442_v19 = vor.u32 %v3727_v15, %v3439_v0 }
 0x66c   : > { %v1908_v43 = vpop.permute.xlu0 %1907 }
 0x66d   : > { %1926 = vst.msk [vmem:[#allocation2 + $0x18] sm:$0xf] %vm1919_vm14, %v1908_v43  ;;  %v3551_v43 = vld [vmem:[#allocation12 + $0xf8] sm:$0xf0] }
 0x674   : > { %v3717_v48 = vld [vmem:[#allocation2 + $0x18] sm:$0xff] }
 0x675   : > { %2047 = vmatmul.bf16.gmra.mxu3 %v3717_v48  ;;  %v3554_v48 = vor.u32 %v3755_v56, %v3551_v43  ;;  %v3486_v56 = vor.u32 %v3741_v60, %v3485_v14  ;;  %v3739_v43 = vld [vmem:[#allocation12 + $0x6c] sm:$0xf] }
 0x677   : > { %2516 = vmatpush.bf16.msrb.mxu3 %v3554_v48  ;;  %v3487_v48 = vld [vmem:[#allocation12 + $0x78] sm:$0xf0] }
 0x69a   : > { %v2033_v28 = vpop.f32.mrf.mxu3 }
 0x69b   : > { %v5224_v30 = vadd.f32 %v4076_v62, %v2033_v28  ;;  %v3525_v62 = vld [vmem:[#allocation12 + $0xc0] sm:$0xf] }
 0x69d   : > { %2062 = vadd.xlane.f32.xlu1 %v5224_v30 }
 0x6a2   : > { %v2035_v61 = vpop.f32.mrf.mxu3 }
 0x6a3   : > { %v5228_v7 = vadd.f32 %v4077_v2, %v2035_v61  ;;  %v3752_v61 = vld [vmem:[#allocation12 + $0xcc] sm:$0xf0]  ;;  %v3750_v2 = vld [vmem:[#allocation12 + $0xc4] sm:$0xf] }
 0x6a5   : > { %2064 = vadd.xlane.f32.xlu0 %v5228_v7 }
 0x6d8   : > { %v2038_v8 = vpop.f32.mrf.mxu3 }
 0x6d9   : > { %v5232_v35 = vadd.f32 %v4078_v37, %v2038_v8  ;;  %v3526_v8 = vor.u32 %v3752_v61, %v3525_v62  ;;  %v3527_v37 = vld [vmem:[#allocation12 + $0xd0] sm:$0xf0]  ;;  %v3461_v62 = vld [vmem:[#allocation12 + $0x40] sm:$0xf]  ;;  %v3736_v61 = vld [vmem:[#allocation12 + $0x4c] sm:$0xf0] }
 0x6db   : > { %2066 = vadd.xlane.f32.xlu2 %v5232_v35  ;;  %2430 = vmatpush.bf16.msrb.mxu0 %v3526_v8  ;;  %v3462_v8 = vor.u32 %v3736_v61, %v3461_v62 }
 0x6e0   : > { %v2040_v3 = vpop.f32.mrf.mxu3 }
 0x6e1   : > { %v5236_v24 = vadd.f32 %v4079_v4, %v2040_v3  ;;  %v3533_v3 = vld [vmem:[#allocation12 + $0xc8] sm:$0xf]  ;;  %v3753_v4 = vld [vmem:[#allocation12 + $0xd4] sm:$0xf0] }
 0x6e3   : > { %2068 = vadd.xlane.f32.xlu1 %v5236_v24 }
 0x6e8   : > { %v2043_v54 = vpop.f32.mrf.mxu3 }
 0x6e9   : > { %v5240_v25 = vadd.f32 %v4080_v52, %v2043_v54  ;;  %v3530_v54 = vor.u32 %v3750_v2, %v3527_v37  ;;  %v3534_v52 = vor.u32 %v3753_v4, %v3533_v3  ;;  %v3734_v2 = vld [vmem:[#allocation12 + $0x44] sm:$0xf]  ;;  %v3463_v37 = vld [vmem:[#allocation12 + $0x50] sm:$0xf0]  ;;  %v3469_v3 = vld [vmem:[#allocation12 + $0x48] sm:$0xf] }
 0x6ea   : > { %v3737_v4 = vld [vmem:[#allocation12 + $0x54] sm:$0xf0] }
 0x6eb   : > { %2070 = vadd.xlane.f32.xlu0 %v5240_v25  ;;  %2459 = vmatpush.bf16.msrb.mxu1 %v3530_v54  ;;  %v3466_v54 = vor.u32 %v3734_v2, %v3463_v37 }
 0x6ec   : > { %2488 = vmatpush.bf16.msrb.mxu2 %v3534_v52  ;;  %v3470_v52 = vor.u32 %v3737_v4, %v3469_v3 }
 0x6f0   : > { %v2045_v10 = vpop.f32.mrf.mxu3 }
 0x6f1   : > { %v5244_v63 = vadd.f32 %v4081_v9, %v2045_v10  ;;  %v3751_v10 = vld [vmem:[#allocation12 + $0xcc] sm:$0xf]  ;;  %v3535_v9 = vld [vmem:[#allocation12 + $0xd8] sm:$0xf0] }
 0x6f3   : > { %2072 = vadd.xlane.f32.xlu2 %v5244_v63 }
 0x6f8   : > { %v2048_v57 = vpop.f32.mrf.mxu3 }
 0x6f9   : > { %v5248_v36 = vadd.f32 %v4082_v59, %v2048_v57  ;;  %v3538_v57 = vor.u32 %v3751_v10, %v3535_v9  ;;  %v3509_v59 = vld [vmem:[#allocation12 + $0xa0] sm:$0xf]  ;;  %v3735_v10 = vld [vmem:[#allocation12 + $0x4c] sm:$0xf]  ;;  %v3471_v9 = vld [vmem:[#allocation12 + $0x58] sm:$0xf0] }
 0x6fb   : > { %2074 = vadd.xlane.f32.xlu2 %v5248_v36  ;;  %2517 = vmatpush.bf16.msrb.mxu3 %v3538_v57  ;;  %v3474_v57 = vor.u32 %v3735_v10, %v3471_v9 }
 0x700   : > { %v2050_v40 = vpop.f32.mrf.mxu3 }
 0x701   : > { %v5262_v31 = vadd.f32 %v4083_v55, %v2050_v40  ;;  %v3749_v40 = vld [vmem:[#allocation12 + $0xb4] sm:$0xf0] }
 0x710   : > { %v2063_v1 = vpop.xlane.xlu1 %2062 }
 0x711   : > { %v2078_v46 = vmul.f32 %v2063_v1, %v4591_v13  ;;  %v3748_v1 = vld [vmem:[#allocation12 + $0xac] sm:$0xf0] }
 0x713   : > { %v5253_v44 = vsub.f32 %v5224_v30, %v2078_v46  ;;  %v3746_v46 = vld [vmem:[#allocation12 + $0xa4] sm:$0xf] }
 0x715   : > { %v2094_v20 = vmul.f32 %v5253_v44, %v5253_v44 }
 0x717   : > { %2102 = vadd.xlane.f32.xlu1 %v2094_v20  ;;  %v3510_v20 = vor.u32 %v3748_v1, %v3509_v59  ;;  %v3445_v59 = vld [vmem:[#allocation12 + $0x20] sm:$0xf]  ;;  %v3732_v1 = vld [vmem:[#allocation12 + $0x2c] sm:$0xf0] }
 0x718   : > { %v2065_v41 = vpop.xlane.xlu0 %2064 }
 0x719   : > { %v2079_v38 = vmul.f32 %v2065_v41, %v4591_v13  ;;  %v3511_v41 = vld [vmem:[#allocation12 + $0xb0] sm:$0xf0]  ;;  %2431 = vmatpush.bf16.msrb.mxu0 %v3510_v20  ;;  %v3446_v20 = vor.u32 %v3732_v1, %v3445_v59 }
 0x71a   : > { %v3514_v55 = vor.u32 %v3746_v46, %v3511_v41  ;;  %v3730_v46 = vld [vmem:[#allocation12 + $0x24] sm:$0xf]  ;;  %v3447_v41 = vld [vmem:[#allocation12 + $0x30] sm:$0xf0] }
 0x71b   : > { %v5259_v29 = vsub.f32 %v5228_v7, %v2079_v38  ;;  %v3517_v38 = vld [vmem:[#allocation12 + $0xa8] sm:$0xf] }
 0x71c   : > { %2460 = vmatpush.bf16.msrb.mxu1 %v3514_v55  ;;  %v3450_v55 = vor.u32 %v3730_v46, %v3447_v41 }
 0x71d   : > { %v2095_v45 = vmul.f32 %v5259_v29, %v5259_v29 }
 0x71f   : > { %2076 = vadd.xlane.f32.xlu1 %v5262_v31  ;;  %2104 = vadd.xlane.f32.xlu0 %v2095_v45  ;;  %v3518_v45 = vor.u32 %v3749_v40, %v3517_v38  ;;  %v3453_v38 = vld [vmem:[#allocation12 + $0x28] sm:$0xf]  ;;  %v3733_v40 = vld [vmem:[#allocation12 + $0x34] sm:$0xf0] }
 0x721   : > { %2489 = vmatpush.bf16.msrb.mxu2 %v3518_v45  ;;  %v3454_v45 = vor.u32 %v3733_v40, %v3453_v38 }
 0x74e   : > { %v2067_v21 = vpop.xlane.xlu2 %2066 }
 0x74f   : > { %v2080_v22 = vmul.f32 %v2067_v21, %v4591_v13  ;;  %v3747_v21 = vld [vmem:[#allocation12 + $0xac] sm:$0xf] }
 0x751   : > { %v5269_v18 = vsub.f32 %v5232_v35, %v2080_v22  ;;  %v3519_v22 = vld [vmem:[#allocation12 + $0xb8] sm:$0xf0] }
 0x753   : > { %v2096_v47 = vmul.f32 %v5269_v18, %v5269_v18 }
 0x755   : > { %2106 = vadd.xlane.f32.xlu0 %v2096_v47  ;;  %v3522_v47 = vor.u32 %v3747_v21, %v3519_v22  ;;  %v3731_v21 = vld [vmem:[#allocation12 + $0x2c] sm:$0xf]  ;;  %v3455_v22 = vld [vmem:[#allocation12 + $0x38] sm:$0xf0] }
 0x756   : > { %v2069_v16 = vpop.xlane.xlu1 %2068 }
 0x757   : > { %v2081_v17 = vmul.f32 %v2069_v16, %v4591_v13  ;;  %v3493_v16 = vld [vmem:[#allocation12 + $0x80] sm:$0xf]  ;;  %2518 = vmatpush.bf16.msrb.mxu3 %v3522_v47 }
 0x759   : > { %v5275_v6 = vsub.f32 %v5236_v24, %v2081_v17  ;;  %v3744_v17 = vld [vmem:[#allocation12 + $0x8c] sm:$0xf0] }
 0x75b   : > { %v2097_v5 = vmul.f32 %v5275_v6, %v5275_v6 }
 0x75d   : > { %2108 = vadd.xlane.f32.xlu2 %v2097_v5  ;;  %v3742_v5 = vld [vmem:[#allocation12 + $0x84] sm:$0xf] }
 0x75e   : > { %v2071_v12 = vpop.xlane.xlu0 %2070 }
 0x75f   : > { %v2082_v26 = vmul.f32 %v2071_v12, %v4591_v13  ;;  %v3494_v12 = vor.u32 %v3744_v17, %v3493_v16  ;;  %v3458_v16 = vor.u32 %v3731_v21, %v3455_v22 }
 0x761   : > { %v5281_v58 = vsub.f32 %v5240_v25, %v2082_v26  ;;  %v3495_v26 = vld [vmem:[#allocation12 + $0x90] sm:$0xf0]  ;;  %2432 = vmatpush.bf16.msrb.mxu0 %v3494_v12  ;;  %v3728_v12 = vld [vmem:[#allocation12 + $0xc] sm:$0xf0] }
 0x763   : > { %v2098_v34 = vmul.f32 %v5281_v58, %v5281_v58 }
 0x765   : > { %2110 = vadd.xlane.f32.xlu1 %v2098_v34  ;;  %v3501_v34 = vld [vmem:[#allocation12 + $0x88] sm:$0xf]  ;;  %2433 = vmatpush.bf16.msrb.mxu0 %v3478_v50 }
 0x766   : > { %v2073_v49 = vpop.xlane.xlu2 %2072 }
 0x767   : > { %v2083_v32 = vmul.f32 %v2073_v49, %v4591_v13  ;;  %v3745_v49 = vld [vmem:[#allocation12 + $0x94] sm:$0xf0] }
 0x769   : > { %v5287_v39 = vsub.f32 %v5244_v63, %v2083_v32  ;;  %v3498_v32 = vor.u32 %v3742_v5, %v3495_v26  ;;  %2434 = vmatpush.bf16.msrb.mxu0 %v3462_v8  ;;  %v3429_v5 = vld [vmem:[#allocation12] sm:$0xf]  ;;  %v3726_v26 = vld [vmem:[#allocation12 + $0x4] sm:$0xf] }
 0x76b   : > { %v2099_v33 = vmul.f32 %v5287_v39, %v5287_v39  ;;  %2461 = vmatpush.bf16.msrb.mxu1 %v3498_v32  ;;  %v3437_v32 = vld [vmem:[#allocation12 + $0x8] sm:$0xf] }
 0x76d   : > { %2112 = vadd.xlane.f32.xlu0 %v2099_v33  ;;  %v3502_v33 = vor.u32 %v3745_v49, %v3501_v34  ;;  %2435 = vmatpush.bf16.msrb.mxu0 %v3446_v20  ;;  %v3430_v34 = vor.u32 %v3728_v12, %v3429_v5  ;;  %v3431_v49 = vld [vmem:[#allocation12 + $0x10] sm:$0xf0] }
 0x76e   : > { %v2075_v51 = vpop.xlane.xlu2 %2074 }
 0x76f   : > { %v2084_v53 = vmul.f32 %v2075_v51, %v4591_v13  ;;  %v3743_v51 = vld [vmem:[#allocation12 + $0x8c] sm:$0xf]  ;;  %2490 = vmatpush.bf16.msrb.mxu2 %v3502_v33  ;;  %2462 = vmatpush.bf16.msrb.mxu1 %v3482_v42  ;;  %v3729_v33 = vld [vmem:[#allocation12 + $0x14] sm:$0xf0] }
 0x771   : > { %v5293_v11 = vsub.f32 %v5248_v36, %v2084_v53  ;;  %v3503_v53 = vld [vmem:[#allocation12 + $0x98] sm:$0xf0]  ;;  %2436 = vmatpush.bf16.msrb.mxu0 %v3430_v34 }
 0x772   : > { %v3506_v27 = vor.u32 %v3743_v51, %v3503_v53  ;;  %v3434_v53 = vor.u32 %v3726_v26, %v3431_v49 }
 0x773   : > { %v2100_v28 = vmul.f32 %v5293_v11, %v5293_v11  ;;  %2491 = vmatpush.bf16.msrb.mxu2 %v3486_v56  ;;  %2463 = vmatpush.bf16.msrb.mxu1 %v3466_v54 }
 0x774   : > { %2519 = vmatpush.bf16.msrb.mxu3 %v3506_v27  ;;  %v3438_v27 = vor.u32 %v3729_v33, %v3437_v32 }
 0x775   : > { %2114 = vadd.xlane.f32.xlu2 %v2100_v28  ;;  %v3490_v28 = vor.u32 %v3739_v43, %v3487_v48 }
 0x777   : > { %2492 = vmatpush.bf16.msrb.mxu2 %v3470_v52  ;;  %2464 = vmatpush.bf16.msrb.mxu1 %v3450_v55 }
 0x778   : > { %2520 = vmatpush.bf16.msrb.mxu3 %v3490_v28 }
 0x77b   : > { %2493 = vmatpush.bf16.msrb.mxu2 %v3454_v45  ;;  %2465 = vmatpush.bf16.msrb.mxu1 %v3434_v53 }
 0x77c   : > { %2521 = vmatpush.bf16.msrb.mxu3 %v3474_v57  ;;  %v5308_v57 = vld [vmem:[%s5470_s4] ss:$0 sm:$0xff] }
 0x77f   : > { %2494 = vmatpush.bf16.msrb.mxu2 %v3438_v27 }
 0x780   : > { %2522 = vmatpush.bf16.msrb.mxu3 %v3458_v16 }
 0x784   : > { %2523 = vmatpush.bf16.msrb.mxu3 %v3442_v19 }
 0x78a   : > { %v2103_v47 = vpop.xlane.xlu1 %2102 }
 0x78b   : > { %v2118_v17 = vmul.f32 %v2103_v47, %v4591_v13 }
 0x78d   : > { %v2126_v51 = vadd.f32 1e-05, %v2118_v17 }
 0x78f   : > { %4060 = vrsqrt.f32 %v2126_v51  ;;  %vm2140_vm0 = vweird.f32 %v2126_v51 }
 0x792   : > { %v2077_v50 = vpop.xlane.xlu1 %2076  ;;  %v2105_v23 = vpop.xlane.xlu0 %2104 }
 0x793   : > { %v2085_v14 = vmul.f32 %v2077_v50, %v4591_v13  ;;  %v2119_v60 = vmul.f32 %v2105_v23, %v4591_v13 }
 0x795   : > { %v4061_v42 = vpop.eup %4060  ;;  %v5301_v56 = vsub.f32 %v5262_v31, %v2085_v14  ;;  %v2127_v43 = vadd.f32 1e-05, %v2119_v60 }
 0x796   : > { %v2135_v48 = vmul.f32 %v4061_v42, %v2126_v51  ;;  %vm2141_vm15 = vweird.f32 %v4061_v42 }
 0x797   : > { %4062 = vrsqrt.f32 %v2127_v43  ;;  %v2101_v28 = vmul.f32 %v5301_v56, %v5301_v56  ;;  %vm2142_vm1 = vmor %vm2140_vm0, %vm2141_vm15  ;;  %vm2150_vm3 = vweird.f32 %v2127_v43 }
 0x798   : > { %v2136_v62 = vmul.f32 %v4061_v42, %v2135_v48 }
 0x799   : > { %2116 = vadd.xlane.f32.xlu1 %v2101_v28 }
 0x79a   : > { %v2137_v61 = vmul.f32 0.5, %v2136_v62 }
 0x79c   : > { %v2138_v2 = vsub.f32 1.5, %v2137_v61 }
 0x79d   : > { %v4063_v8 = vpop.eup %4062 }
 0x79e   : > { %v2145_v37 = vmul.f32 %v4063_v8, %v2127_v43  ;;  %v2139_v3 = vmul.f32 %v4061_v42, %v2138_v2  ;;  %vm2151_vm2 = vweird.f32 %v4063_v8 }
 0x79f   : > { %vm2152_vm4 = vmor %vm2150_vm3, %vm2151_vm2 }
 0x7a0   : > { %v2146_v4 = vmul.f32 %v4063_v8, %v2145_v37  ;;  %v2143_v52 = vsel %vm2142_vm1, %v4061_v42, %v2139_v3 }
 0x7a1   : > { %v2214_v59 = vmul.f32 %v2143_v52, %v5253_v44 }
 0x7a2   : > { %v2147_v54 = vmul.f32 0.5, %v2146_v4 }
 0x7a3   : > { %v2225_v20 = vmul.f32 %v5308_v57, %v2214_v59 }
 0x7a4   : > { %v2148_v10 = vsub.f32 1.5, %v2147_v54 }
 0x7a6   : > { %v2149_v9 = vmul.f32 %v4063_v8, %v2148_v10 }
 0x7a8   : > { %v2153_v1 = vsel %vm2152_vm4, %v4063_v8, %v2149_v9 }
 0x7a9   : > { %v2215_v46 = vmul.f32 %v2153_v1, %v5259_v29 }
 0x7ab   : > { %v2226_v41 = vmul.f32 %v5308_v57, %v2215_v46 }
 0x7ad   : > { %v2233_v38 = vpack.c.bf16 %v2226_v41, %v2225_v20 }
 0x7af   : > { %2437 = vmatmul.bf16.vlgmr.msrb.gmra.mxu0 %v2233_v38  ;;  %2466 = vmatmul.bf16.vlgmr.msrb.gmra.mxu1 %v2233_v38 }
 0x7b0   : > { %2495 = vmatmul.bf16.vlgmr.msrb.gmra.mxu2 %v2233_v38  ;;  %2524 = vmatmul.bf16.vlgmr.msrb.gmra.mxu3 %v2233_v38 }
 0x7c8   : > { %v2107_v40 = vpop.xlane.xlu0 %2106 }
 0x7c9   : > { %v2120_v55 = vmul.f32 %v2107_v40, %v4591_v13 }
 0x7cb   : > { %v2128_v45 = vadd.f32 1e-05, %v2120_v55 }
 0x7cd   : > { %4064 = vrsqrt.f32 %v2128_v45  ;;  %vm2160_vm6 = vweird.f32 %v2128_v45 }
 0x7d0   : > { %v2109_v21 = vpop.xlane.xlu2 %2108 }
 0x7d1   : > { %v2121_v44 = vmul.f32 %v2109_v21, %v4591_v13  ;;  %v3765_v21 = vld [vmem:[#allocation13 + $0x38] sm:$0xff] }
 0x7d2   : > { %2949 = vmatpush.bf16.msra.mxu0 %v3765_v21 }
 0x7d3   : > { %v4065_v22 = vpop.eup %4064  ;;  %v2129_v47 = vadd.f32 1e-05, %v2121_v44  ;;  %v3772_v44 = vld [vmem:[#allocation13 + $0x70] sm:$0xff] }
 0x7d4   : > { %v2155_v29 = vmul.f32 %v4065_v22, %v2128_v45  ;;  %vm2161_vm5 = vweird.f32 %v4065_v22 }
 0x7d5   : > { %4066 = vrsqrt.f32 %v2129_v47  ;;  %vm2162_vm7 = vmor %vm2160_vm6, %vm2161_vm5  ;;  %vm2170_vm9 = vweird.f32 %v2129_v47 }
 0x7d6   : > { %v2156_v16 = vmul.f32 %v4065_v22, %v2155_v29  ;;  %v3763_v29 = vld [vmem:[#allocation13 + $0x28] sm:$0xff] }
 0x7d8   : > { %v2157_v17 = vmul.f32 0.5, %v2156_v16  ;;  %v2111_v5 = vpop.xlane.xlu1 %2110  ;;  %v3771_v16 = vld [vmem:[#allocation13 + $0x68] sm:$0xff] }
 0x7d9   : > { %v2122_v12 = vmul.f32 %v2111_v5, %v4591_v13 }
 0x7da   : > { %v2158_v26 = vsub.f32 1.5, %v2157_v17 }
 0x7db   : > { %v4067_v34 = vpop.eup %4066  ;;  %v2130_v49 = vadd.f32 1e-05, %v2122_v12  ;;  %v3780_v12 = vld [vmem:[#allocation13 + $0xb0] sm:$0xff] }
 0x7dc   : > { %v2165_v32 = vmul.f32 %v4067_v34, %v2129_v47  ;;  %v2159_v33 = vmul.f32 %v4065_v22, %v2158_v26  ;;  %vm2171_vm8 = vweird.f32 %v4067_v34  ;;  %v3789_v47 = vld [vmem:[#allocation13 + $0xf8] sm:$0xff]  ;;  %v3788_v26 = vld [vmem:[#allocation13 + $0xf0] sm:$0xff] }
 0x7dd   : > { %4068 = vrsqrt.f32 %v2130_v49  ;;  %vm2172_vm10 = vmor %vm2170_vm9, %vm2171_vm8  ;;  %vm2180_vm12 = vweird.f32 %v2130_v49  ;;  %3036 = vmatpush.bf16.msra.mxu3 %v3789_v47 }
 0x7de   : > { %v2166_v51 = vmul.f32 %v4067_v34, %v2165_v32  ;;  %v2163_v0 = vsel %vm2162_vm7, %v4065_v22, %v2159_v33  ;;  %v3781_v22 = vld [vmem:[#allocation13 + $0xb8] sm:$0xff]  ;;  %v3770_v32 = vld [vmem:[#allocation13 + $0x60] sm:$0xff] }
 0x7df   : > { %v2216_v42 = vmul.f32 %v2163_v0, %v5269_v18  ;;  %3007 = vmatpush.bf16.msra.mxu2 %v3781_v22  ;;  %v3761_v0 = vld [vmem:[#allocation13 + $0x18] sm:$0xff] }
 0x7e0   : > { %v2167_v53 = vmul.f32 0.5, %v2166_v51  ;;  %v2113_v27 = vpop.xlane.xlu0 %2112 }
 0x7e1   : > { %v2123_v15 = vmul.f32 %v2113_v27, %v4591_v13  ;;  %v2227_v61 = vmul.f32 %v5308_v57, %v2216_v42  ;;  %3037 = vmatpush.bf16.msra.mxu3 %v3788_v26  ;;  %v3787_v27 = vld [vmem:[#allocation13 + $0xe8] sm:$0xff] }
 0x7e2   : > { %v2168_v19 = vsub.f32 1.5, %v2167_v53  ;;  %v3779_v53 = vld [vmem:[#allocation13 + $0xa8] sm:$0xff] }
 0x7e3   : > { %v4069_v50 = vpop.eup %4068  ;;  %v2131_v23 = vadd.f32 1e-05, %v2123_v15  ;;  %3008 = vmatpush.bf16.msra.mxu2 %v3780_v12 }
 0x7e4   : > { %v2169_v14 = vmul.f32 %v4067_v34, %v2168_v19  ;;  %v2175_v60 = vmul.f32 %v4069_v50, %v2130_v49  ;;  %vm2181_vm11 = vweird.f32 %v4069_v50  ;;  %v3762_v49 = vld [vmem:[#allocation13 + $0x20] sm:$0xff]  ;;  %v3769_v19 = vld [vmem:[#allocation13 + $0x58] sm:$0xff] }
 0x7e5   : > { %4070 = vrsqrt.f32 %v2131_v23  ;;  %vm2182_vm13 = vmor %vm2180_vm12, %vm2181_vm11  ;;  %vm2190_vm15 = vweird.f32 %v2131_v23  ;;  %3038 = vmatpush.bf16.msra.mxu3 %v3787_v27 }
 0x7e6   : > { %v2173_v43 = vsel %vm2172_vm10, %v4067_v34, %v2169_v14  ;;  %v2176_v48 = vmul.f32 %v4069_v50, %v2175_v60  ;;  %v3786_v14 = vld [vmem:[#allocation13 + $0xe0] sm:$0xff]  ;;  %v3768_v60 = vld [vmem:[#allocation13 + $0x50] sm:$0xff] }
 0x7e7   : > { %v2217_v28 = vmul.f32 %v2173_v43, %v5275_v6  ;;  %3009 = vmatpush.bf16.msra.mxu2 %v3779_v53  ;;  %v3777_v43 = vld [vmem:[#allocation13 + $0x98] sm:$0xff]  ;;  %v5348_v53 = vstv %s3555_s10 }
 0x7e8   : > { %v2177_v62 = vmul.f32 0.5, %v2176_v48  ;;  %v2115_v46 = vpop.xlane.xlu2 %2114  ;;  %v3785_v48 = vld [vmem:[#allocation13 + $0xd8] sm:$0xff] }
 0x7e9   : > { %v2228_v2 = vmul.f32 %v5308_v57, %v2217_v28  ;;  %v2124_v41 = vmul.f32 %v2115_v46, %v4591_v13  ;;  %3039 = vmatpush.bf16.msra.mxu3 %v3786_v14 }
 0x7ea   : > { %v2178_v8 = vsub.f32 1.5, %v2177_v62 }
 0x7eb   : > { %v4071_v37 = vpop.eup %4070  ;;  %v2234_v3 = vpack.c.bf16 %v2228_v2, %v2227_v61  ;;  %v5327_v45 = vadd.f32 1e-05, %v2124_v41  ;;  %v3759_v61 = vld [vmem:[#allocation13 + $0x8] sm:$0xff]  ;;  %v3774_v41 = vld [vmem:[#allocation13 + $0x80] sm:$0xff] }
 0x7ec   : > { %v2185_v4 = vmul.f32 %v4071_v37, %v2131_v23  ;;  %v2179_v54 = vmul.f32 %v4069_v50, %v2178_v8  ;;  %vm2191_vm14 = vweird.f32 %v4071_v37  ;;  %v3778_v23 = vld [vmem:[#allocation13 + $0xa0] sm:$0xff]  ;;  %v3767_v2 = vld [vmem:[#allocation13 + $0x48] sm:$0xff] }
 0x7ed   : > { %2442 = vmatmul.bf16.gmra.mxu0 %v2234_v3  ;;  %2471 = vmatmul.bf16.gmra.mxu1 %v2234_v3  ;;  %vm2192_vm0 = vmor %vm2190_vm15, %vm2191_vm14  ;;  %4072 = vrsqrt.f32 %v5327_v45  ;;  %vm2200_vm2 = vweird.f32 %v5327_v45 }
 0x7ee   : > { %v2186_v18 = vmul.f32 %v4071_v37, %v2185_v4  ;;  %2500 = vmatmul.bf16.gmra.mxu2 %v2234_v3  ;;  %2529 = vmatmul.bf16.gmra.mxu3 %v2234_v3  ;;  %v2183_v6 = vsel %vm2182_vm13, %v4069_v50, %v2179_v54  ;;  %v3776_v3 = vld [vmem:[#allocation13 + $0x90] sm:$0xff] }
 0x7ef   : > { %v2218_v59 = vmul.f32 %v2183_v6, %v5281_v58  ;;  %v3773_v58 = vld [vmem:[#allocation13 + $0x78] sm:$0xff]  ;;  %3010 = vmatpush.bf16.msra.mxu2 %v3778_v23  ;;  %3040 = vmatpush.bf16.msra.mxu3 %v3785_v48  ;;  %v3784_v4 = vld [vmem:[#allocation13 + $0xd0] sm:$0xff] }
 0x7f0   : > { %v2187_v52 = vmul.f32 0.5, %v2186_v18  ;;  %2978 = vmatpush.bf16.msra.mxu1 %v3773_v58  ;;  %v3758_v18 = vld [vmem:[#allocation13] sm:$0xff] }
 0x7f1   : > { %v2229_v38 = vmul.f32 %v5308_v57, %v2218_v59  ;;  %v3783_v59 = vld [vmem:[#allocation13 + $0xc8] sm:$0xff] }
 0x7f2   : > { %v2188_v10 = vsub.f32 1.5, %v2187_v52  ;;  %v3766_v52 = vld [vmem:[#allocation13 + $0x40] sm:$0xff] }
 0x7f3   : > { %v5330_v17 = vpop.eup %4072  ;;  %3011 = vmatpush.bf16.msra.mxu2 %v3777_v43  ;;  %3041 = vmatpush.bf16.msra.mxu3 %v3784_v4 }
 0x7f4   : > { %v2189_v9 = vmul.f32 %v4071_v37, %v2188_v10  ;;  %2979 = vmatpush.bf16.msra.mxu1 %v3772_v44  ;;  %v2195_v5 = vmul.f32 %v5330_v17, %v5327_v45  ;;  %vm2201_vm1 = vweird.f32 %v5330_v17 }
 0x7f5   : > { %vm2202_vm3 = vmor %vm2200_vm2, %vm2201_vm1 }
 0x7f6   : > { %v2193_v1 = vsel %vm2192_vm0, %v4071_v37, %v2189_v9  ;;  %v2196_v51 = vmul.f32 %v5330_v17, %v2195_v5  ;;  %v3775_v9 = vld [vmem:[#allocation13 + $0x88] sm:$0xff] }
 0x7f7   : > { %v2219_v20 = vmul.f32 %v2193_v1, %v5287_v39  ;;  %v3764_v39 = vld [vmem:[#allocation13 + $0x30] sm:$0xff]  ;;  %3012 = vmatpush.bf16.msra.mxu2 %v3776_v3  ;;  %3042 = vmatpush.bf16.msra.mxu3 %v3783_v59 }
 0x7f8   : > { %2950 = vmatpush.bf16.msra.mxu0 %v3764_v39  ;;  %2980 = vmatpush.bf16.msra.mxu1 %v3771_v16  ;;  %v2197_v50 = vmul.f32 0.5, %v2196_v51  ;;  %v5344_v16 = vstv %s2577_s15 }
 0x7f9   : > { %v2230_v40 = vmul.f32 %v5308_v57, %v2219_v20 }
 0x7fa   : > { %v2198_v42 = vsub.f32 1.5, %v2197_v50 }
 0x7fb   : > { %v2235_v55 = vpack.c.bf16 %v2230_v40, %v2229_v38  ;;  %3013 = vmatpush.bf16.msra.mxu2 %v3775_v9  ;;  %v3782_v38 = vld [vmem:[#allocation13 + $0xc0] sm:$0xff] }
 0x7fc   : > { %2951 = vmatpush.bf16.msra.mxu0 %v3763_v29  ;;  %2981 = vmatpush.bf16.msra.mxu1 %v3770_v32  ;;  %v2199_v8 = vmul.f32 %v5330_v17, %v2198_v42 }
 0x7fd   : > { %2447 = vmatmul.bf16.gmra.mxu0 %v2235_v55  ;;  %2476 = vmatmul.bf16.gmra.mxu1 %v2235_v55 }
 0x7fe   : > { %2505 = vmatmul.bf16.gmra.mxu2 %v2235_v55  ;;  %2534 = vmatmul.bf16.gmra.mxu3 %v2235_v55  ;;  %v2203_v6 = vsel %vm2202_vm3, %v5330_v17, %v2199_v8 }
 0x7ff   : > { %v2220_v46 = vmul.f32 %v2203_v6, %v5293_v11  ;;  %3014 = vmatpush.bf16.msra.mxu2 %v3774_v41  ;;  %3043 = vmatpush.bf16.msra.mxu3 %v3782_v38 }
 0x800   : > { %2952 = vmatpush.bf16.msra.mxu0 %v3762_v49  ;;  %2982 = vmatpush.bf16.msra.mxu1 %v3769_v19 }
 0x801   : > { %v2231_v55 = vmul.f32 %v5308_v57, %v2220_v46 }
 0x804   : > { %2953 = vmatpush.bf16.msra.mxu0 %v3761_v0  ;;  %2983 = vmatpush.bf16.msra.mxu1 %v3768_v60 }
 0x808   : > { %2984 = vmatpush.bf16.msra.mxu1 %v3767_v2 }
 0x80c   : > { %v2117_v34 = vpop.xlane.xlu1 %2116  ;;  %2985 = vmatpush.bf16.msra.mxu1 %v3766_v52 }
 0x80d   : > { %v2125_v33 = vmul.f32 %v2117_v34, %v4591_v13  ;;  %v3760_v13 = vld [vmem:[#allocation13 + $0x10] sm:$0xff] }
 0x80e   : > { %2954 = vmatpush.bf16.msra.mxu0 %v3760_v13 }
 0x80f   : > { %v2133_v15 = vadd.f32 1e-05, %v2125_v33 }
 0x811   : > { %4074 = vrsqrt.f32 %v2133_v15  ;;  %vm2210_vm5 = vweird.f32 %v2133_v15 }
 0x812   : > { %2955 = vmatpush.bf16.msra.mxu0 %v3759_v61 }
 0x816   : > { %2956 = vmatpush.bf16.msra.mxu0 %v3758_v18 }
 0x817   : > { %v4075_v28 = vpop.eup %4074 }
 0x818   : > { %v2205_v62 = vmul.f32 %v4075_v28, %v2133_v15  ;;  %vm2211_vm4 = vweird.f32 %v4075_v28 }
 0x819   : > { %vm2212_vm6 = vmor %vm2210_vm5, %vm2211_vm4 }
 0x81a   : > { %v2206_v37 = vmul.f32 %v4075_v28, %v2205_v62 }
 0x81c   : > { %v2207_v54 = vmul.f32 0.5, %v2206_v37 }
 0x81e   : > { %v2208_v10 = vsub.f32 1.5, %v2207_v54 }
 0x820   : > { %v2209_v1 = vmul.f32 %v4075_v28, %v2208_v10 }
 0x822   : > { %v2213_v20 = vsel %vm2212_vm6, %v4075_v28, %v2209_v1 }
 0x823   : > { %v2221_v40 = vmul.f32 %v2213_v20, %v5301_v56 }
 0x825   : > { %v2232_v45 = vmul.f32 %v5308_v57, %v2221_v40 }
 0x827   : > { %v2236_v21 = vpack.c.bf16 %v2232_v45, %v2231_v55 }
 0x829   : > { %2452 = vmatmul.bf16.gmra.mxu0 %v2236_v21  ;;  %2481 = vmatmul.bf16.gmra.mxu1 %v2236_v21 }
 0x82a   : > { %2510 = vmatmul.bf16.gmra.mxu2 %v2236_v21  ;;  %2539 = vmatmul.bf16.gmra.mxu3 %v2236_v21 }
 0x82c   : > { %v2438_v58 = vpop.f32.mrf.mxu0  ;;  %v2467_v11 = vpop.f32.mrf.mxu1 }
 0x82d   : > { %v2545_v39 = vmax.f32 %v2438_v58, 0.0  ;;  %v2546_v44 = vmax.f32 %v2467_v11, 0.0 }
 0x82f   : > { %v2578_v22 = vmul.f32 %v2545_v39, %v2545_v39  ;;  %v2579_v47 = vmul.f32 %v2546_v44, %v2546_v44 }
 0x831   : > { %v2611_v49 = vmul.f32 %v5344_v16, %v2578_v22  ;;  %v2612_v32 = vmul.f32 %v5344_v16, %v2579_v47 }
 0x833   : > { %v2496_v56 = vpop.f32.mrf.mxu2  ;;  %v2525_v29 = vpop.f32.mrf.mxu3  ;;  %v2645_v50 = vadd.f32 %v5348_v53, %v2611_v49  ;;  %v2646_v23 = vadd.f32 %v5348_v53, %v2612_v32 }
 0x834   : > { %v2440_v17 = vpop.f32.mrf.mxu0  ;;  %v2469_v5 = vpop.f32.mrf.mxu1  ;;  %v2547_v26 = vmax.f32 %v2496_v56, 0.0  ;;  %v2548_v34 = vmax.f32 %v2525_v29, 0.0 }
 0x835   : > { %v2549_v57 = vmax.f32 %v2440_v17, 0.0  ;;  %v2550_v12 = vmax.f32 %v2469_v5, 0.0 }
 0x836   : > { %v2580_v0 = vmul.f32 %v2547_v26, %v2547_v26  ;;  %v2581_v19 = vmul.f32 %v2548_v34, %v2548_v34 }
 0x837   : > { %v2582_v33 = vmul.f32 %v2549_v57, %v2549_v57  ;;  %v2583_v51 = vmul.f32 %v2550_v12, %v2550_v12 }
 0x838   : > { %v2613_v61 = vmul.f32 %v5344_v16, %v2580_v0  ;;  %v2614_v2 = vmul.f32 %v5344_v16, %v2581_v19 }
 0x839   : > { %v2615_v27 = vmul.f32 %v5344_v16, %v2582_v33  ;;  %v2616_v15 = vmul.f32 %v5344_v16, %v2583_v51 }
 0x83a   : > { %v2647_v54 = vadd.f32 %v5348_v53, %v2613_v61  ;;  %v2648_v18 = vadd.f32 %v5348_v53, %v2614_v2 }
 0x83b   : > { %v2649_v14 = vadd.f32 %v5348_v53, %v2615_v27  ;;  %v2650_v13 = vadd.f32 %v5348_v53, %v2616_v15  ;;  %v2498_v60 = vpop.f32.mrf.mxu2  ;;  %v2527_v42 = vpop.f32.mrf.mxu3 }
 0x83c   : > { %v2551_v43 = vmax.f32 %v2498_v60, 0.0  ;;  %v2552_v48 = vmax.f32 %v2527_v42, 0.0 }
 0x83d   : > { %v2677_v28 = vpack.c.bf16 %v2649_v14, %v2645_v50  ;;  %v2678_v62 = vpack.c.bf16 %v2650_v13, %v2646_v23 }
 0x83e   : > { %v2584_v8 = vmul.f32 %v2551_v43, %v2551_v43  ;;  %v2585_v37 = vmul.f32 %v2552_v48, %v2552_v48 }
 0x83f   : > { %2957 = vmatmul.bf16.vlgmr.msra.gmra.mxu0 %v2677_v28  ;;  %2986 = vmatmul.bf16.vlgmr.msra.gmra.mxu1 %v2678_v62 }
 0x840   : > { %v2617_v3 = vmul.f32 %v5344_v16, %v2584_v8  ;;  %v2618_v4 = vmul.f32 %v5344_v16, %v2585_v37 }
 0x842   : > { %v2651_v52 = vadd.f32 %v5348_v53, %v2617_v3  ;;  %v2652_v6 = vadd.f32 %v5348_v53, %v2618_v4 }
 0x844   : > { %v2679_v10 = vpack.c.bf16 %v2651_v52, %v2647_v54  ;;  %v2680_v9 = vpack.c.bf16 %v2652_v6, %v2648_v18 }
 0x846   : > { %3015 = vmatmul.bf16.vlgmr.msra.gmra.mxu2 %v2679_v10  ;;  %3044 = vmatmul.bf16.vlgmr.msra.gmra.mxu3 %v2680_v9 }
 0x86a   : > { %v2443_v59 = vpop.f32.mrf.mxu0  ;;  %v2472_v1 = vpop.f32.mrf.mxu1 }
 0x86b   : > { %v2553_v46 = vmax.f32 %v2443_v59, 0.0  ;;  %v2554_v20 = vmax.f32 %v2472_v1, 0.0 }
 0x86d   : > { %v2586_v41 = vmul.f32 %v2553_v46, %v2553_v46  ;;  %v2587_v38 = vmul.f32 %v2554_v20, %v2554_v20 }
 0x86f   : > { %v2619_v22 = vmul.f32 %v5344_v16, %v2586_v41  ;;  %v2620_v47 = vmul.f32 %v5344_v16, %v2587_v38 }
 0x871   : > { %v2501_v40 = vpop.f32.mrf.mxu2  ;;  %v2530_v55 = vpop.f32.mrf.mxu3  ;;  %v2653_v26 = vadd.f32 %v5348_v53, %v2619_v22  ;;  %v2654_v34 = vadd.f32 %v5348_v53, %v2620_v47 }
 0x872   : > { %v2445_v45 = vpop.f32.mrf.mxu0  ;;  %v2474_v21 = vpop.f32.mrf.mxu1  ;;  %v2555_v39 = vmax.f32 %v2501_v40, 0.0  ;;  %v2556_v44 = vmax.f32 %v2530_v55, 0.0 }
 0x873   : > { %v2557_v58 = vmax.f32 %v2445_v45, 0.0  ;;  %v2558_v11 = vmax.f32 %v2474_v21, 0.0 }
 0x874   : > { %v2588_v57 = vmul.f32 %v2555_v39, %v2555_v39  ;;  %v2589_v12 = vmul.f32 %v2556_v44, %v2556_v44 }
 0x875   : > { %v2590_v56 = vmul.f32 %v2557_v58, %v2557_v58  ;;  %v2591_v29 = vmul.f32 %v2558_v11, %v2558_v11 }
 0x876   : > { %v2621_v14 = vmul.f32 %v5344_v16, %v2588_v57  ;;  %v2622_v13 = vmul.f32 %v5344_v16, %v2589_v12 }
 0x877   : > { %v2623_v17 = vmul.f32 %v5344_v16, %v2590_v56  ;;  %v2624_v5 = vmul.f32 %v5344_v16, %v2591_v29 }
 0x878   : > { %v2655_v61 = vadd.f32 %v5348_v53, %v2621_v14  ;;  %v2656_v2 = vadd.f32 %v5348_v53, %v2622_v13 }
 0x879   : > { %v2657_v49 = vadd.f32 %v5348_v53, %v2623_v17  ;;  %v2658_v32 = vadd.f32 %v5348_v53, %v2624_v5  ;;  %v2503_v33 = vpop.f32.mrf.mxu2  ;;  %v2532_v51 = vpop.f32.mrf.mxu3 }
 0x87a   : > { %v2559_v27 = vmax.f32 %v2503_v33, 0.0  ;;  %v2560_v15 = vmax.f32 %v2532_v51, 0.0  ;;  %v2448_v0 = vpop.f32.mrf.mxu0  ;;  %v2477_v19 = vpop.f32.mrf.mxu1 }
 0x87b   : > { %v2681_v50 = vpack.c.bf16 %v2657_v49, %v2653_v26  ;;  %v2682_v23 = vpack.c.bf16 %v2658_v32, %v2654_v34  ;;  %v2561_v43 = vmax.f32 %v2448_v0, 0.0  ;;  %v2562_v48 = vmax.f32 %v2477_v19, 0.0 }
 0x87c   : > { %v2592_v60 = vmul.f32 %v2559_v27, %v2559_v27  ;;  %v2593_v42 = vmul.f32 %v2560_v15, %v2560_v15 }
 0x87d   : > { %2962 = vmatmul.bf16.gmra.mxu0 %v2681_v50  ;;  %2991 = vmatmul.bf16.gmra.mxu1 %v2682_v23  ;;  %v2594_v3 = vmul.f32 %v2561_v43, %v2561_v43  ;;  %v2595_v4 = vmul.f32 %v2562_v48, %v2562_v48 }
 0x87e   : > { %v2625_v28 = vmul.f32 %v5344_v16, %v2592_v60  ;;  %v2626_v62 = vmul.f32 %v5344_v16, %v2593_v42 }
 0x87f   : > { %v2627_v41 = vmul.f32 %v5344_v16, %v2594_v3  ;;  %v2628_v38 = vmul.f32 %v5344_v16, %v2595_v4 }
 0x880   : > { %v2659_v8 = vadd.f32 %v5348_v53, %v2625_v28  ;;  %v2660_v37 = vadd.f32 %v5348_v53, %v2626_v62 }
 0x881   : > { %v2506_v54 = vpop.f32.mrf.mxu2  ;;  %v2535_v18 = vpop.f32.mrf.mxu3  ;;  %v2661_v39 = vadd.f32 %v5348_v53, %v2627_v41  ;;  %v2662_v44 = vadd.f32 %v5348_v53, %v2628_v38 }
 0x882   : > { %v2450_v52 = vpop.f32.mrf.mxu0  ;;  %v2479_v6 = vpop.f32.mrf.mxu1  ;;  %v2683_v10 = vpack.c.bf16 %v2659_v8, %v2655_v61  ;;  %v2684_v9 = vpack.c.bf16 %v2660_v37, %v2656_v2  ;;  %v2563_v46 = vmax.f32 %v2506_v54, 0.0  ;;  %v2564_v20 = vmax.f32 %v2535_v18, 0.0 }
 0x883   : > { %v2565_v59 = vmax.f32 %v2450_v52, 0.0  ;;  %v2566_v1 = vmax.f32 %v2479_v6, 0.0 }
 0x884   : > { %3020 = vmatmul.bf16.gmra.mxu2 %v2683_v10  ;;  %3049 = vmatmul.bf16.gmra.mxu3 %v2684_v9  ;;  %v2596_v58 = vmul.f32 %v2563_v46, %v2563_v46  ;;  %v2597_v11 = vmul.f32 %v2564_v20, %v2564_v20 }
 0x885   : > { %v2598_v40 = vmul.f32 %v2565_v59, %v2565_v59  ;;  %v2599_v55 = vmul.f32 %v2566_v1, %v2566_v1 }
 0x886   : > { %v2629_v26 = vmul.f32 %v5344_v16, %v2596_v58  ;;  %v2630_v34 = vmul.f32 %v5344_v16, %v2597_v11 }
 0x887   : > { %v2631_v45 = vmul.f32 %v5344_v16, %v2598_v40  ;;  %v2632_v21 = vmul.f32 %v5344_v16, %v2599_v55 }
 0x888   : > { %v2663_v27 = vadd.f32 %v5348_v53, %v2629_v26  ;;  %v2664_v15 = vadd.f32 %v5348_v53, %v2630_v34 }
 0x889   : > { %v2665_v22 = vadd.f32 %v5348_v53, %v2631_v45  ;;  %v2666_v47 = vadd.f32 %v5348_v53, %v2632_v21  ;;  %v2508_v56 = vpop.f32.mrf.mxu2  ;;  %v2537_v29 = vpop.f32.mrf.mxu3 }
 0x88a   : > { %v2567_v17 = vmax.f32 %v2508_v56, 0.0  ;;  %v2568_v5 = vmax.f32 %v2537_v29, 0.0 }
 0x88b   : > { %v2685_v57 = vpack.c.bf16 %v2665_v22, %v2661_v39  ;;  %v2686_v12 = vpack.c.bf16 %v2666_v47, %v2662_v44 }
 0x88c   : > { %v2600_v49 = vmul.f32 %v2567_v17, %v2567_v17  ;;  %v2601_v32 = vmul.f32 %v2568_v5, %v2568_v5 }
 0x88d   : > { %2967 = vmatmul.bf16.gmra.mxu0 %v2685_v57  ;;  %2996 = vmatmul.bf16.gmra.mxu1 %v2686_v12 }
 0x88e   : > { %v2633_v33 = vmul.f32 %v5344_v16, %v2600_v49  ;;  %v2634_v51 = vmul.f32 %v5344_v16, %v2601_v32 }
 0x890   : > { %v2667_v0 = vadd.f32 %v5348_v53, %v2633_v33  ;;  %v2668_v19 = vadd.f32 %v5348_v53, %v2634_v51 }
 0x892   : > { %v2687_v50 = vpack.c.bf16 %v2667_v0, %v2663_v27  ;;  %v2688_v23 = vpack.c.bf16 %v2668_v19, %v2664_v15 }
 0x894   : > { %3025 = vmatmul.bf16.gmra.mxu2 %v2687_v50  ;;  %3054 = vmatmul.bf16.gmra.mxu3 %v2688_v23 }
 0x8a6   : > { %v2453_v14 = vpop.f32.mrf.mxu0  ;;  %v2482_v13 = vpop.f32.mrf.mxu1 }
 0x8a7   : > { %v2569_v60 = vmax.f32 %v2453_v14, 0.0  ;;  %v2570_v42 = vmax.f32 %v2482_v13, 0.0 }
 0x8a9   : > { %v2602_v43 = vmul.f32 %v2569_v60, %v2569_v60  ;;  %v2603_v48 = vmul.f32 %v2570_v42, %v2570_v42 }
 0x8ab   : > { %v2635_v54 = vmul.f32 %v5344_v16, %v2602_v43  ;;  %v2636_v18 = vmul.f32 %v5344_v16, %v2603_v48 }
 0x8ad   : > { %v2511_v28 = vpop.f32.mrf.mxu2  ;;  %v2540_v62 = vpop.f32.mrf.mxu3  ;;  %v2669_v46 = vadd.f32 %v5348_v53, %v2635_v54  ;;  %v2670_v20 = vadd.f32 %v5348_v53, %v2636_v18 }
 0x8ae   : > { %v2455_v61 = vpop.f32.mrf.mxu0  ;;  %v2484_v2 = vpop.f32.mrf.mxu1  ;;  %v2571_v3 = vmax.f32 %v2511_v28, 0.0  ;;  %v2572_v4 = vmax.f32 %v2540_v62, 0.0 }
 0x8af   : > { %v2573_v8 = vmax.f32 %v2455_v61, 0.0  ;;  %v2574_v37 = vmax.f32 %v2484_v2, 0.0 }
 0x8b0   : > { %v2604_v59 = vmul.f32 %v2571_v3, %v2571_v3  ;;  %v2605_v1 = vmul.f32 %v2572_v4, %v2572_v4 }
 0x8b1   : > { %v2606_v52 = vmul.f32 %v2573_v8, %v2573_v8  ;;  %v2607_v6 = vmul.f32 %v2574_v37, %v2574_v37 }
 0x8b2   : > { %v2637_v39 = vmul.f32 %v5344_v16, %v2604_v59  ;;  %v2638_v44 = vmul.f32 %v5344_v16, %v2605_v1 }
 0x8b3   : > { %v2639_v10 = vmul.f32 %v5344_v16, %v2606_v52  ;;  %v2640_v9 = vmul.f32 %v5344_v16, %v2607_v6 }
 0x8b4   : > { %v2671_v17 = vadd.f32 %v5348_v53, %v2637_v39  ;;  %v2672_v5 = vadd.f32 %v5348_v53, %v2638_v44 }
 0x8b5   : > { %v2673_v41 = vadd.f32 %v5348_v53, %v2639_v10  ;;  %v2674_v38 = vadd.f32 %v5348_v53, %v2640_v9  ;;  %v2513_v40 = vpop.f32.mrf.mxu2  ;;  %v2542_v55 = vpop.f32.mrf.mxu3 }
 0x8b6   : > { %v2575_v45 = vmax.f32 %v2513_v40, 0.0  ;;  %v2576_v21 = vmax.f32 %v2542_v55, 0.0 }
 0x8b7   : > { %v2689_v58 = vpack.c.bf16 %v2673_v41, %v2669_v46  ;;  %v2690_v11 = vpack.c.bf16 %v2674_v38, %v2670_v20 }
 0x8b8   : > { %v2608_v22 = vmul.f32 %v2575_v45, %v2575_v45  ;;  %v2609_v47 = vmul.f32 %v2576_v21, %v2576_v21 }
 0x8b9   : > { %2972 = vmatmul.bf16.gmra.mxu0 %v2689_v58  ;;  %3001 = vmatmul.bf16.gmra.mxu1 %v2690_v11 }
 0x8ba   : > { %v2641_v56 = vmul.f32 %v5344_v16, %v2608_v22  ;;  %v2642_v29 = vmul.f32 %v5344_v16, %v2609_v47 }
 0x8bc   : > { %v2675_v57 = vadd.f32 %v5348_v53, %v2641_v56  ;;  %v2676_v12 = vadd.f32 %v5348_v53, %v2642_v29  ;;  %v2958_v49 = vpop.f32.mrf.mxu0  ;;  %v2987_v32 = vpop.f32.mrf.mxu1 }
 0x8bd   : > { %v2988_v33 = vadd.f32 %v2987_v32, %v2958_v49 }
 0x8be   : > { %v2691_v26 = vpack.c.bf16 %v2675_v57, %v2671_v17  ;;  %v2692_v34 = vpack.c.bf16 %v2676_v12, %v2672_v5 }
 0x8c0   : > { %3030 = vmatmul.bf16.gmra.mxu2 %v2691_v26  ;;  %3059 = vmatmul.bf16.gmra.mxu3 %v2692_v34 }
 0x8c4   : > { %v2960_v0 = vpop.f32.mrf.mxu0  ;;  %v2989_v19 = vpop.f32.mrf.mxu1 }
 0x8c5   : > { %v2990_v23 = vadd.f32 %v2989_v19, %v2960_v0 }
 0x8c9   : > { %v3016_v51 = vpop.f32.mrf.mxu2  ;;  %v3045_v27 = vpop.f32.mrf.mxu3 }
 0x8ca   : > { %v3017_v15 = vadd.f32 %v3016_v51, %v2988_v33 }
 0x8cc   : > { %v3046_v16 = vadd.f32 %v3045_v27, %v3017_v15 }
 0x8ce   : > { %v3065_v50 = vadd.f32 %v3046_v16, %v5224_v30 }
 0x8d0   : > { %3073 = vst [vmem:[%s5415_s16] sm:$0xff] %v3065_v50 }
 0x8d1   : > { %v3018_v53 = vpop.f32.mrf.mxu2  ;;  %v3047_v13 = vpop.f32.mrf.mxu3 }
 0x8d2   : > { %v3019_v14 = vadd.f32 %v3018_v53, %v2990_v23 }
 0x8d4   : > { %v3048_v60 = vadd.f32 %v3047_v13, %v3019_v14 }
 0x8d6   : > { %v3066_v42 = vadd.f32 %v3048_v60, %v5228_v7 }
 0x8d8   : > { %3074 = vst [vmem:[%s5415_s16 + $0x8] sm:$0xff] %v3066_v42 }
 0x8fa   : > { %v2963_v43 = vpop.f32.mrf.mxu0  ;;  %v2992_v48 = vpop.f32.mrf.mxu1 }
 0x8fb   : > { %v2993_v28 = vadd.f32 %v2992_v48, %v2963_v43 }
 0x902   : > { %v2965_v62 = vpop.f32.mrf.mxu0  ;;  %v2994_v30 = vpop.f32.mrf.mxu1 }
 0x903   : > { %v2995_v4 = vadd.f32 %v2994_v30, %v2965_v62 }
 0x907   : > { %v3021_v61 = vpop.f32.mrf.mxu2  ;;  %v3050_v2 = vpop.f32.mrf.mxu3 }
 0x908   : > { %v3022_v8 = vadd.f32 %v3021_v61, %v2993_v28 }
 0x90a   : > { %v3051_v37 = vadd.f32 %v3050_v2, %v3022_v8  ;;  %v2968_v7 = vpop.f32.mrf.mxu0  ;;  %v2997_v6 = vpop.f32.mrf.mxu1 }
 0x90b   : > { %v2998_v59 = vadd.f32 %v2997_v6, %v2968_v7 }
 0x90c   : > { %v3067_v3 = vadd.f32 %v3051_v37, %v5232_v35 }
 0x90e   : > { %3075 = vst [vmem:[%s5415_s16 + $0x10] sm:$0xff] %v3067_v3 }
 0x90f   : > { %v3023_v54 = vpop.f32.mrf.mxu2  ;;  %v3052_v18 = vpop.f32.mrf.mxu3 }
 0x910   : > { %v3024_v52 = vadd.f32 %v3023_v54, %v2995_v4 }
 0x912   : > { %v3053_v10 = vadd.f32 %v3052_v18, %v3024_v52  ;;  %v2970_v38 = vpop.f32.mrf.mxu0  ;;  %v2999_v35 = vpop.f32.mrf.mxu1 }
 0x913   : > { %v3000_v55 = vadd.f32 %v2999_v35, %v2970_v38 }
 0x914   : > { %v3068_v9 = vadd.f32 %v3053_v10, %v5236_v24 }
 0x916   : > { %3076 = vst [vmem:[%s5415_s16 + $0x18] sm:$0xff] %v3068_v9 }
 0x917   : > { %v3026_v1 = vpop.f32.mrf.mxu2  ;;  %v3055_v46 = vpop.f32.mrf.mxu3 }
 0x918   : > { %v3027_v20 = vadd.f32 %v3026_v1, %v2998_v59 }
 0x91a   : > { %v3056_v41 = vadd.f32 %v3055_v46, %v3027_v20 }
 0x91c   : > { %v3069_v40 = vadd.f32 %v3056_v41, %v5240_v25 }
 0x91e   : > { %3077 = vst [vmem:[%s5415_s16 + $0x20] sm:$0xff] %v3069_v40 }
 0x91f   : > { %v3028_v45 = vpop.f32.mrf.mxu2  ;;  %v3057_v58 = vpop.f32.mrf.mxu3 }
 0x920   : > { %v3029_v21 = vadd.f32 %v3028_v45, %v3000_v55 }
 0x922   : > { %v3058_v11 = vadd.f32 %v3057_v58, %v3029_v21 }
 0x924   : > { %v3070_v24 = vadd.f32 %v3058_v11, %v5244_v63 }
 0x926   : > { %3078 = vst [vmem:[%s5415_s16 + $0x28] sm:$0xff] %v3070_v24 }
 0x936   : > { %v2973_v39 = vpop.f32.mrf.mxu0  ;;  %v3002_v44 = vpop.f32.mrf.mxu1 }
 0x937   : > { %v3003_v22 = vadd.f32 %v3002_v44, %v2973_v39 }
 0x93e   : > { %v2975_v25 = vpop.f32.mrf.mxu0  ;;  %v3004_v5 = vpop.f32.mrf.mxu1 }
 0x93f   : > { %v3005_v63 = vadd.f32 %v3004_v5, %v2975_v25 }
 0x943   : > { %v3031_v47 = vpop.f32.mrf.mxu2  ;;  %v3060_v56 = vpop.f32.mrf.mxu3 }
 0x944   : > { %v3032_v29 = vadd.f32 %v3031_v47, %v3003_v22 }
 0x946   : > { %v3061_v17 = vadd.f32 %v3060_v56, %v3032_v29 }
 0x948   : > { %v3071_v57 = vadd.f32 %v3061_v17, %v5248_v36 }
 0x94a   : > { %3079 = vst [vmem:[%s5415_s16 + $0x30] sm:$0xff] %v3071_v57 }
 0x94b   : > { %v3033_v12 = vpop.f32.mrf.mxu2  ;;  %v3062_v34 = vpop.f32.mrf.mxu3 }
 0x94c   : > { %v3034_v26 = vadd.f32 %v3033_v12, %v3005_v63 }
 0x94e   : > { %v3063_v49 = vadd.f32 %v3062_v34, %v3034_v26 }
 0x950   : > { %v3072_v32 = vadd.f32 %v3063_v49, %v5262_v31 }
 0x952   : > { %3080 = vst [vmem:[%s5415_s16 + $0x38] sm:$0xff] %v3072_v32 }
 0x953   : > { %4306 = shalt.err (!%p4303_p9)
}
 0x954   : > { %s4381_s17 = smov 128   ;;  %s4382_s10 = smov 8  }
 0x955   : > { %3817 = dma.vmem_to_hbm [thread:$0]  (%p4525_p5), %s3095_s2, 1024, %s3097_s3, %s3082_s12, %s4381_s17, %s4381_s17, %s4382_s10  }
 0x956 PF: > { %s3111_s16 = sand.u32 1, %s4349_s27   ;;  %p5488_p10 = scmp.ge.s32.totalorder %s4361_s30, 2 }
 0x957   : > { %s3112_s20 = scalar_lea.sflag [#allocation5], %s3111_s16 }
 0x958   : > { %p3843_p13 = pnand %p5488_p10, %p4529_p6 }
 0x95a   : > { %p3844_p11 = pneg %p3843_p13 }
 0x95c   : > { %4344 = dma.done.wait (%p3844_p11), %s3112_s20, 1024  }
 0x95d   : > { %4346 = vsyncadd (%p3844_p11), %s3112_s20, 4294966272  ;;  %p25_p0 = scmp.ge.s32.totalorder %s4499_s18, 4   ;;  %s5489_s27 = smov %s4353_s28 }
 0x95e   : > { %s5490_s28 = smov %s4357_s29  ;;  %s5491_s29 = smov %s4510_s25 }
 0x95f   : > { %s5492_s30 = smov %s4499_s18  ;;  %27 = sbr.rel (!%p25_p0) target bundleno = 13 (0xd), region = 122 }
 0x964   :  { %3118 = vsyncpa [#allocation4], 1 }
 0x965   :  { %3120 = vsyncpa [#allocation4 + $0x1], 1 }
 0x966   :  { %3121 = vsyncpa [#allocation8], 1 }
 0x967   :  { %3122 = vsyncpa [#allocation11], 1 }
 0x968   :  { %3123 = vsyncpa [#allocation14], 1 }
 0x969   :  { %3124 = vsyncpa [#allocation5], 1 }
 0x96a   :  { %3126 = vsyncpa [#allocation5 + $0x1], 1 }
 0x96b   :  { %3127 = vsyncpa [#allocation6], 1 }
 0x96c   :  { %3129 = vsyncpa [#allocation6 + $0x1], 1 }

</bundles_post_ra>
